<compile_context>
chip_gen: v6e
topology: v6e:2x2x1
jax: 0.10.0
libtpu: 0.0.40
codegen_flags: <defaults>
</compile_context>

<pallas_src>
import functools

import jax
import jax.numpy as jnp
import numpy as np
from jax.experimental import pallas as pl
from jax.experimental.pallas import tpu as pltpu


# -----------------------------------------------------------------------------
# Fused Pallas kernel: TCN encoder + dual GRU decoders
# -----------------------------------------------------------------------------
def _basic_block_kernel(*refs, B, T, F, K, channels, H, steps_f, steps_e):
    it = iter(refs)
    x_ref = next(it)

    # per-layer conv weights: (w1, b1, w2, b2[, wres, bres])
    layer_refs = []
    cin = F
    for cout in channels:
        n = 6 if cin != cout else 4
        layer_refs.append(tuple(next(it) for _ in range(n)))
        cin = cout

    fdec = tuple(next(it) for _ in range(6))   # wih, whh, bih, bhh, wfc, bfc
    edec = tuple(next(it) for _ in range(6))

    fore_ref = next(it)                         # [B, steps_f]
    est_ref = next(it)                          # [B, steps_e]
    xpad_ref = next(it)                         # VMEM scratch [B, T+pad_max, c_max]

    x = x_ref[...]                              # [B, T, F]

    # ------------------------ TCN encoder (VMEM resident) -------------------
    def causal_conv(v, w_ref, b_ref, cin, cout, dil):
        """Dilated causal conv as one im2col matmul; left-pad via scratch."""
        pad = (K - 1) * dil
        xpad_ref[...] = jnp.zeros_like(xpad_ref)
        xpad_ref[:, pad:pad + T, :cin] = v
        cols = jnp.concatenate(
            [xpad_ref[:, k * dil:k * dil + T, :cin] for k in range(K)], axis=-1)
        w = w_ref[...].reshape(K * cin, cout)
        out = jnp.dot(cols.reshape(B * T, K * cin), w,
                      preferred_element_type=jnp.float32) + b_ref[...]
        return out.reshape(B, T, cout)

    h = x
    cin = F
    for li, cout in enumerate(channels):
        dil = 2 ** li
        lr = layer_refs[li]
        out = jnp.maximum(causal_conv(h, lr[0], lr[1], cin, cout, dil), 0.0)
        out = jnp.maximum(causal_conv(out, lr[2], lr[3], cout, cout, dil), 0.0)
        if len(lr) == 6:   # 1x1-conv residual when cin != cout
            res = (jnp.dot(h.reshape(B * T, cin), lr[4][...],
                           preferred_element_type=jnp.float32)
                   + lr[5][...]).reshape(B, T, cout)
        else:
            res = h
        h = jnp.maximum(out + res, 0.0)
        cin = cout

    hidden = h[:, T - 1, :]                     # [B, H] == PyTorch (1, B, H) hidden

    # ------------------------ dual GRU decoders -----------------------------
    # hoist all weight/bias loads out of the unrolled rollout
    wih_f, whh_f, bih_f, bhh_f = fdec[0][...], fdec[1][...], fdec[2][...], fdec[3][...]
    wfc_f, bfc_f = fdec[4][...], fdec[5][...]
    wih_e, whh_e, bih_e, bhh_e = edec[0][...], edec[1][...], edec[2][...], edec[3][...]
    wfc_e, bfc_e = edec[4][...], edec[5][...]

    def gru_step(x_in, hprev, wih, whh, bih, bhh, wfc, bfc):
        gi = x_in * wih + bih                                     # input size 1 -> VPU
        gh = jnp.dot(hprev, whh, preferred_element_type=jnp.float32) + bhh
        r = jax.nn.sigmoid(gi[:, 0:H] + gh[:, 0:H])
        z = jax.nn.sigmoid(gi[:, H:2 * H] + gh[:, H:2 * H])
        n = jnp.tanh(gi[:, 2 * H:3 * H] + r * gh[:, 2 * H:3 * H])
        hnew = (1.0 - z) * n + z * hprev
        o = jnp.dot(hnew, wfc, preferred_element_type=jnp.float32) + bfc   # [B, 1]
        return o, hnew

    x_f = x[:, T - 1, 0:1]                      # inputs[:, 0, -1] -> (B, 1)
    x_e = x[:, 0, 0:1]                          # inputs[:, 0, 0]  -> (B, 1)
    h_f = hidden
    h_e = hidden
    f_outs, e_outs = [], []
    # TODO(synk): if steps grow beyond ~16, switch to lax.fori_loop(unroll=k)
    # with a stacked VMEM output scratch to bound vreg live ranges.
    for t in range(max(steps_f, steps_e)):      # two independent chains, interleaved
        if t < steps_f:
            x_f, h_f = gru_step(x_f, h_f, wih_f, whh_f, bih_f, bhh_f, wfc_f, bfc_f)
            f_outs.append(x_f)
        if t < steps_e:
            x_e, h_e = gru_step(x_e, h_e, wih_e, whh_e, bih_e, bhh_e, wfc_e, bfc_e)
            e_outs.append(x_e)

    # single lane-contiguous store per decoder
    fore_ref[...] = jnp.concatenate(f_outs, axis=-1)
    est_ref[...] = jnp.concatenate(e_outs, axis=-1)


# -----------------------------------------------------------------------------
# Wrapper
# -----------------------------------------------------------------------------
def basic_block_forward(x, params, forecast_seqlen, estimate_seqlen):
    """x: [B, seq_len, features]  (same as the PyTorch module's `inputs`)."""
    B, T, F = x.shape
    assert estimate_seqlen == T   # mirrors `input_main.shape == estimate_outputs.shape`

    tcn = params["tcn"]
    K = tcn[0]["w1"].shape[0]
    channels = tuple(ly["w1"].shape[2] for ly in tcn)
    H = channels[-1]
    pad_max = (K - 1) * (2 ** (len(channels) - 1))
    c_max = max(F, max(channels))

    flat = [x]
    for ly in tcn:
        flat += [ly["w1"], ly["b1"], ly["w2"], ly["b2"]]
        if ly["wres"] is not None:
            flat += [ly["wres"], ly["bres"]]
    for d in (params["f_dec"], params["e_dec"]):
        flat += [d["wih"], d["whh"], d["bih"], d["bhh"], d["wfc"], d["bfc"]]

    kernel = functools.partial(
        _basic_block_kernel, B=B, T=T, F=F, K=K, channels=channels, H=H,
        steps_f=forecast_seqlen, steps_e=estimate_seqlen)

    forecast, estimate = pl.pallas_call(
        kernel,
        out_shape=(jax.ShapeDtypeStruct((B, forecast_seqlen), jnp.float32),
                   jax.ShapeDtypeStruct((B, estimate_seqlen), jnp.float32)),
        scratch_shapes=[pltpu.VMEM((B, T + pad_max, c_max), jnp.float32)],
    )(*flat)

    input_main = x[:, :, 0]                                    # (B, T)
    forecast_out = forecast[:, :, None]                        # (B, forecast_seqlen, 1)
    residual_out = (input_main - estimate)[:, :, None]         # (B, estimate_seqlen, 1)
    return forecast_out, residual_out


# -----------------------------------------------------------------------------
# Parameter construction (deterministic, synthetic)
# -----------------------------------------------------------------------------
def make_params(key, input_size, channels, kernel_size, hidden_size):
    def nrm(k, shape):
        return 0.1 * jax.random.normal(k, shape, dtype=jnp.float32)

    params = {"tcn": []}
    for i, out_ch in enumerate(channels):
        in_ch = input_size if i == 0 else channels[i - 1]
        key, k1, k2, k3, k4, k5, k6 = jax.random.split(key, 7)
        params["tcn"].append({
            "w1": nrm(k1, (kernel_size, in_ch, out_ch)),
            "b1": nrm(k2, (1, out_ch)),
            "w2": nrm(k3, (kernel_size, out_ch, out_ch)),
            "b2": nrm(k4, (1, out_ch)),
            "wres": nrm(k5, (in_ch, out_ch)) if in_ch != out_ch else None,
            "bres": nrm(k6, (1, out_ch)) if in_ch != out_ch else None,
        })

    def make_dec(k):
        H = hidden_size
        ks = jax.random.split(k, 6)
        return {   # gate order (r, z, n), packed along lanes
            "wih": nrm(ks[0], (1, 3 * H)),
            "whh": nrm(ks[1], (H, 3 * H)),
            "bih": nrm(ks[2], (1, 3 * H)),
            "bhh": nrm(ks[3], (1, 3 * H)),
            "wfc": nrm(ks[4], (H, 1)),
            "bfc": nrm(ks[5], (1, 1)),
        }

    key, kf, ke = jax.random.split(key, 3)
    params["f_dec"] = make_dec(kf)
    params["e_dec"] = make_dec(ke)
    return params


# -----------------------------------------------------------------------------
# Pure-JAX reference (same math) for a correctness check
# -----------------------------------------------------------------------------
def _reference_forward(x, params, forecast_seqlen, estimate_seqlen):
    B, T, _ = x.shape
    K = params["tcn"][0]["w1"].shape[0]
    hp = jax.lax.Precision.HIGHEST

    h = x
    for li, ly in enumerate(params["tcn"]):
        dil = 2 ** li
        pad = (K - 1) * dil

        def conv(v, w, b):
            cin, cout = v.shape[-1], w.shape[-1]
            vp = jnp.pad(v, ((0, 0), (pad, 0), (0, 0)))
            cols = jnp.concatenate(
                [vp[:, k * dil:k * dil + T, :] for k in range(K)], axis=-1)
            o = jnp.dot(cols.reshape(B * T, K * cin), w.reshape(K * cin, cout),
                        precision=hp) + b
            return o.reshape(B, T, cout)

        out = jnp.maximum(conv(h, ly["w1"], ly["b1"]), 0.0)
        out = jnp.maximum(conv(out, ly["w2"], ly["b2"]), 0.0)
        if ly["wres"] is not None:
            cin = h.shape[-1]
            res = (jnp.dot(h.reshape(B * T, cin), ly["wres"], precision=hp)
                   + ly["bres"]).reshape(B, T, -1)
        else:
            res = h
        h = jnp.maximum(out + res, 0.0)

    hidden = h[:, -1, :]
    H = hidden.shape[-1]

    def rollout(x0, h0, d, steps):
        xh, hh, outs = x0, h0, []
        for _ in range(steps):
            gi = xh * d["wih"] + d["bih"]
            gh = jnp.dot(hh, d["whh"], precision=hp) + d["bhh"]
            r = jax.nn.sigmoid(gi[:, 0:H] + gh[:, 0:H])
            z = jax.nn.sigmoid(gi[:, H:2 * H] + gh[:, H:2 * H])
            n = jnp.tanh(gi[:, 2 * H:3 * H] + r * gh[:, 2 * H:3 * H])
            hh = (1.0 - z) * n + z * hh
            xh = jnp.dot(hh, d["wfc"], precision=hp) + d["bfc"]
            outs.append(xh)
        return jnp.concatenate(outs, axis=-1)

    fore = rollout(x[:, -1, 0:1], hidden, params["f_dec"], forecast_seqlen)
    est = rollout(x[:, 0, 0:1], hidden, params["e_dec"], estimate_seqlen)
    return fore[:, :, None], (x[:, :, 0] - est)[:, :, None]


# -----------------------------------------------------------------------------
if __name__ == "__main__":
    batch_size = 2
    seq_len = 8              # estimate_seqlen must equal the input seq_len
    input_size = 4
    encoder_num_channels = [16, 32]
    kernel_size = 5
    forecast_seqlen = 6
    estimate_seqlen = seq_len
    hidden_size = encoder_num_channels[-1]

    key = jax.random.PRNGKey(0)
    key, kx, kp = jax.random.split(key, 3)
    x = jax.random.normal(kx, (batch_size, seq_len, input_size), dtype=jnp.float32)
    params = make_params(kp, input_size, encoder_num_channels, kernel_size, hidden_size)

    fwd = jax.jit(functools.partial(basic_block_forward,
                                    forecast_seqlen=forecast_seqlen,
                                    estimate_seqlen=estimate_seqlen))
    forecast, residual = fwd(x, params)
    jax.block_until_ready((forecast, residual))

    assert forecast.shape == (batch_size, forecast_seqlen, 1)
    assert residual.shape == (batch_size, estimate_seqlen, 1)

    ref_f, ref_r = _reference_forward(x, params, forecast_seqlen, estimate_seqlen)
    np.testing.assert_allclose(np.asarray(forecast), np.asarray(ref_f),
                               rtol=2e-2, atol=2e-3)
    np.testing.assert_allclose(np.asarray(residual), np.asarray(ref_r),
                               rtol=2e-2, atol=2e-3)

    print("KERNEL_OK")
</pallas_src>

<mosaic_0001>
module attributes {stable_mosaic.version = 11 : i64} {
  func.func @_basic_block_kernel(%arg0: memref<2x8x4xf32, #tpu.memory_space<vmem>>, %arg1: memref<5x4x16xf32, #tpu.memory_space<vmem>>, %arg2: memref<1x16xf32, #tpu.memory_space<vmem>>, %arg3: memref<5x16x16xf32, #tpu.memory_space<vmem>>, %arg4: memref<1x16xf32, #tpu.memory_space<vmem>>, %arg5: memref<4x16xf32, #tpu.memory_space<vmem>>, %arg6: memref<1x16xf32, #tpu.memory_space<vmem>>, %arg7: memref<5x16x32xf32, #tpu.memory_space<vmem>>, %arg8: memref<1x32xf32, #tpu.memory_space<vmem>>, %arg9: memref<5x32x32xf32, #tpu.memory_space<vmem>>, %arg10: memref<1x32xf32, #tpu.memory_space<vmem>>, %arg11: memref<16x32xf32, #tpu.memory_space<vmem>>, %arg12: memref<1x32xf32, #tpu.memory_space<vmem>>, %arg13: memref<1x96xf32, #tpu.memory_space<vmem>>, %arg14: memref<32x96xf32, #tpu.memory_space<vmem>>, %arg15: memref<1x96xf32, #tpu.memory_space<vmem>>, %arg16: memref<1x96xf32, #tpu.memory_space<vmem>>, %arg17: memref<32x1xf32, #tpu.memory_space<vmem>>, %arg18: memref<1x1xf32, #tpu.memory_space<vmem>>, %arg19: memref<1x96xf32, #tpu.memory_space<vmem>>, %arg20: memref<32x96xf32, #tpu.memory_space<vmem>>, %arg21: memref<1x96xf32, #tpu.memory_space<vmem>>, %arg22: memref<1x96xf32, #tpu.memory_space<vmem>>, %arg23: memref<32x1xf32, #tpu.memory_space<vmem>>, %arg24: memref<1x1xf32, #tpu.memory_space<vmem>>, %arg25: memref<2x6xf32, #tpu.memory_space<vmem>>, %arg26: memref<2x8xf32, #tpu.memory_space<vmem>>, %arg27: memref<2x16x32xf32, #tpu.memory_space<vmem>>) attributes {dimension_semantics = [], scalar_prefetch = 0 : i64, scratch_operands = 1 : i64, tpu.core_type = #tpu.core_type<tc>} {
    %c0 = arith.constant 0 : index
    %c0_0 = arith.constant 0 : index
    %c0_1 = arith.constant 0 : index
    %0 = vector.load %arg0[%c0, %c0_0, %c0_1] : memref<2x8x4xf32, #tpu.memory_space<vmem>>, vector<2x8x4xf32>
    %cst = arith.constant 0.000000e+00 : f32
    %1 = vector.broadcast %cst : f32 to vector<2x16x32xf32>
    %c0_2 = arith.constant 0 : index
    %c0_3 = arith.constant 0 : index
    %c0_4 = arith.constant 0 : index
    %2 = vector.load %arg27[%c0_2, %c0_3, %c0_4] : memref<2x16x32xf32, #tpu.memory_space<vmem>>, vector<2x16x32xf32>
    tpu.vector_store %arg27[%c0_2, %c0_3, %c0_4], %1 {strides = array<i32>} : memref<2x16x32xf32, #tpu.memory_space<vmem>>, vector<2x16x32xf32>,
    %c0_5 = arith.constant 0 : index
    %c4 = arith.constant 4 : index
    %c0_6 = arith.constant 0 : index
    %3 = vector.load %arg27[%c0_5, %c4, %c0_6] : memref<2x16x32xf32, #tpu.memory_space<vmem>>, vector<2x8x4xf32>
    tpu.vector_store %arg27[%c0_5, %c4, %c0_6], %0 {strides = array<i32>} : memref<2x16x32xf32, #tpu.memory_space<vmem>>, vector<2x8x4xf32>,
    %c0_7 = arith.constant 0 : index
    %c0_8 = arith.constant 0 : index
    %c0_9 = arith.constant 0 : index
    %4 = vector.load %arg27[%c0_7, %c0_8, %c0_9] : memref<2x16x32xf32, #tpu.memory_space<vmem>>, vector<2x8x4xf32>
    %c0_10 = arith.constant 0 : index
    %c1 = arith.constant 1 : index
    %c0_11 = arith.constant 0 : index
    %5 = vector.load %arg27[%c0_10, %c1, %c0_11] : memref<2x16x32xf32, #tpu.memory_space<vmem>>, vector<2x8x4xf32>
    %c0_12 = arith.constant 0 : index
    %c2 = arith.constant 2 : index
    %c0_13 = arith.constant 0 : index
    %6 = vector.load %arg27[%c0_12, %c2, %c0_13] : memref<2x16x32xf32, #tpu.memory_space<vmem>>, vector<2x8x4xf32>
    %c0_14 = arith.constant 0 : index
    %c3 = arith.constant 3 : index
    %c0_15 = arith.constant 0 : index
    %7 = vector.load %arg27[%c0_14, %c3, %c0_15] : memref<2x16x32xf32, #tpu.memory_space<vmem>>, vector<2x8x4xf32>
    %c0_16 = arith.constant 0 : index
    %c4_17 = arith.constant 4 : index
    %c0_18 = arith.constant 0 : index
    %8 = vector.load %arg27[%c0_16, %c4_17, %c0_18] : memref<2x16x32xf32, #tpu.memory_space<vmem>>, vector<2x8x4xf32>
    %9 = tpu.concatenate %4, %5, %6, %7, %8 in 2 : vector<2x8x4xf32>, vector<2x8x4xf32>, vector<2x8x4xf32>, vector<2x8x4xf32>, vector<2x8x4xf32> -> vector<2x8x20xf32>
    %c0_19 = arith.constant 0 : index
    %c0_20 = arith.constant 0 : index
    %c0_21 = arith.constant 0 : index
    %10 = vector.load %arg1[%c0_19, %c0_20, %c0_21] : memref<5x4x16xf32, #tpu.memory_space<vmem>>, vector<5x4x16xf32>
    %11 = vector.shape_cast %10 : vector<5x4x16xf32> to vector<20x16xf32>
    %12 = vector.shape_cast %9 : vector<2x8x20xf32> to vector<16x20xf32>
    %cst_22 = arith.constant dense<0.000000e+00> : vector<16x16xf32>
    %13 = tpu.matmul %12, %11, %cst_22 {dimension_numbers = #tpu.dot_dimension_numbers<[1], [0], [0], [1], [0, 0, 1, 1], [], []>} : vector<16x20xf32>, vector<20x16xf32>, vector<16x16xf32> -> vector<16x16xf32>
    %c0_23 = arith.constant 0 : index
    %c0_24 = arith.constant 0 : index
    %14 = vector.load %arg2[%c0_23, %c0_24] : memref<1x16xf32, #tpu.memory_space<vmem>>, vector<1x16xf32>
    %15 = vector.broadcast %14 : vector<1x16xf32> to vector<16x16xf32>
    %16 = arith.addf %13, %15 : vector<16x16xf32>
    %17 = vector.shape_cast %16 : vector<16x16xf32> to vector<2x8x16xf32>
    %cst_25 = arith.constant 0.000000e+00 : f32
    %18 = vector.broadcast %cst_25 : f32 to vector<2x8x16xf32>
    %19 = arith.maximumf %17, %18 : vector<2x8x16xf32>
    %cst_26 = arith.constant 0.000000e+00 : f32
    %20 = vector.broadcast %cst_26 : f32 to vector<2x16x32xf32>
    %c0_27 = arith.constant 0 : index
    %c0_28 = arith.constant 0 : index
    %c0_29 = arith.constant 0 : index
    %21 = vector.load %arg27[%c0_27, %c0_28, %c0_29] : memref<2x16x32xf32, #tpu.memory_space<vmem>>, vector<2x16x32xf32>
    tpu.vector_store %arg27[%c0_27, %c0_28, %c0_29], %20 {strides = array<i32>} : memref<2x16x32xf32, #tpu.memory_space<vmem>>, vector<2x16x32xf32>,
    %c0_30 = arith.constant 0 : index
    %c4_31 = arith.constant 4 : index
    %c0_32 = arith.constant 0 : index
    %22 = vector.load %arg27[%c0_30, %c4_31, %c0_32] : memref<2x16x32xf32, #tpu.memory_space<vmem>>, vector<2x8x16xf32>
    tpu.vector_store %arg27[%c0_30, %c4_31, %c0_32], %19 {strides = array<i32>} : memref<2x16x32xf32, #tpu.memory_space<vmem>>, vector<2x8x16xf32>,
    %c0_33 = arith.constant 0 : index
    %c0_34 = arith.constant 0 : index
    %c0_35 = arith.constant 0 : index
    %23 = vector.load %arg27[%c0_33, %c0_34, %c0_35] : memref<2x16x32xf32, #tpu.memory_space<vmem>>, vector<2x8x16xf32>
    %c0_36 = arith.constant 0 : index
    %c1_37 = arith.constant 1 : index
    %c0_38 = arith.constant 0 : index
    %24 = vector.load %arg27[%c0_36, %c1_37, %c0_38] : memref<2x16x32xf32, #tpu.memory_space<vmem>>, vector<2x8x16xf32>
    %c0_39 = arith.constant 0 : index
    %c2_40 = arith.constant 2 : index
    %c0_41 = arith.constant 0 : index
    %25 = vector.load %arg27[%c0_39, %c2_40, %c0_41] : memref<2x16x32xf32, #tpu.memory_space<vmem>>, vector<2x8x16xf32>
    %c0_42 = arith.constant 0 : index
    %c3_43 = arith.constant 3 : index
    %c0_44 = arith.constant 0 : index
    %26 = vector.load %arg27[%c0_42, %c3_43, %c0_44] : memref<2x16x32xf32, #tpu.memory_space<vmem>>, vector<2x8x16xf32>
    %c0_45 = arith.constant 0 : index
    %c4_46 = arith.constant 4 : index
    %c0_47 = arith.constant 0 : index
    %27 = vector.load %arg27[%c0_45, %c4_46, %c0_47] : memref<2x16x32xf32, #tpu.memory_space<vmem>>, vector<2x8x16xf32>
    %28 = tpu.concatenate %23, %24, %25, %26, %27 in 2 : vector<2x8x16xf32>, vector<2x8x16xf32>, vector<2x8x16xf32>, vector<2x8x16xf32>, vector<2x8x16xf32> -> vector<2x8x80xf32>
    %c0_48 = arith.constant 0 : index
    %c0_49 = arith.constant 0 : index
    %c0_50 = arith.constant 0 : index
    %29 = vector.load %arg3[%c0_48, %c0_49, %c0_50] : memref<5x16x16xf32, #tpu.memory_space<vmem>>, vector<5x16x16xf32>
    %30 = vector.shape_cast %29 : vector<5x16x16xf32> to vector<80x16xf32>
    %31 = vector.shape_cast %28 : vector<2x8x80xf32> to vector<16x80xf32>
    %cst_51 = arith.constant dense<0.000000e+00> : vector<16x16xf32>
    %32 = tpu.matmul %31, %30, %cst_51 {dimension_numbers = #tpu.dot_dimension_numbers<[1], [0], [0], [1], [0, 0, 1, 1], [], []>} : vector<16x80xf32>, vector<80x16xf32>, vector<16x16xf32> -> vector<16x16xf32>
    %c0_52 = arith.constant 0 : index
    %c0_53 = arith.constant 0 : index
    %33 = vector.load %arg4[%c0_52, %c0_53] : memref<1x16xf32, #tpu.memory_space<vmem>>, vector<1x16xf32>
    %34 = vector.broadcast %33 : vector<1x16xf32> to vector<16x16xf32>
    %35 = arith.addf %32, %34 : vector<16x16xf32>
    %36 = vector.shape_cast %35 : vector<16x16xf32> to vector<2x8x16xf32>
    %cst_54 = arith.constant 0.000000e+00 : f32
    %37 = vector.broadcast %cst_54 : f32 to vector<2x8x16xf32>
    %38 = arith.maximumf %36, %37 : vector<2x8x16xf32>
    %39 = vector.shape_cast %0 : vector<2x8x4xf32> to vector<16x4xf32>
    %c0_55 = arith.constant 0 : index
    %c0_56 = arith.constant 0 : index
    %40 = vector.load %arg5[%c0_55, %c0_56] : memref<4x16xf32, #tpu.memory_space<vmem>>, vector<4x16xf32>
    %cst_57 = arith.constant dense<0.000000e+00> : vector<16x16xf32>
    %41 = tpu.matmul %39, %40, %cst_57 {dimension_numbers = #tpu.dot_dimension_numbers<[1], [0], [0], [1], [0, 0, 1, 1], [], []>} : vector<16x4xf32>, vector<4x16xf32>, vector<16x16xf32> -> vector<16x16xf32>
    %c0_58 = arith.constant 0 : index
    %c0_59 = arith.constant 0 : index
    %42 = vector.load %arg6[%c0_58, %c0_59] : memref<1x16xf32, #tpu.memory_space<vmem>>, vector<1x16xf32>
    %43 = vector.broadcast %42 : vector<1x16xf32> to vector<16x16xf32>
    %44 = arith.addf %41, %43 : vector<16x16xf32>
    %45 = vector.shape_cast %44 : vector<16x16xf32> to vector<2x8x16xf32>
    %46 = arith.addf %38, %45 : vector<2x8x16xf32>
    %cst_60 = arith.constant 0.000000e+00 : f32
    %47 = vector.broadcast %cst_60 : f32 to vector<2x8x16xf32>
    %48 = arith.maximumf %46, %47 : vector<2x8x16xf32>
    %cst_61 = arith.constant 0.000000e+00 : f32
    %49 = vector.broadcast %cst_61 : f32 to vector<2x16x32xf32>
    %c0_62 = arith.constant 0 : index
    %c0_63 = arith.constant 0 : index
    %c0_64 = arith.constant 0 : index
    %50 = vector.load %arg27[%c0_62, %c0_63, %c0_64] : memref<2x16x32xf32, #tpu.memory_space<vmem>>, vector<2x16x32xf32>
    tpu.vector_store %arg27[%c0_62, %c0_63, %c0_64], %49 {strides = array<i32>} : memref<2x16x32xf32, #tpu.memory_space<vmem>>, vector<2x16x32xf32>,
    %c0_65 = arith.constant 0 : index
    %c8 = arith.constant 8 : index
    %c0_66 = arith.constant 0 : index
    %51 = vector.load %arg27[%c0_65, %c8, %c0_66] : memref<2x16x32xf32, #tpu.memory_space<vmem>>, vector<2x8x16xf32>
    tpu.vector_store %arg27[%c0_65, %c8, %c0_66], %48 {strides = array<i32>} : memref<2x16x32xf32, #tpu.memory_space<vmem>>, vector<2x8x16xf32>,
    %c0_67 = arith.constant 0 : index
    %c0_68 = arith.constant 0 : index
    %c0_69 = arith.constant 0 : index
    %52 = vector.load %arg27[%c0_67, %c0_68, %c0_69] : memref<2x16x32xf32, #tpu.memory_space<vmem>>, vector<2x8x16xf32>
    %c0_70 = arith.constant 0 : index
    %c2_71 = arith.constant 2 : index
    %c0_72 = arith.constant 0 : index
    %53 = vector.load %arg27[%c0_70, %c2_71, %c0_72] : memref<2x16x32xf32, #tpu.memory_space<vmem>>, vector<2x8x16xf32>
    %c0_73 = arith.constant 0 : index
    %c4_74 = arith.constant 4 : index
    %c0_75 = arith.constant 0 : index
    %54 = vector.load %arg27[%c0_73, %c4_74, %c0_75] : memref<2x16x32xf32, #tpu.memory_space<vmem>>, vector<2x8x16xf32>
    %c0_76 = arith.constant 0 : index
    %c6 = arith.constant 6 : index
    %c0_77 = arith.constant 0 : index
    %55 = vector.load %arg27[%c0_76, %c6, %c0_77] : memref<2x16x32xf32, #tpu.memory_space<vmem>>, vector<2x8x16xf32>
    %c0_78 = arith.constant 0 : index
    %c8_79 = arith.constant 8 : index
    %c0_80 = arith.constant 0 : index
    %56 = vector.load %arg27[%c0_78, %c8_79, %c0_80] : memref<2x16x32xf32, #tpu.memory_space<vmem>>, vector<2x8x16xf32>
    %57 = tpu.concatenate %52, %53, %54, %55, %56 in 2 : vector<2x8x16xf32>, vector<2x8x16xf32>, vector<2x8x16xf32>, vector<2x8x16xf32>, vector<2x8x16xf32> -> vector<2x8x80xf32>
    %c0_81 = arith.constant 0 : index
    %c0_82 = arith.constant 0 : index
    %c0_83 = arith.constant 0 : index
    %58 = vector.load %arg7[%c0_81, %c0_82, %c0_83] : memref<5x16x32xf32, #tpu.memory_space<vmem>>, vector<5x16x32xf32>
    %59 = vector.shape_cast %58 : vector<5x16x32xf32> to vector<80x32xf32>
    %60 = vector.shape_cast %57 : vector<2x8x80xf32> to vector<16x80xf32>
    %cst_84 = arith.constant dense<0.000000e+00> : vector<16x32xf32>
    %61 = tpu.matmul %60, %59, %cst_84 {dimension_numbers = #tpu.dot_dimension_numbers<[1], [0], [0], [1], [0, 0, 1, 1], [], []>} : vector<16x80xf32>, vector<80x32xf32>, vector<16x32xf32> -> vector<16x32xf32>
    %c0_85 = arith.constant 0 : index
    %c0_86 = arith.constant 0 : index
    %62 = vector.load %arg8[%c0_85, %c0_86] : memref<1x32xf32, #tpu.memory_space<vmem>>, vector<1x32xf32>
    %63 = vector.broadcast %62 : vector<1x32xf32> to vector<16x32xf32>
    %64 = arith.addf %61, %63 : vector<16x32xf32>
    %65 = vector.shape_cast %64 : vector<16x32xf32> to vector<2x8x32xf32>
    %cst_87 = arith.constant 0.000000e+00 : f32
    %66 = vector.broadcast %cst_87 : f32 to vector<2x8x32xf32>
    %67 = arith.maximumf %65, %66 : vector<2x8x32xf32>
    %cst_88 = arith.constant 0.000000e+00 : f32
    %68 = vector.broadcast %cst_88 : f32 to vector<2x16x32xf32>
    %c0_89 = arith.constant 0 : index
    %c0_90 = arith.constant 0 : index
    %c0_91 = arith.constant 0 : index
    %69 = vector.load %arg27[%c0_89, %c0_90, %c0_91] : memref<2x16x32xf32, #tpu.memory_space<vmem>>, vector<2x16x32xf32>
    tpu.vector_store %arg27[%c0_89, %c0_90, %c0_91], %68 {strides = array<i32>} : memref<2x16x32xf32, #tpu.memory_space<vmem>>, vector<2x16x32xf32>,
    %c0_92 = arith.constant 0 : index
    %c8_93 = arith.constant 8 : index
    %c0_94 = arith.constant 0 : index
    %70 = vector.load %arg27[%c0_92, %c8_93, %c0_94] : memref<2x16x32xf32, #tpu.memory_space<vmem>>, vector<2x8x32xf32>
    tpu.vector_store %arg27[%c0_92, %c8_93, %c0_94], %67 {strides = array<i32>} : memref<2x16x32xf32, #tpu.memory_space<vmem>>, vector<2x8x32xf32>,
    %c0_95 = arith.constant 0 : index
    %c0_96 = arith.constant 0 : index
    %c0_97 = arith.constant 0 : index
    %71 = vector.load %arg27[%c0_95, %c0_96, %c0_97] : memref<2x16x32xf32, #tpu.memory_space<vmem>>, vector<2x8x32xf32>
    %c0_98 = arith.constant 0 : index
    %c2_99 = arith.constant 2 : index
    %c0_100 = arith.constant 0 : index
    %72 = vector.load %arg27[%c0_98, %c2_99, %c0_100] : memref<2x16x32xf32, #tpu.memory_space<vmem>>, vector<2x8x32xf32>
    %c0_101 = arith.constant 0 : index
    %c4_102 = arith.constant 4 : index
    %c0_103 = arith.constant 0 : index
    %73 = vector.load %arg27[%c0_101, %c4_102, %c0_103] : memref<2x16x32xf32, #tpu.memory_space<vmem>>, vector<2x8x32xf32>
    %c0_104 = arith.constant 0 : index
    %c6_105 = arith.constant 6 : index
    %c0_106 = arith.constant 0 : index
    %74 = vector.load %arg27[%c0_104, %c6_105, %c0_106] : memref<2x16x32xf32, #tpu.memory_space<vmem>>, vector<2x8x32xf32>
    %c0_107 = arith.constant 0 : index
    %c8_108 = arith.constant 8 : index
    %c0_109 = arith.constant 0 : index
    %75 = vector.load %arg27[%c0_107, %c8_108, %c0_109] : memref<2x16x32xf32, #tpu.memory_space<vmem>>, vector<2x8x32xf32>
    %76 = tpu.concatenate %71, %72, %73, %74, %75 in 2 : vector<2x8x32xf32>, vector<2x8x32xf32>, vector<2x8x32xf32>, vector<2x8x32xf32>, vector<2x8x32xf32> -> vector<2x8x160xf32>
    %c0_110 = arith.constant 0 : index
    %c0_111 = arith.constant 0 : index
    %c0_112 = arith.constant 0 : index
    %77 = vector.load %arg9[%c0_110, %c0_111, %c0_112] : memref<5x32x32xf32, #tpu.memory_space<vmem>>, vector<5x32x32xf32>
    %78 = vector.shape_cast %77 : vector<5x32x32xf32> to vector<160x32xf32>
    %79 = vector.shape_cast %76 : vector<2x8x160xf32> to vector<16x160xf32>
    %cst_113 = arith.constant dense<0.000000e+00> : vector<16x32xf32>
    %80 = tpu.matmul %79, %78, %cst_113 {dimension_numbers = #tpu.dot_dimension_numbers<[1], [0], [0], [1], [0, 0, 1, 1], [], []>} : vector<16x160xf32>, vector<160x32xf32>, vector<16x32xf32> -> vector<16x32xf32>
    %c0_114 = arith.constant 0 : index
    %c0_115 = arith.constant 0 : index
    %81 = vector.load %arg10[%c0_114, %c0_115] : memref<1x32xf32, #tpu.memory_space<vmem>>, vector<1x32xf32>
    %82 = vector.broadcast %81 : vector<1x32xf32> to vector<16x32xf32>
    %83 = arith.addf %80, %82 : vector<16x32xf32>
    %84 = vector.shape_cast %83 : vector<16x32xf32> to vector<2x8x32xf32>
    %cst_116 = arith.constant 0.000000e+00 : f32
    %85 = vector.broadcast %cst_116 : f32 to vector<2x8x32xf32>
    %86 = arith.maximumf %84, %85 : vector<2x8x32xf32>
    %87 = vector.shape_cast %48 : vector<2x8x16xf32> to vector<16x16xf32>
    %c0_117 = arith.constant 0 : index
    %c0_118 = arith.constant 0 : index
    %88 = vector.load %arg11[%c0_117, %c0_118] : memref<16x32xf32, #tpu.memory_space<vmem>>, vector<16x32xf32>
    %cst_119 = arith.constant dense<0.000000e+00> : vector<16x32xf32>
    %89 = tpu.matmul %87, %88, %cst_119 {dimension_numbers = #tpu.dot_dimension_numbers<[1], [0], [0], [1], [0, 0, 1, 1], [], []>} : vector<16x16xf32>, vector<16x32xf32>, vector<16x32xf32> -> vector<16x32xf32>
    %c0_120 = arith.constant 0 : index
    %c0_121 = arith.constant 0 : index
    %90 = vector.load %arg12[%c0_120, %c0_121] : memref<1x32xf32, #tpu.memory_space<vmem>>, vector<1x32xf32>
    %91 = vector.broadcast %90 : vector<1x32xf32> to vector<16x32xf32>
    %92 = arith.addf %89, %91 : vector<16x32xf32>
    %93 = vector.shape_cast %92 : vector<16x32xf32> to vector<2x8x32xf32>
    %94 = arith.addf %86, %93 : vector<2x8x32xf32>
    %cst_122 = arith.constant 0.000000e+00 : f32
    %95 = vector.broadcast %cst_122 : f32 to vector<2x8x32xf32>
    %96 = arith.maximumf %94, %95 : vector<2x8x32xf32>
    %97 = vector.extract_strided_slice %96 {offsets = [0, 7, 0], sizes = [2, 1, 32], strides = [1, 1, 1]} : vector<2x8x32xf32> to vector<2x1x32xf32>
    %98 = vector.shape_cast %97 : vector<2x1x32xf32> to vector<2x32xf32>
    %c0_123 = arith.constant 0 : index
    %c0_124 = arith.constant 0 : index
    %99 = vector.load %arg13[%c0_123, %c0_124] : memref<1x96xf32, #tpu.memory_space<vmem>>, vector<1x96xf32>
    %c0_125 = arith.constant 0 : index
    %c0_126 = arith.constant 0 : index
    %100 = vector.load %arg14[%c0_125, %c0_126] : memref<32x96xf32, #tpu.memory_space<vmem>>, vector<32x96xf32>
    %c0_127 = arith.constant 0 : index
    %c0_128 = arith.constant 0 : index
    %101 = vector.load %arg15[%c0_127, %c0_128] : memref<1x96xf32, #tpu.memory_space<vmem>>, vector<1x96xf32>
    %c0_129 = arith.constant 0 : index
    %c0_130 = arith.constant 0 : index
    %102 = vector.load %arg16[%c0_129, %c0_130] : memref<1x96xf32, #tpu.memory_space<vmem>>, vector<1x96xf32>
    %c0_131 = arith.constant 0 : index
    %c0_132 = arith.constant 0 : index
    %103 = vector.load %arg17[%c0_131, %c0_132] : memref<32x1xf32, #tpu.memory_space<vmem>>, vector<32x1xf32>
    %c0_133 = arith.constant 0 : index
    %c0_134 = arith.constant 0 : index
    %104 = vector.load %arg18[%c0_133, %c0_134] : memref<1x1xf32, #tpu.memory_space<vmem>>, vector<1x1xf32>
    %c0_135 = arith.constant 0 : index
    %c0_136 = arith.constant 0 : index
    %105 = vector.load %arg19[%c0_135, %c0_136] : memref<1x96xf32, #tpu.memory_space<vmem>>, vector<1x96xf32>
    %c0_137 = arith.constant 0 : index
    %c0_138 = arith.constant 0 : index
    %106 = vector.load %arg20[%c0_137, %c0_138] : memref<32x96xf32, #tpu.memory_space<vmem>>, vector<32x96xf32>
    %c0_139 = arith.constant 0 : index
    %c0_140 = arith.constant 0 : index
    %107 = vector.load %arg21[%c0_139, %c0_140] : memref<1x96xf32, #tpu.memory_space<vmem>>, vector<1x96xf32>
    %c0_141 = arith.constant 0 : index
    %c0_142 = arith.constant 0 : index
    %108 = vector.load %arg22[%c0_141, %c0_142] : memref<1x96xf32, #tpu.memory_space<vmem>>, vector<1x96xf32>
    %c0_143 = arith.constant 0 : index
    %c0_144 = arith.constant 0 : index
    %109 = vector.load %arg23[%c0_143, %c0_144] : memref<32x1xf32, #tpu.memory_space<vmem>>, vector<32x1xf32>
    %c0_145 = arith.constant 0 : index
    %c0_146 = arith.constant 0 : index
    %110 = vector.load %arg24[%c0_145, %c0_146] : memref<1x1xf32, #tpu.memory_space<vmem>>, vector<1x1xf32>
    %111 = vector.extract_strided_slice %0 {offsets = [0, 7, 0], sizes = [2, 1, 1], strides = [1, 1, 1]} : vector<2x8x4xf32> to vector<2x1x1xf32>
    %112 = vector.shape_cast %111 : vector<2x1x1xf32> to vector<2x1xf32>
    %113 = vector.extract_strided_slice %0 {offsets = [0, 0, 0], sizes = [2, 1, 1], strides = [1, 1, 1]} : vector<2x8x4xf32> to vector<2x1x1xf32>
    %114 = vector.shape_cast %113 : vector<2x1x1xf32> to vector<2x1xf32>
    %115 = vector.broadcast %112 : vector<2x1xf32> to vector<2x96xf32>
    %116 = vector.broadcast %99 : vector<1x96xf32> to vector<2x96xf32>
    %117 = arith.mulf %115, %116 : vector<2x96xf32>
    %118 = vector.broadcast %101 : vector<1x96xf32> to vector<2x96xf32>
    %119 = arith.addf %117, %118 : vector<2x96xf32>
    %cst_147 = arith.constant dense<0.000000e+00> : vector<2x96xf32>
    %120 = tpu.matmul %98, %100, %cst_147 {dimension_numbers = #tpu.dot_dimension_numbers<[1], [0], [0], [1], [0, 0, 1, 1], [], []>} : vector<2x32xf32>, vector<32x96xf32>, vector<2x96xf32> -> vector<2x96xf32>
    %121 = vector.broadcast %102 : vector<1x96xf32> to vector<2x96xf32>
    %122 = arith.addf %120, %121 : vector<2x96xf32>
    %123 = vector.extract_strided_slice %119 {offsets = [0, 0], sizes = [2, 32], strides = [1, 1]} : vector<2x96xf32> to vector<2x32xf32>
    %124 = vector.extract_strided_slice %122 {offsets = [0, 0], sizes = [2, 32], strides = [1, 1]} : vector<2x96xf32> to vector<2x32xf32>
    %125 = arith.addf %123, %124 : vector<2x32xf32>
    %126 = arith.negf %125 : vector<2x32xf32>
    %127 = math.exp %126 : vector<2x32xf32>
    %cst_148 = arith.constant 1.000000e+00 : f32
    %128 = vector.broadcast %cst_148 : f32 to vector<2x32xf32>
    %129 = arith.addf %128, %127 : vector<2x32xf32>
    %130 = arith.divf %128, %129 : vector<2x32xf32>
    %131 = vector.extract_strided_slice %119 {offsets = [0, 32], sizes = [2, 32], strides = [1, 1]} : vector<2x96xf32> to vector<2x32xf32>
    %132 = vector.extract_strided_slice %122 {offsets = [0, 32], sizes = [2, 32], strides = [1, 1]} : vector<2x96xf32> to vector<2x32xf32>
    %133 = arith.addf %131, %132 : vector<2x32xf32>
    %134 = arith.negf %133 : vector<2x32xf32>
    %135 = math.exp %134 : vector<2x32xf32>
    %cst_149 = arith.constant 1.000000e+00 : f32
    %136 = vector.broadcast %cst_149 : f32 to vector<2x32xf32>
    %137 = arith.addf %136, %135 : vector<2x32xf32>
    %138 = arith.divf %136, %137 : vector<2x32xf32>
    %139 = vector.extract_strided_slice %119 {offsets = [0, 64], sizes = [2, 32], strides = [1, 1]} : vector<2x96xf32> to vector<2x32xf32>
    %140 = vector.extract_strided_slice %122 {offsets = [0, 64], sizes = [2, 32], strides = [1, 1]} : vector<2x96xf32> to vector<2x32xf32>
    %141 = arith.mulf %130, %140 : vector<2x32xf32>
    %142 = arith.addf %139, %141 : vector<2x32xf32>
    %143 = math.tanh %142 : vector<2x32xf32>
    %cst_150 = arith.constant 1.000000e+00 : f32
    %144 = vector.broadcast %cst_150 : f32 to vector<2x32xf32>
    %145 = arith.subf %144, %138 : vector<2x32xf32>
    %146 = arith.mulf %145, %143 : vector<2x32xf32>
    %147 = arith.mulf %138, %98 : vector<2x32xf32>
    %148 = arith.addf %146, %147 : vector<2x32xf32>
    %cst_151 = arith.constant dense<0.000000e+00> : vector<2x1xf32>
    %149 = tpu.matmul %148, %103, %cst_151 {dimension_numbers = #tpu.dot_dimension_numbers<[1], [0], [0], [1], [0, 0, 1, 1], [], []>} : vector<2x32xf32>, vector<32x1xf32>, vector<2x1xf32> -> vector<2x1xf32>
    %150 = vector.broadcast %104 : vector<1x1xf32> to vector<2x1xf32>
    %151 = arith.addf %149, %150 : vector<2x1xf32>
    %152 = vector.broadcast %114 : vector<2x1xf32> to vector<2x96xf32>
    %153 = vector.broadcast %105 : vector<1x96xf32> to vector<2x96xf32>
    %154 = arith.mulf %152, %153 : vector<2x96xf32>
    %155 = vector.broadcast %107 : vector<1x96xf32> to vector<2x96xf32>
    %156 = arith.addf %154, %155 : vector<2x96xf32>
    %cst_152 = arith.constant dense<0.000000e+00> : vector<2x96xf32>
    %157 = tpu.matmul %98, %106, %cst_152 {dimension_numbers = #tpu.dot_dimension_numbers<[1], [0], [0], [1], [0, 0, 1, 1], [], []>} : vector<2x32xf32>, vector<32x96xf32>, vector<2x96xf32> -> vector<2x96xf32>
    %158 = vector.broadcast %108 : vector<1x96xf32> to vector<2x96xf32>
    %159 = arith.addf %157, %158 : vector<2x96xf32>
    %160 = vector.extract_strided_slice %156 {offsets = [0, 0], sizes = [2, 32], strides = [1, 1]} : vector<2x96xf32> to vector<2x32xf32>
    %161 = vector.extract_strided_slice %159 {offsets = [0, 0], sizes = [2, 32], strides = [1, 1]} : vector<2x96xf32> to vector<2x32xf32>
    %162 = arith.addf %160, %161 : vector<2x32xf32>
    %163 = arith.negf %162 : vector<2x32xf32>
    %164 = math.exp %163 : vector<2x32xf32>
    %cst_153 = arith.constant 1.000000e+00 : f32
    %165 = vector.broadcast %cst_153 : f32 to vector<2x32xf32>
    %166 = arith.addf %165, %164 : vector<2x32xf32>
    %167 = arith.divf %165, %166 : vector<2x32xf32>
    %168 = vector.extract_strided_slice %156 {offsets = [0, 32], sizes = [2, 32], strides = [1, 1]} : vector<2x96xf32> to vector<2x32xf32>
    %169 = vector.extract_strided_slice %159 {offsets = [0, 32], sizes = [2, 32], strides = [1, 1]} : vector<2x96xf32> to vector<2x32xf32>
    %170 = arith.addf %168, %169 : vector<2x32xf32>
    %171 = arith.negf %170 : vector<2x32xf32>
    %172 = math.exp %171 : vector<2x32xf32>
    %cst_154 = arith.constant 1.000000e+00 : f32
    %173 = vector.broadcast %cst_154 : f32 to vector<2x32xf32>
    %174 = arith.addf %173, %172 : vector<2x32xf32>
    %175 = arith.divf %173, %174 : vector<2x32xf32>
    %176 = vector.extract_strided_slice %156 {offsets = [0, 64], sizes = [2, 32], strides = [1, 1]} : vector<2x96xf32> to vector<2x32xf32>
    %177 = vector.extract_strided_slice %159 {offsets = [0, 64], sizes = [2, 32], strides = [1, 1]} : vector<2x96xf32> to vector<2x32xf32>
    %178 = arith.mulf %167, %177 : vector<2x32xf32>
    %179 = arith.addf %176, %178 : vector<2x32xf32>
    %180 = math.tanh %179 : vector<2x32xf32>
    %cst_155 = arith.constant 1.000000e+00 : f32
    %181 = vector.broadcast %cst_155 : f32 to vector<2x32xf32>
    %182 = arith.subf %181, %175 : vector<2x32xf32>
    %183 = arith.mulf %182, %180 : vector<2x32xf32>
    %184 = arith.mulf %175, %98 : vector<2x32xf32>
    %185 = arith.addf %183, %184 : vector<2x32xf32>
    %cst_156 = arith.constant dense<0.000000e+00> : vector<2x1xf32>
    %186 = tpu.matmul %185, %109, %cst_156 {dimension_numbers = #tpu.dot_dimension_numbers<[1], [0], [0], [1], [0, 0, 1, 1], [], []>} : vector<2x32xf32>, vector<32x1xf32>, vector<2x1xf32> -> vector<2x1xf32>
    %187 = vector.broadcast %110 : vector<1x1xf32> to vector<2x1xf32>
    %188 = arith.addf %186, %187 : vector<2x1xf32>
    %189 = vector.broadcast %151 : vector<2x1xf32> to vector<2x96xf32>
    %190 = vector.broadcast %99 : vector<1x96xf32> to vector<2x96xf32>
    %191 = arith.mulf %189, %190 : vector<2x96xf32>
    %192 = vector.broadcast %101 : vector<1x96xf32> to vector<2x96xf32>
    %193 = arith.addf %191, %192 : vector<2x96xf32>
    %cst_157 = arith.constant dense<0.000000e+00> : vector<2x96xf32>
    %194 = tpu.matmul %148, %100, %cst_157 {dimension_numbers = #tpu.dot_dimension_numbers<[1], [0], [0], [1], [0, 0, 1, 1], [], []>} : vector<2x32xf32>, vector<32x96xf32>, vector<2x96xf32> -> vector<2x96xf32>
    %195 = vector.broadcast %102 : vector<1x96xf32> to vector<2x96xf32>
    %196 = arith.addf %194, %195 : vector<2x96xf32>
    %197 = vector.extract_strided_slice %193 {offsets = [0, 0], sizes = [2, 32], strides = [1, 1]} : vector<2x96xf32> to vector<2x32xf32>
    %198 = vector.extract_strided_slice %196 {offsets = [0, 0], sizes = [2, 32], strides = [1, 1]} : vector<2x96xf32> to vector<2x32xf32>
    %199 = arith.addf %197, %198 : vector<2x32xf32>
    %200 = arith.negf %199 : vector<2x32xf32>
    %201 = math.exp %200 : vector<2x32xf32>
    %cst_158 = arith.constant 1.000000e+00 : f32
    %202 = vector.broadcast %cst_158 : f32 to vector<2x32xf32>
    %203 = arith.addf %202, %201 : vector<2x32xf32>
    %204 = arith.divf %202, %203 : vector<2x32xf32>
    %205 = vector.extract_strided_slice %193 {offsets = [0, 32], sizes = [2, 32], strides = [1, 1]} : vector<2x96xf32> to vector<2x32xf32>
    %206 = vector.extract_strided_slice %196 {offsets = [0, 32], sizes = [2, 32], strides = [1, 1]} : vector<2x96xf32> to vector<2x32xf32>
    %207 = arith.addf %205, %206 : vector<2x32xf32>
    %208 = arith.negf %207 : vector<2x32xf32>
    %209 = math.exp %208 : vector<2x32xf32>
    %cst_159 = arith.constant 1.000000e+00 : f32
    %210 = vector.broadcast %cst_159 : f32 to vector<2x32xf32>
    %211 = arith.addf %210, %209 : vector<2x32xf32>
    %212 = arith.divf %210, %211 : vector<2x32xf32>
    %213 = vector.extract_strided_slice %193 {offsets = [0, 64], sizes = [2, 32], strides = [1, 1]} : vector<2x96xf32> to vector<2x32xf32>
    %214 = vector.extract_strided_slice %196 {offsets = [0, 64], sizes = [2, 32], strides = [1, 1]} : vector<2x96xf32> to vector<2x32xf32>
    %215 = arith.mulf %204, %214 : vector<2x32xf32>
    %216 = arith.addf %213, %215 : vector<2x32xf32>
    %217 = math.tanh %216 : vector<2x32xf32>
    %cst_160 = arith.constant 1.000000e+00 : f32
    %218 = vector.broadcast %cst_160 : f32 to vector<2x32xf32>
    %219 = arith.subf %218, %212 : vector<2x32xf32>
    %220 = arith.mulf %219, %217 : vector<2x32xf32>
    %221 = arith.mulf %212, %148 : vector<2x32xf32>
    %222 = arith.addf %220, %221 : vector<2x32xf32>
    %cst_161 = arith.constant dense<0.000000e+00> : vector<2x1xf32>
    %223 = tpu.matmul %222, %103, %cst_161 {dimension_numbers = #tpu.dot_dimension_numbers<[1], [0], [0], [1], [0, 0, 1, 1], [], []>} : vector<2x32xf32>, vector<32x1xf32>, vector<2x1xf32> -> vector<2x1xf32>
    %224 = vector.broadcast %104 : vector<1x1xf32> to vector<2x1xf32>
    %225 = arith.addf %223, %224 : vector<2x1xf32>
    %226 = vector.broadcast %188 : vector<2x1xf32> to vector<2x96xf32>
    %227 = vector.broadcast %105 : vector<1x96xf32> to vector<2x96xf32>
    %228 = arith.mulf %226, %227 : vector<2x96xf32>
    %229 = vector.broadcast %107 : vector<1x96xf32> to vector<2x96xf32>
    %230 = arith.addf %228, %229 : vector<2x96xf32>
    %cst_162 = arith.constant dense<0.000000e+00> : vector<2x96xf32>
    %231 = tpu.matmul %185, %106, %cst_162 {dimension_numbers = #tpu.dot_dimension_numbers<[1], [0], [0], [1], [0, 0, 1, 1], [], []>} : vector<2x32xf32>, vector<32x96xf32>, vector<2x96xf32> -> vector<2x96xf32>
    %232 = vector.broadcast %108 : vector<1x96xf32> to vector<2x96xf32>
    %233 = arith.addf %231, %232 : vector<2x96xf32>
    %234 = vector.extract_strided_slice %230 {offsets = [0, 0], sizes = [2, 32], strides = [1, 1]} : vector<2x96xf32> to vector<2x32xf32>
    %235 = vector.extract_strided_slice %233 {offsets = [0, 0], sizes = [2, 32], strides = [1, 1]} : vector<2x96xf32> to vector<2x32xf32>
    %236 = arith.addf %234, %235 : vector<2x32xf32>
    %237 = arith.negf %236 : vector<2x32xf32>
    %238 = math.exp %237 : vector<2x32xf32>
    %cst_163 = arith.constant 1.000000e+00 : f32
    %239 = vector.broadcast %cst_163 : f32 to vector<2x32xf32>
    %240 = arith.addf %239, %238 : vector<2x32xf32>
    %241 = arith.divf %239, %240 : vector<2x32xf32>
    %242 = vector.extract_strided_slice %230 {offsets = [0, 32], sizes = [2, 32], strides = [1, 1]} : vector<2x96xf32> to vector<2x32xf32>
    %243 = vector.extract_strided_slice %233 {offsets = [0, 32], sizes = [2, 32], strides = [1, 1]} : vector<2x96xf32> to vector<2x32xf32>
    %244 = arith.addf %242, %243 : vector<2x32xf32>
    %245 = arith.negf %244 : vector<2x32xf32>
    %246 = math.exp %245 : vector<2x32xf32>
    %cst_164 = arith.constant 1.000000e+00 : f32
    %247 = vector.broadcast %cst_164 : f32 to vector<2x32xf32>
    %248 = arith.addf %247, %246 : vector<2x32xf32>
    %249 = arith.divf %247, %248 : vector<2x32xf32>
    %250 = vector.extract_strided_slice %230 {offsets = [0, 64], sizes = [2, 32], strides = [1, 1]} : vector<2x96xf32> to vector<2x32xf32>
    %251 = vector.extract_strided_slice %233 {offsets = [0, 64], sizes = [2, 32], strides = [1, 1]} : vector<2x96xf32> to vector<2x32xf32>
    %252 = arith.mulf %241, %251 : vector<2x32xf32>
    %253 = arith.addf %250, %252 : vector<2x32xf32>
    %254 = math.tanh %253 : vector<2x32xf32>
    %cst_165 = arith.constant 1.000000e+00 : f32
    %255 = vector.broadcast %cst_165 : f32 to vector<2x32xf32>
    %256 = arith.subf %255, %249 : vector<2x32xf32>
    %257 = arith.mulf %256, %254 : vector<2x32xf32>
    %258 = arith.mulf %249, %185 : vector<2x32xf32>
    %259 = arith.addf %257, %258 : vector<2x32xf32>
    %cst_166 = arith.constant dense<0.000000e+00> : vector<2x1xf32>
    %260 = tpu.matmul %259, %109, %cst_166 {dimension_numbers = #tpu.dot_dimension_numbers<[1], [0], [0], [1], [0, 0, 1, 1], [], []>} : vector<2x32xf32>, vector<32x1xf32>, vector<2x1xf32> -> vector<2x1xf32>
    %261 = vector.broadcast %110 : vector<1x1xf32> to vector<2x1xf32>
    %262 = arith.addf %260, %261 : vector<2x1xf32>
    %263 = vector.broadcast %225 : vector<2x1xf32> to vector<2x96xf32>
    %264 = vector.broadcast %99 : vector<1x96xf32> to vector<2x96xf32>
    %265 = arith.mulf %263, %264 : vector<2x96xf32>
    %266 = vector.broadcast %101 : vector<1x96xf32> to vector<2x96xf32>
    %267 = arith.addf %265, %266 : vector<2x96xf32>
    %cst_167 = arith.constant dense<0.000000e+00> : vector<2x96xf32>
    %268 = tpu.matmul %222, %100, %cst_167 {dimension_numbers = #tpu.dot_dimension_numbers<[1], [0], [0], [1], [0, 0, 1, 1], [], []>} : vector<2x32xf32>, vector<32x96xf32>, vector<2x96xf32> -> vector<2x96xf32>
    %269 = vector.broadcast %102 : vector<1x96xf32> to vector<2x96xf32>
    %270 = arith.addf %268, %269 : vector<2x96xf32>
    %271 = vector.extract_strided_slice %267 {offsets = [0, 0], sizes = [2, 32], strides = [1, 1]} : vector<2x96xf32> to vector<2x32xf32>
    %272 = vector.extract_strided_slice %270 {offsets = [0, 0], sizes = [2, 32], strides = [1, 1]} : vector<2x96xf32> to vector<2x32xf32>
    %273 = arith.addf %271, %272 : vector<2x32xf32>
    %274 = arith.negf %273 : vector<2x32xf32>
    %275 = math.exp %274 : vector<2x32xf32>
    %cst_168 = arith.constant 1.000000e+00 : f32
    %276 = vector.broadcast %cst_168 : f32 to vector<2x32xf32>
    %277 = arith.addf %276, %275 : vector<2x32xf32>
    %278 = arith.divf %276, %277 : vector<2x32xf32>
    %279 = vector.extract_strided_slice %267 {offsets = [0, 32], sizes = [2, 32], strides = [1, 1]} : vector<2x96xf32> to vector<2x32xf32>
    %280 = vector.extract_strided_slice %270 {offsets = [0, 32], sizes = [2, 32], strides = [1, 1]} : vector<2x96xf32> to vector<2x32xf32>
    %281 = arith.addf %279, %280 : vector<2x32xf32>
    %282 = arith.negf %281 : vector<2x32xf32>
    %283 = math.exp %282 : vector<2x32xf32>
    %cst_169 = arith.constant 1.000000e+00 : f32
    %284 = vector.broadcast %cst_169 : f32 to vector<2x32xf32>
    %285 = arith.addf %284, %283 : vector<2x32xf32>
    %286 = arith.divf %284, %285 : vector<2x32xf32>
    %287 = vector.extract_strided_slice %267 {offsets = [0, 64], sizes = [2, 32], strides = [1, 1]} : vector<2x96xf32> to vector<2x32xf32>
    %288 = vector.extract_strided_slice %270 {offsets = [0, 64], sizes = [2, 32], strides = [1, 1]} : vector<2x96xf32> to vector<2x32xf32>
    %289 = arith.mulf %278, %288 : vector<2x32xf32>
    %290 = arith.addf %287, %289 : vector<2x32xf32>
    %291 = math.tanh %290 : vector<2x32xf32>
    %cst_170 = arith.constant 1.000000e+00 : f32
    %292 = vector.broadcast %cst_170 : f32 to vector<2x32xf32>
    %293 = arith.subf %292, %286 : vector<2x32xf32>
    %294 = arith.mulf %293, %291 : vector<2x32xf32>
    %295 = arith.mulf %286, %222 : vector<2x32xf32>
    %296 = arith.addf %294, %295 : vector<2x32xf32>
    %cst_171 = arith.constant dense<0.000000e+00> : vector<2x1xf32>
    %297 = tpu.matmul %296, %103, %cst_171 {dimension_numbers = #tpu.dot_dimension_numbers<[1], [0], [0], [1], [0, 0, 1, 1], [], []>} : vector<2x32xf32>, vector<32x1xf32>, vector<2x1xf32> -> vector<2x1xf32>
    %298 = vector.broadcast %104 : vector<1x1xf32> to vector<2x1xf32>
    %299 = arith.addf %297, %298 : vector<2x1xf32>
    %300 = vector.broadcast %262 : vector<2x1xf32> to vector<2x96xf32>
    %301 = vector.broadcast %105 : vector<1x96xf32> to vector<2x96xf32>
    %302 = arith.mulf %300, %301 : vector<2x96xf32>
    %303 = vector.broadcast %107 : vector<1x96xf32> to vector<2x96xf32>
    %304 = arith.addf %302, %303 : vector<2x96xf32>
    %cst_172 = arith.constant dense<0.000000e+00> : vector<2x96xf32>
    %305 = tpu.matmul %259, %106, %cst_172 {dimension_numbers = #tpu.dot_dimension_numbers<[1], [0], [0], [1], [0, 0, 1, 1], [], []>} : vector<2x32xf32>, vector<32x96xf32>, vector<2x96xf32> -> vector<2x96xf32>
    %306 = vector.broadcast %108 : vector<1x96xf32> to vector<2x96xf32>
    %307 = arith.addf %305, %306 : vector<2x96xf32>
    %308 = vector.extract_strided_slice %304 {offsets = [0, 0], sizes = [2, 32], strides = [1, 1]} : vector<2x96xf32> to vector<2x32xf32>
    %309 = vector.extract_strided_slice %307 {offsets = [0, 0], sizes = [2, 32], strides = [1, 1]} : vector<2x96xf32> to vector<2x32xf32>
    %310 = arith.addf %308, %309 : vector<2x32xf32>
    %311 = arith.negf %310 : vector<2x32xf32>
    %312 = math.exp %311 : vector<2x32xf32>
    %cst_173 = arith.constant 1.000000e+00 : f32
    %313 = vector.broadcast %cst_173 : f32 to vector<2x32xf32>
    %314 = arith.addf %313, %312 : vector<2x32xf32>
    %315 = arith.divf %313, %314 : vector<2x32xf32>
    %316 = vector.extract_strided_slice %304 {offsets = [0, 32], sizes = [2, 32], strides = [1, 1]} : vector<2x96xf32> to vector<2x32xf32>
    %317 = vector.extract_strided_slice %307 {offsets = [0, 32], sizes = [2, 32], strides = [1, 1]} : vector<2x96xf32> to vector<2x32xf32>
    %318 = arith.addf %316, %317 : vector<2x32xf32>
    %319 = arith.negf %318 : vector<2x32xf32>
    %320 = math.exp %319 : vector<2x32xf32>
    %cst_174 = arith.constant 1.000000e+00 : f32
    %321 = vector.broadcast %cst_174 : f32 to vector<2x32xf32>
    %322 = arith.addf %321, %320 : vector<2x32xf32>
    %323 = arith.divf %321, %322 : vector<2x32xf32>
    %324 = vector.extract_strided_slice %304 {offsets = [0, 64], sizes = [2, 32], strides = [1, 1]} : vector<2x96xf32> to vector<2x32xf32>
    %325 = vector.extract_strided_slice %307 {offsets = [0, 64], sizes = [2, 32], strides = [1, 1]} : vector<2x96xf32> to vector<2x32xf32>
    %326 = arith.mulf %315, %325 : vector<2x32xf32>
    %327 = arith.addf %324, %326 : vector<2x32xf32>
    %328 = math.tanh %327 : vector<2x32xf32>
    %cst_175 = arith.constant 1.000000e+00 : f32
    %329 = vector.broadcast %cst_175 : f32 to vector<2x32xf32>
    %330 = arith.subf %329, %323 : vector<2x32xf32>
    %331 = arith.mulf %330, %328 : vector<2x32xf32>
    %332 = arith.mulf %323, %259 : vector<2x32xf32>
    %333 = arith.addf %331, %332 : vector<2x32xf32>
    %cst_176 = arith.constant dense<0.000000e+00> : vector<2x1xf32>
    %334 = tpu.matmul %333, %109, %cst_176 {dimension_numbers = #tpu.dot_dimension_numbers<[1], [0], [0], [1], [0, 0, 1, 1], [], []>} : vector<2x32xf32>, vector<32x1xf32>, vector<2x1xf32> -> vector<2x1xf32>
    %335 = vector.broadcast %110 : vector<1x1xf32> to vector<2x1xf32>
    %336 = arith.addf %334, %335 : vector<2x1xf32>
    %337 = vector.broadcast %299 : vector<2x1xf32> to vector<2x96xf32>
    %338 = vector.broadcast %99 : vector<1x96xf32> to vector<2x96xf32>
    %339 = arith.mulf %337, %338 : vector<2x96xf32>
    %340 = vector.broadcast %101 : vector<1x96xf32> to vector<2x96xf32>
    %341 = arith.addf %339, %340 : vector<2x96xf32>
    %cst_177 = arith.constant dense<0.000000e+00> : vector<2x96xf32>
    %342 = tpu.matmul %296, %100, %cst_177 {dimension_numbers = #tpu.dot_dimension_numbers<[1], [0], [0], [1], [0, 0, 1, 1], [], []>} : vector<2x32xf32>, vector<32x96xf32>, vector<2x96xf32> -> vector<2x96xf32>
    %343 = vector.broadcast %102 : vector<1x96xf32> to vector<2x96xf32>
    %344 = arith.addf %342, %343 : vector<2x96xf32>
    %345 = vector.extract_strided_slice %341 {offsets = [0, 0], sizes = [2, 32], strides = [1, 1]} : vector<2x96xf32> to vector<2x32xf32>
    %346 = vector.extract_strided_slice %344 {offsets = [0, 0], sizes = [2, 32], strides = [1, 1]} : vector<2x96xf32> to vector<2x32xf32>
    %347 = arith.addf %345, %346 : vector<2x32xf32>
    %348 = arith.negf %347 : vector<2x32xf32>
    %349 = math.exp %348 : vector<2x32xf32>
    %cst_178 = arith.constant 1.000000e+00 : f32
    %350 = vector.broadcast %cst_178 : f32 to vector<2x32xf32>
    %351 = arith.addf %350, %349 : vector<2x32xf32>
    %352 = arith.divf %350, %351 : vector<2x32xf32>
    %353 = vector.extract_strided_slice %341 {offsets = [0, 32], sizes = [2, 32], strides = [1, 1]} : vector<2x96xf32> to vector<2x32xf32>
    %354 = vector.extract_strided_slice %344 {offsets = [0, 32], sizes = [2, 32], strides = [1, 1]} : vector<2x96xf32> to vector<2x32xf32>
    %355 = arith.addf %353, %354 : vector<2x32xf32>
    %356 = arith.negf %355 : vector<2x32xf32>
    %357 = math.exp %356 : vector<2x32xf32>
    %cst_179 = arith.constant 1.000000e+00 : f32
    %358 = vector.broadcast %cst_179 : f32 to vector<2x32xf32>
    %359 = arith.addf %358, %357 : vector<2x32xf32>
    %360 = arith.divf %358, %359 : vector<2x32xf32>
    %361 = vector.extract_strided_slice %341 {offsets = [0, 64], sizes = [2, 32], strides = [1, 1]} : vector<2x96xf32> to vector<2x32xf32>
    %362 = vector.extract_strided_slice %344 {offsets = [0, 64], sizes = [2, 32], strides = [1, 1]} : vector<2x96xf32> to vector<2x32xf32>
    %363 = arith.mulf %352, %362 : vector<2x32xf32>
    %364 = arith.addf %361, %363 : vector<2x32xf32>
    %365 = math.tanh %364 : vector<2x32xf32>
    %cst_180 = arith.constant 1.000000e+00 : f32
    %366 = vector.broadcast %cst_180 : f32 to vector<2x32xf32>
    %367 = arith.subf %366, %360 : vector<2x32xf32>
    %368 = arith.mulf %367, %365 : vector<2x32xf32>
    %369 = arith.mulf %360, %296 : vector<2x32xf32>
    %370 = arith.addf %368, %369 : vector<2x32xf32>
    %cst_181 = arith.constant dense<0.000000e+00> : vector<2x1xf32>
    %371 = tpu.matmul %370, %103, %cst_181 {dimension_numbers = #tpu.dot_dimension_numbers<[1], [0], [0], [1], [0, 0, 1, 1], [], []>} : vector<2x32xf32>, vector<32x1xf32>, vector<2x1xf32> -> vector<2x1xf32>
    %372 = vector.broadcast %104 : vector<1x1xf32> to vector<2x1xf32>
    %373 = arith.addf %371, %372 : vector<2x1xf32>
    %374 = vector.broadcast %336 : vector<2x1xf32> to vector<2x96xf32>
    %375 = vector.broadcast %105 : vector<1x96xf32> to vector<2x96xf32>
    %376 = arith.mulf %374, %375 : vector<2x96xf32>
    %377 = vector.broadcast %107 : vector<1x96xf32> to vector<2x96xf32>
    %378 = arith.addf %376, %377 : vector<2x96xf32>
    %cst_182 = arith.constant dense<0.000000e+00> : vector<2x96xf32>
    %379 = tpu.matmul %333, %106, %cst_182 {dimension_numbers = #tpu.dot_dimension_numbers<[1], [0], [0], [1], [0, 0, 1, 1], [], []>} : vector<2x32xf32>, vector<32x96xf32>, vector<2x96xf32> -> vector<2x96xf32>
    %380 = vector.broadcast %108 : vector<1x96xf32> to vector<2x96xf32>
    %381 = arith.addf %379, %380 : vector<2x96xf32>
    %382 = vector.extract_strided_slice %378 {offsets = [0, 0], sizes = [2, 32], strides = [1, 1]} : vector<2x96xf32> to vector<2x32xf32>
    %383 = vector.extract_strided_slice %381 {offsets = [0, 0], sizes = [2, 32], strides = [1, 1]} : vector<2x96xf32> to vector<2x32xf32>
    %384 = arith.addf %382, %383 : vector<2x32xf32>
    %385 = arith.negf %384 : vector<2x32xf32>
    %386 = math.exp %385 : vector<2x32xf32>
    %cst_183 = arith.constant 1.000000e+00 : f32
    %387 = vector.broadcast %cst_183 : f32 to vector<2x32xf32>
    %388 = arith.addf %387, %386 : vector<2x32xf32>
    %389 = arith.divf %387, %388 : vector<2x32xf32>
    %390 = vector.extract_strided_slice %378 {offsets = [0, 32], sizes = [2, 32], strides = [1, 1]} : vector<2x96xf32> to vector<2x32xf32>
    %391 = vector.extract_strided_slice %381 {offsets = [0, 32], sizes = [2, 32], strides = [1, 1]} : vector<2x96xf32> to vector<2x32xf32>
    %392 = arith.addf %390, %391 : vector<2x32xf32>
    %393 = arith.negf %392 : vector<2x32xf32>
    %394 = math.exp %393 : vector<2x32xf32>
    %cst_184 = arith.constant 1.000000e+00 : f32
    %395 = vector.broadcast %cst_184 : f32 to vector<2x32xf32>
    %396 = arith.addf %395, %394 : vector<2x32xf32>
    %397 = arith.divf %395, %396 : vector<2x32xf32>
    %398 = vector.extract_strided_slice %378 {offsets = [0, 64], sizes = [2, 32], strides = [1, 1]} : vector<2x96xf32> to vector<2x32xf32>
    %399 = vector.extract_strided_slice %381 {offsets = [0, 64], sizes = [2, 32], strides = [1, 1]} : vector<2x96xf32> to vector<2x32xf32>
    %400 = arith.mulf %389, %399 : vector<2x32xf32>
    %401 = arith.addf %398, %400 : vector<2x32xf32>
    %402 = math.tanh %401 : vector<2x32xf32>
    %cst_185 = arith.constant 1.000000e+00 : f32
    %403 = vector.broadcast %cst_185 : f32 to vector<2x32xf32>
    %404 = arith.subf %403, %397 : vector<2x32xf32>
    %405 = arith.mulf %404, %402 : vector<2x32xf32>
    %406 = arith.mulf %397, %333 : vector<2x32xf32>
    %407 = arith.addf %405, %406 : vector<2x32xf32>
    %cst_186 = arith.constant dense<0.000000e+00> : vector<2x1xf32>
    %408 = tpu.matmul %407, %109, %cst_186 {dimension_numbers = #tpu.dot_dimension_numbers<[1], [0], [0], [1], [0, 0, 1, 1], [], []>} : vector<2x32xf32>, vector<32x1xf32>, vector<2x1xf32> -> vector<2x1xf32>
    %409 = vector.broadcast %110 : vector<1x1xf32> to vector<2x1xf32>
    %410 = arith.addf %408, %409 : vector<2x1xf32>
    %411 = vector.broadcast %373 : vector<2x1xf32> to vector<2x96xf32>
    %412 = vector.broadcast %99 : vector<1x96xf32> to vector<2x96xf32>
    %413 = arith.mulf %411, %412 : vector<2x96xf32>
    %414 = vector.broadcast %101 : vector<1x96xf32> to vector<2x96xf32>
    %415 = arith.addf %413, %414 : vector<2x96xf32>
    %cst_187 = arith.constant dense<0.000000e+00> : vector<2x96xf32>
    %416 = tpu.matmul %370, %100, %cst_187 {dimension_numbers = #tpu.dot_dimension_numbers<[1], [0], [0], [1], [0, 0, 1, 1], [], []>} : vector<2x32xf32>, vector<32x96xf32>, vector<2x96xf32> -> vector<2x96xf32>
    %417 = vector.broadcast %102 : vector<1x96xf32> to vector<2x96xf32>
    %418 = arith.addf %416, %417 : vector<2x96xf32>
    %419 = vector.extract_strided_slice %415 {offsets = [0, 0], sizes = [2, 32], strides = [1, 1]} : vector<2x96xf32> to vector<2x32xf32>
    %420 = vector.extract_strided_slice %418 {offsets = [0, 0], sizes = [2, 32], strides = [1, 1]} : vector<2x96xf32> to vector<2x32xf32>
    %421 = arith.addf %419, %420 : vector<2x32xf32>
    %422 = arith.negf %421 : vector<2x32xf32>
    %423 = math.exp %422 : vector<2x32xf32>
    %cst_188 = arith.constant 1.000000e+00 : f32
    %424 = vector.broadcast %cst_188 : f32 to vector<2x32xf32>
    %425 = arith.addf %424, %423 : vector<2x32xf32>
    %426 = arith.divf %424, %425 : vector<2x32xf32>
    %427 = vector.extract_strided_slice %415 {offsets = [0, 32], sizes = [2, 32], strides = [1, 1]} : vector<2x96xf32> to vector<2x32xf32>
    %428 = vector.extract_strided_slice %418 {offsets = [0, 32], sizes = [2, 32], strides = [1, 1]} : vector<2x96xf32> to vector<2x32xf32>
    %429 = arith.addf %427, %428 : vector<2x32xf32>
    %430 = arith.negf %429 : vector<2x32xf32>
    %431 = math.exp %430 : vector<2x32xf32>
    %cst_189 = arith.constant 1.000000e+00 : f32
    %432 = vector.broadcast %cst_189 : f32 to vector<2x32xf32>
    %433 = arith.addf %432, %431 : vector<2x32xf32>
    %434 = arith.divf %432, %433 : vector<2x32xf32>
    %435 = vector.extract_strided_slice %415 {offsets = [0, 64], sizes = [2, 32], strides = [1, 1]} : vector<2x96xf32> to vector<2x32xf32>
    %436 = vector.extract_strided_slice %418 {offsets = [0, 64], sizes = [2, 32], strides = [1, 1]} : vector<2x96xf32> to vector<2x32xf32>
    %437 = arith.mulf %426, %436 : vector<2x32xf32>
    %438 = arith.addf %435, %437 : vector<2x32xf32>
    %439 = math.tanh %438 : vector<2x32xf32>
    %cst_190 = arith.constant 1.000000e+00 : f32
    %440 = vector.broadcast %cst_190 : f32 to vector<2x32xf32>
    %441 = arith.subf %440, %434 : vector<2x32xf32>
    %442 = arith.mulf %441, %439 : vector<2x32xf32>
    %443 = arith.mulf %434, %370 : vector<2x32xf32>
    %444 = arith.addf %442, %443 : vector<2x32xf32>
    %cst_191 = arith.constant dense<0.000000e+00> : vector<2x1xf32>
    %445 = tpu.matmul %444, %103, %cst_191 {dimension_numbers = #tpu.dot_dimension_numbers<[1], [0], [0], [1], [0, 0, 1, 1], [], []>} : vector<2x32xf32>, vector<32x1xf32>, vector<2x1xf32> -> vector<2x1xf32>
    %446 = vector.broadcast %104 : vector<1x1xf32> to vector<2x1xf32>
    %447 = arith.addf %445, %446 : vector<2x1xf32>
    %448 = vector.broadcast %410 : vector<2x1xf32> to vector<2x96xf32>
    %449 = vector.broadcast %105 : vector<1x96xf32> to vector<2x96xf32>
    %450 = arith.mulf %448, %449 : vector<2x96xf32>
    %451 = vector.broadcast %107 : vector<1x96xf32> to vector<2x96xf32>
    %452 = arith.addf %450, %451 : vector<2x96xf32>
    %cst_192 = arith.constant dense<0.000000e+00> : vector<2x96xf32>
    %453 = tpu.matmul %407, %106, %cst_192 {dimension_numbers = #tpu.dot_dimension_numbers<[1], [0], [0], [1], [0, 0, 1, 1], [], []>} : vector<2x32xf32>, vector<32x96xf32>, vector<2x96xf32> -> vector<2x96xf32>
    %454 = vector.broadcast %108 : vector<1x96xf32> to vector<2x96xf32>
    %455 = arith.addf %453, %454 : vector<2x96xf32>
    %456 = vector.extract_strided_slice %452 {offsets = [0, 0], sizes = [2, 32], strides = [1, 1]} : vector<2x96xf32> to vector<2x32xf32>
    %457 = vector.extract_strided_slice %455 {offsets = [0, 0], sizes = [2, 32], strides = [1, 1]} : vector<2x96xf32> to vector<2x32xf32>
    %458 = arith.addf %456, %457 : vector<2x32xf32>
    %459 = arith.negf %458 : vector<2x32xf32>
    %460 = math.exp %459 : vector<2x32xf32>
    %cst_193 = arith.constant 1.000000e+00 : f32
    %461 = vector.broadcast %cst_193 : f32 to vector<2x32xf32>
    %462 = arith.addf %461, %460 : vector<2x32xf32>
    %463 = arith.divf %461, %462 : vector<2x32xf32>
    %464 = vector.extract_strided_slice %452 {offsets = [0, 32], sizes = [2, 32], strides = [1, 1]} : vector<2x96xf32> to vector<2x32xf32>
    %465 = vector.extract_strided_slice %455 {offsets = [0, 32], sizes = [2, 32], strides = [1, 1]} : vector<2x96xf32> to vector<2x32xf32>
    %466 = arith.addf %464, %465 : vector<2x32xf32>
    %467 = arith.negf %466 : vector<2x32xf32>
    %468 = math.exp %467 : vector<2x32xf32>
    %cst_194 = arith.constant 1.000000e+00 : f32
    %469 = vector.broadcast %cst_194 : f32 to vector<2x32xf32>
    %470 = arith.addf %469, %468 : vector<2x32xf32>
    %471 = arith.divf %469, %470 : vector<2x32xf32>
    %472 = vector.extract_strided_slice %452 {offsets = [0, 64], sizes = [2, 32], strides = [1, 1]} : vector<2x96xf32> to vector<2x32xf32>
    %473 = vector.extract_strided_slice %455 {offsets = [0, 64], sizes = [2, 32], strides = [1, 1]} : vector<2x96xf32> to vector<2x32xf32>
    %474 = arith.mulf %463, %473 : vector<2x32xf32>
    %475 = arith.addf %472, %474 : vector<2x32xf32>
    %476 = math.tanh %475 : vector<2x32xf32>
    %cst_195 = arith.constant 1.000000e+00 : f32
    %477 = vector.broadcast %cst_195 : f32 to vector<2x32xf32>
    %478 = arith.subf %477, %471 : vector<2x32xf32>
    %479 = arith.mulf %478, %476 : vector<2x32xf32>
    %480 = arith.mulf %471, %407 : vector<2x32xf32>
    %481 = arith.addf %479, %480 : vector<2x32xf32>
    %cst_196 = arith.constant dense<0.000000e+00> : vector<2x1xf32>
    %482 = tpu.matmul %481, %109, %cst_196 {dimension_numbers = #tpu.dot_dimension_numbers<[1], [0], [0], [1], [0, 0, 1, 1], [], []>} : vector<2x32xf32>, vector<32x1xf32>, vector<2x1xf32> -> vector<2x1xf32>
    %483 = vector.broadcast %110 : vector<1x1xf32> to vector<2x1xf32>
    %484 = arith.addf %482, %483 : vector<2x1xf32>
    %485 = vector.broadcast %447 : vector<2x1xf32> to vector<2x96xf32>
    %486 = vector.broadcast %99 : vector<1x96xf32> to vector<2x96xf32>
    %487 = arith.mulf %485, %486 : vector<2x96xf32>
    %488 = vector.broadcast %101 : vector<1x96xf32> to vector<2x96xf32>
    %489 = arith.addf %487, %488 : vector<2x96xf32>
    %cst_197 = arith.constant dense<0.000000e+00> : vector<2x96xf32>
    %490 = tpu.matmul %444, %100, %cst_197 {dimension_numbers = #tpu.dot_dimension_numbers<[1], [0], [0], [1], [0, 0, 1, 1], [], []>} : vector<2x32xf32>, vector<32x96xf32>, vector<2x96xf32> -> vector<2x96xf32>
    %491 = vector.broadcast %102 : vector<1x96xf32> to vector<2x96xf32>
    %492 = arith.addf %490, %491 : vector<2x96xf32>
    %493 = vector.extract_strided_slice %489 {offsets = [0, 0], sizes = [2, 32], strides = [1, 1]} : vector<2x96xf32> to vector<2x32xf32>
    %494 = vector.extract_strided_slice %492 {offsets = [0, 0], sizes = [2, 32], strides = [1, 1]} : vector<2x96xf32> to vector<2x32xf32>
    %495 = arith.addf %493, %494 : vector<2x32xf32>
    %496 = arith.negf %495 : vector<2x32xf32>
    %497 = math.exp %496 : vector<2x32xf32>
    %cst_198 = arith.constant 1.000000e+00 : f32
    %498 = vector.broadcast %cst_198 : f32 to vector<2x32xf32>
    %499 = arith.addf %498, %497 : vector<2x32xf32>
    %500 = arith.divf %498, %499 : vector<2x32xf32>
    %501 = vector.extract_strided_slice %489 {offsets = [0, 32], sizes = [2, 32], strides = [1, 1]} : vector<2x96xf32> to vector<2x32xf32>
    %502 = vector.extract_strided_slice %492 {offsets = [0, 32], sizes = [2, 32], strides = [1, 1]} : vector<2x96xf32> to vector<2x32xf32>
    %503 = arith.addf %501, %502 : vector<2x32xf32>
    %504 = arith.negf %503 : vector<2x32xf32>
    %505 = math.exp %504 : vector<2x32xf32>
    %cst_199 = arith.constant 1.000000e+00 : f32
    %506 = vector.broadcast %cst_199 : f32 to vector<2x32xf32>
    %507 = arith.addf %506, %505 : vector<2x32xf32>
    %508 = arith.divf %506, %507 : vector<2x32xf32>
    %509 = vector.extract_strided_slice %489 {offsets = [0, 64], sizes = [2, 32], strides = [1, 1]} : vector<2x96xf32> to vector<2x32xf32>
    %510 = vector.extract_strided_slice %492 {offsets = [0, 64], sizes = [2, 32], strides = [1, 1]} : vector<2x96xf32> to vector<2x32xf32>
    %511 = arith.mulf %500, %510 : vector<2x32xf32>
    %512 = arith.addf %509, %511 : vector<2x32xf32>
    %513 = math.tanh %512 : vector<2x32xf32>
    %cst_200 = arith.constant 1.000000e+00 : f32
    %514 = vector.broadcast %cst_200 : f32 to vector<2x32xf32>
    %515 = arith.subf %514, %508 : vector<2x32xf32>
    %516 = arith.mulf %515, %513 : vector<2x32xf32>
    %517 = arith.mulf %508, %444 : vector<2x32xf32>
    %518 = arith.addf %516, %517 : vector<2x32xf32>
    %cst_201 = arith.constant dense<0.000000e+00> : vector<2x1xf32>
    %519 = tpu.matmul %518, %103, %cst_201 {dimension_numbers = #tpu.dot_dimension_numbers<[1], [0], [0], [1], [0, 0, 1, 1], [], []>} : vector<2x32xf32>, vector<32x1xf32>, vector<2x1xf32> -> vector<2x1xf32>
    %520 = vector.broadcast %104 : vector<1x1xf32> to vector<2x1xf32>
    %521 = arith.addf %519, %520 : vector<2x1xf32>
    %522 = vector.broadcast %484 : vector<2x1xf32> to vector<2x96xf32>
    %523 = vector.broadcast %105 : vector<1x96xf32> to vector<2x96xf32>
    %524 = arith.mulf %522, %523 : vector<2x96xf32>
    %525 = vector.broadcast %107 : vector<1x96xf32> to vector<2x96xf32>
    %526 = arith.addf %524, %525 : vector<2x96xf32>
    %cst_202 = arith.constant dense<0.000000e+00> : vector<2x96xf32>
    %527 = tpu.matmul %481, %106, %cst_202 {dimension_numbers = #tpu.dot_dimension_numbers<[1], [0], [0], [1], [0, 0, 1, 1], [], []>} : vector<2x32xf32>, vector<32x96xf32>, vector<2x96xf32> -> vector<2x96xf32>
    %528 = vector.broadcast %108 : vector<1x96xf32> to vector<2x96xf32>
    %529 = arith.addf %527, %528 : vector<2x96xf32>
    %530 = vector.extract_strided_slice %526 {offsets = [0, 0], sizes = [2, 32], strides = [1, 1]} : vector<2x96xf32> to vector<2x32xf32>
    %531 = vector.extract_strided_slice %529 {offsets = [0, 0], sizes = [2, 32], strides = [1, 1]} : vector<2x96xf32> to vector<2x32xf32>
    %532 = arith.addf %530, %531 : vector<2x32xf32>
    %533 = arith.negf %532 : vector<2x32xf32>
    %534 = math.exp %533 : vector<2x32xf32>
    %cst_203 = arith.constant 1.000000e+00 : f32
    %535 = vector.broadcast %cst_203 : f32 to vector<2x32xf32>
    %536 = arith.addf %535, %534 : vector<2x32xf32>
    %537 = arith.divf %535, %536 : vector<2x32xf32>
    %538 = vector.extract_strided_slice %526 {offsets = [0, 32], sizes = [2, 32], strides = [1, 1]} : vector<2x96xf32> to vector<2x32xf32>
    %539 = vector.extract_strided_slice %529 {offsets = [0, 32], sizes = [2, 32], strides = [1, 1]} : vector<2x96xf32> to vector<2x32xf32>
    %540 = arith.addf %538, %539 : vector<2x32xf32>
    %541 = arith.negf %540 : vector<2x32xf32>
    %542 = math.exp %541 : vector<2x32xf32>
    %cst_204 = arith.constant 1.000000e+00 : f32
    %543 = vector.broadcast %cst_204 : f32 to vector<2x32xf32>
    %544 = arith.addf %543, %542 : vector<2x32xf32>
    %545 = arith.divf %543, %544 : vector<2x32xf32>
    %546 = vector.extract_strided_slice %526 {offsets = [0, 64], sizes = [2, 32], strides = [1, 1]} : vector<2x96xf32> to vector<2x32xf32>
    %547 = vector.extract_strided_slice %529 {offsets = [0, 64], sizes = [2, 32], strides = [1, 1]} : vector<2x96xf32> to vector<2x32xf32>
    %548 = arith.mulf %537, %547 : vector<2x32xf32>
    %549 = arith.addf %546, %548 : vector<2x32xf32>
    %550 = math.tanh %549 : vector<2x32xf32>
    %cst_205 = arith.constant 1.000000e+00 : f32
    %551 = vector.broadcast %cst_205 : f32 to vector<2x32xf32>
    %552 = arith.subf %551, %545 : vector<2x32xf32>
    %553 = arith.mulf %552, %550 : vector<2x32xf32>
    %554 = arith.mulf %545, %481 : vector<2x32xf32>
    %555 = arith.addf %553, %554 : vector<2x32xf32>
    %cst_206 = arith.constant dense<0.000000e+00> : vector<2x1xf32>
    %556 = tpu.matmul %555, %109, %cst_206 {dimension_numbers = #tpu.dot_dimension_numbers<[1], [0], [0], [1], [0, 0, 1, 1], [], []>} : vector<2x32xf32>, vector<32x1xf32>, vector<2x1xf32> -> vector<2x1xf32>
    %557 = vector.broadcast %110 : vector<1x1xf32> to vector<2x1xf32>
    %558 = arith.addf %556, %557 : vector<2x1xf32>
    %559 = vector.broadcast %558 : vector<2x1xf32> to vector<2x96xf32>
    %560 = vector.broadcast %105 : vector<1x96xf32> to vector<2x96xf32>
    %561 = arith.mulf %559, %560 : vector<2x96xf32>
    %562 = vector.broadcast %107 : vector<1x96xf32> to vector<2x96xf32>
    %563 = arith.addf %561, %562 : vector<2x96xf32>
    %cst_207 = arith.constant dense<0.000000e+00> : vector<2x96xf32>
    %564 = tpu.matmul %555, %106, %cst_207 {dimension_numbers = #tpu.dot_dimension_numbers<[1], [0], [0], [1], [0, 0, 1, 1], [], []>} : vector<2x32xf32>, vector<32x96xf32>, vector<2x96xf32> -> vector<2x96xf32>
    %565 = vector.broadcast %108 : vector<1x96xf32> to vector<2x96xf32>
    %566 = arith.addf %564, %565 : vector<2x96xf32>
    %567 = vector.extract_strided_slice %563 {offsets = [0, 0], sizes = [2, 32], strides = [1, 1]} : vector<2x96xf32> to vector<2x32xf32>
    %568 = vector.extract_strided_slice %566 {offsets = [0, 0], sizes = [2, 32], strides = [1, 1]} : vector<2x96xf32> to vector<2x32xf32>
    %569 = arith.addf %567, %568 : vector<2x32xf32>
    %570 = arith.negf %569 : vector<2x32xf32>
    %571 = math.exp %570 : vector<2x32xf32>
    %cst_208 = arith.constant 1.000000e+00 : f32
    %572 = vector.broadcast %cst_208 : f32 to vector<2x32xf32>
    %573 = arith.addf %572, %571 : vector<2x32xf32>
    %574 = arith.divf %572, %573 : vector<2x32xf32>
    %575 = vector.extract_strided_slice %563 {offsets = [0, 32], sizes = [2, 32], strides = [1, 1]} : vector<2x96xf32> to vector<2x32xf32>
    %576 = vector.extract_strided_slice %566 {offsets = [0, 32], sizes = [2, 32], strides = [1, 1]} : vector<2x96xf32> to vector<2x32xf32>
    %577 = arith.addf %575, %576 : vector<2x32xf32>
    %578 = arith.negf %577 : vector<2x32xf32>
    %579 = math.exp %578 : vector<2x32xf32>
    %cst_209 = arith.constant 1.000000e+00 : f32
    %580 = vector.broadcast %cst_209 : f32 to vector<2x32xf32>
    %581 = arith.addf %580, %579 : vector<2x32xf32>
    %582 = arith.divf %580, %581 : vector<2x32xf32>
    %583 = vector.extract_strided_slice %563 {offsets = [0, 64], sizes = [2, 32], strides = [1, 1]} : vector<2x96xf32> to vector<2x32xf32>
    %584 = vector.extract_strided_slice %566 {offsets = [0, 64], sizes = [2, 32], strides = [1, 1]} : vector<2x96xf32> to vector<2x32xf32>
    %585 = arith.mulf %574, %584 : vector<2x32xf32>
    %586 = arith.addf %583, %585 : vector<2x32xf32>
    %587 = math.tanh %586 : vector<2x32xf32>
    %cst_210 = arith.constant 1.000000e+00 : f32
    %588 = vector.broadcast %cst_210 : f32 to vector<2x32xf32>
    %589 = arith.subf %588, %582 : vector<2x32xf32>
    %590 = arith.mulf %589, %587 : vector<2x32xf32>
    %591 = arith.mulf %582, %555 : vector<2x32xf32>
    %592 = arith.addf %590, %591 : vector<2x32xf32>
    %cst_211 = arith.constant dense<0.000000e+00> : vector<2x1xf32>
    %593 = tpu.matmul %592, %109, %cst_211 {dimension_numbers = #tpu.dot_dimension_numbers<[1], [0], [0], [1], [0, 0, 1, 1], [], []>} : vector<2x32xf32>, vector<32x1xf32>, vector<2x1xf32> -> vector<2x1xf32>
    %594 = vector.broadcast %110 : vector<1x1xf32> to vector<2x1xf32>
    %595 = arith.addf %593, %594 : vector<2x1xf32>
    %596 = vector.broadcast %595 : vector<2x1xf32> to vector<2x96xf32>
    %597 = vector.broadcast %105 : vector<1x96xf32> to vector<2x96xf32>
    %598 = arith.mulf %596, %597 : vector<2x96xf32>
    %599 = vector.broadcast %107 : vector<1x96xf32> to vector<2x96xf32>
    %600 = arith.addf %598, %599 : vector<2x96xf32>
    %cst_212 = arith.constant dense<0.000000e+00> : vector<2x96xf32>
    %601 = tpu.matmul %592, %106, %cst_212 {dimension_numbers = #tpu.dot_dimension_numbers<[1], [0], [0], [1], [0, 0, 1, 1], [], []>} : vector<2x32xf32>, vector<32x96xf32>, vector<2x96xf32> -> vector<2x96xf32>
    %602 = vector.broadcast %108 : vector<1x96xf32> to vector<2x96xf32>
    %603 = arith.addf %601, %602 : vector<2x96xf32>
    %604 = vector.extract_strided_slice %600 {offsets = [0, 0], sizes = [2, 32], strides = [1, 1]} : vector<2x96xf32> to vector<2x32xf32>
    %605 = vector.extract_strided_slice %603 {offsets = [0, 0], sizes = [2, 32], strides = [1, 1]} : vector<2x96xf32> to vector<2x32xf32>
    %606 = arith.addf %604, %605 : vector<2x32xf32>
    %607 = arith.negf %606 : vector<2x32xf32>
    %608 = math.exp %607 : vector<2x32xf32>
    %cst_213 = arith.constant 1.000000e+00 : f32
    %609 = vector.broadcast %cst_213 : f32 to vector<2x32xf32>
    %610 = arith.addf %609, %608 : vector<2x32xf32>
    %611 = arith.divf %609, %610 : vector<2x32xf32>
    %612 = vector.extract_strided_slice %600 {offsets = [0, 32], sizes = [2, 32], strides = [1, 1]} : vector<2x96xf32> to vector<2x32xf32>
    %613 = vector.extract_strided_slice %603 {offsets = [0, 32], sizes = [2, 32], strides = [1, 1]} : vector<2x96xf32> to vector<2x32xf32>
    %614 = arith.addf %612, %613 : vector<2x32xf32>
    %615 = arith.negf %614 : vector<2x32xf32>
    %616 = math.exp %615 : vector<2x32xf32>
    %cst_214 = arith.constant 1.000000e+00 : f32
    %617 = vector.broadcast %cst_214 : f32 to vector<2x32xf32>
    %618 = arith.addf %617, %616 : vector<2x32xf32>
    %619 = arith.divf %617, %618 : vector<2x32xf32>
    %620 = vector.extract_strided_slice %600 {offsets = [0, 64], sizes = [2, 32], strides = [1, 1]} : vector<2x96xf32> to vector<2x32xf32>
    %621 = vector.extract_strided_slice %603 {offsets = [0, 64], sizes = [2, 32], strides = [1, 1]} : vector<2x96xf32> to vector<2x32xf32>
    %622 = arith.mulf %611, %621 : vector<2x32xf32>
    %623 = arith.addf %620, %622 : vector<2x32xf32>
    %624 = math.tanh %623 : vector<2x32xf32>
    %cst_215 = arith.constant 1.000000e+00 : f32
    %625 = vector.broadcast %cst_215 : f32 to vector<2x32xf32>
    %626 = arith.subf %625, %619 : vector<2x32xf32>
    %627 = arith.mulf %626, %624 : vector<2x32xf32>
    %628 = arith.mulf %619, %592 : vector<2x32xf32>
    %629 = arith.addf %627, %628 : vector<2x32xf32>
    %cst_216 = arith.constant dense<0.000000e+00> : vector<2x1xf32>
    %630 = tpu.matmul %629, %109, %cst_216 {dimension_numbers = #tpu.dot_dimension_numbers<[1], [0], [0], [1], [0, 0, 1, 1], [], []>} : vector<2x32xf32>, vector<32x1xf32>, vector<2x1xf32> -> vector<2x1xf32>
    %631 = vector.broadcast %110 : vector<1x1xf32> to vector<2x1xf32>
    %632 = arith.addf %630, %631 : vector<2x1xf32>
    %633 = tpu.concatenate %151, %225, %299, %373, %447, %521 in 1 : vector<2x1xf32>, vector<2x1xf32>, vector<2x1xf32>, vector<2x1xf32>, vector<2x1xf32>, vector<2x1xf32> -> vector<2x6xf32>
    %c0_217 = arith.constant 0 : index
    %c0_218 = arith.constant 0 : index
    %634 = vector.load %arg25[%c0_217, %c0_218] : memref<2x6xf32, #tpu.memory_space<vmem>>, vector<2x6xf32>
    tpu.vector_store %arg25[%c0_217, %c0_218], %633 {strides = array<i32>} : memref<2x6xf32, #tpu.memory_space<vmem>>, vector<2x6xf32>,
    %635 = tpu.concatenate %188, %262, %336, %410, %484, %558, %595, %632 in 1 : vector<2x1xf32>, vector<2x1xf32>, vector<2x1xf32>, vector<2x1xf32>, vector<2x1xf32>, vector<2x1xf32>, vector<2x1xf32>, vector<2x1xf32> -> vector<2x8xf32>
    %c0_219 = arith.constant 0 : index
    %c0_220 = arith.constant 0 : index
    %636 = vector.load %arg26[%c0_219, %c0_220] : memref<2x8xf32, #tpu.memory_space<vmem>>, vector<2x8xf32>
    tpu.vector_store %arg26[%c0_219, %c0_220], %635 {strides = array<i32>} : memref<2x8xf32, #tpu.memory_space<vmem>>, vector<2x8xf32>,
    return
  }
}

</mosaic_0001>

<bundles_post_ra>
// kernel: sub.1
= control target key start
LH: loop header
LB: loop body
LE: loop exit
PB: predicated region body
PF: predicated region fallthrough
CT: control target
= control target key end

     0   :  { %3 = vsyncpa [#allocation1], 0  ;;  %s69_s0 = inlined_call_operand.vmem [shape: f32[2,8], index: 0, kind: input, shape index: {}]   ;;  %s70_s1 = inlined_call_operand.vmem [shape: f32[2,8], index: 1, kind: input, shape index: {}]   ;;  %s71_s2 = inlined_call_operand.hbm [shape: f32[2,8], index: 2, kind: output, shape index: {}]  }
   0x1   :  { %v4_v0 = vld [vmem:[%s69_s0] sm:$0x3] }
   0x2   :  { %v5_v1 = vld [vmem:[%s70_s1] sm:$0x3]  ;;  %s44_s1 = smov [#allocation0]  }
   0x3   :  { %v8_v2 = vsub.f32 %v4_v0, %v5_v1  ;;  %s15_s12 = sshll.u32 %s44_s1, 4  ;;  %s16_s12 = int_to_ptr.vmem [resolvable:$true] %s15_s12 }
   0x4   :  { %s22_s13 = scalar_lea.vmem %s16_s12, 32  ;;  %p27_p1 = scmp.lt.s32.totalorder %s16_s12, %s16_s12 }
   0x5   :  { %10 = vst [vmem:[#allocation0] sm:$0x3] %v8_v2  ;;  %p23_p0 = scmp.ne.s32.totalorder %s16_s12, %s22_s13  ;;  %p28_p2 = scmp.lt.s32.totalorder %s22_s13, %s22_s13 }
   0x7   :  { %p29_p3 = por %p28_p2, %p27_p1 }
   0x9   :  { %p30_p4 = pnand %p29_p3, %p23_p0 }
   0xb   :  { %33 = shalt.err (!%p30_p4)
}
   0xc   :  { %18 = dma.vmem_to_hbm [thread:$0]  %s16_s12, 32, %s71_s2, [#allocation1]  }
   0xd   :  { %42 = dma.done.wait [#allocation1], 32  }
   0xe   :  { %43 = vsyncadd [#allocation1], 4294967264 }
   0xf   :  { %20 = vsyncpa [#allocation1], 1 }

// kernel: basic_block_forward.1
= control target key start
LH: loop header
LB: loop body
LE: loop exit
PB: predicated region body
PF: predicated region fallthrough
CT: control target
= control target key end

     0   :  { %s6086_s0 = inlined_call_operand.vmem [shape: f32[2,8,4], index: 0, kind: input, shape index: {}]   ;;  %s6087_s1 = inlined_call_operand.hbm [shape: f32[5,4,16], index: 1, kind: input, shape index: {}]   ;;  %s6088_s2 = inlined_call_operand.hbm [shape: f32[1,16], index: 2, kind: input, shape index: {}]   ;;  %s6089_s3 = inlined_call_operand.vmem [shape: f32[5,16,16], index: 3, kind: input, shape index: {}]   ;;  %s6090_s4 = inlined_call_operand.hbm [shape: f32[1,16], index: 4, kind: input, shape index: {}]   ;;  %s6091_s5 = inlined_call_operand.hbm [shape: f32[4,16], index: 5, kind: input, shape index: {}]   ;;  %s6092_s6 = inlined_call_operand.hbm [shape: f32[1,16], index: 6, kind: input, shape index: {}]   ;;  %s6093_s7 = inlined_call_operand.hbm [shape: f32[5,16,32], index: 7, kind: input, shape index: {}]   ;;  %s6094_s8 = inlined_call_operand.hbm [shape: f32[1,32], index: 8, kind: input, shape index: {}]   ;;  %s6095_s9 = inlined_call_operand.hbm [shape: f32[5,32,32], index: 9, kind: input, shape index: {}]   ;;  %s6096_s10 = inlined_call_operand.hbm [shape: f32[1,32], index: 10, kind: input, shape index: {}]   ;;  %s6097_s11 = inlined_call_operand.hbm [shape: f32[16,32], index: 11, kind: input, shape index: {}]   ;;  %s6098_s12 = inlined_call_operand.hbm [shape: f32[1,32], index: 12, kind: input, shape index: {}]   ;;  %s6099_s13 = inlined_call_operand.hbm [shape: f32[1,96], index: 13, kind: input, shape index: {}]   ;;  %s6100_s14 = inlined_call_operand.vmem [shape: f32[32,96], index: 14, kind: input, shape index: {}]   ;;  %s6101_s15 = inlined_call_operand.hbm [shape: f32[1,96], index: 15, kind: input, shape index: {}]   ;;  %s6102_s16 = inlined_call_operand.hbm [shape: f32[1,96], index: 16, kind: input, shape index: {}]   ;;  %s6103_s17 = inlined_call_operand.vmem [shape: f32[32,1], index: 17, kind: input, shape index: {}]   ;;  %s6104_s18 = inlined_call_operand.<no memory space> [shape: f32[1,1], index: 18, kind: input, shape index: {}]   ;;  %s6105_s19 = inlined_call_operand.vmem [shape: f32[1,96], index: 19, kind: input, shape index: {}]   ;;  %s6106_s20 = inlined_call_operand.hbm [shape: f32[32,96], index: 20, kind: input, shape index: {}]   ;;  %s6107_s21 = inlined_call_operand.vmem [shape: f32[1,96], index: 21, kind: input, shape index: {}]   ;;  %s6108_s22 = inlined_call_operand.vmem [shape: f32[1,96], index: 22, kind: input, shape index: {}]   ;;  %s6109_s23 = inlined_call_operand.vmem [shape: f32[32,1], index: 23, kind: input, shape index: {}]   ;;  %s6110_s25 = inlined_call_operand.hbm [shape: f32[2,6], index: 25, kind: output, shape index: {0}]   ;;  %s6111_s26 = inlined_call_operand.vmem [shape: f32[2,8], index: 26, kind: output, shape index: {1}]   ;;  %s6112_s24 = inlined_call_operand.<no memory space> [shape: f32[1,1], index: 24, kind: input, shape index: {}]  }
   0x1   :  { %6115 = sst [smem:[#allocation39_spill]] %s6086_s0  ;;  %v32_v0 = vstv %s6104_s18  ;;  %v34_v1 = vstv %s6112_s24 }
   0x2   :  { %6116 = sst [smem:[#allocation40_spill]] %s6087_s1  ;;  %33 = vst [vmem:[#allocation3] sm:$0x1] %v32_v0  ;;  %35 = vst [vmem:[#allocation4] sm:$0x1] %v34_v1 }
   0x3   :  { %6117 = sst [smem:[#allocation41_spill]] %s6088_s2 }
   0x4   :  { %6118 = sst [smem:[#allocation42_spill]] %s6089_s3 }
   0x5   :  { %6119 = sst [smem:[#allocation43_spill]] %s6090_s4 }
   0x6   :  { %6120 = sst [smem:[#allocation44_spill]] %s6091_s5 }
   0x7   :  { %6121 = sst [smem:[#allocation45_spill]] %s6092_s6 }
   0x8   :  { %6122 = sst [smem:[#allocation46_spill]] %s6093_s7 }
   0x9   :  { %6123 = sst [smem:[#allocation47_spill]] %s6094_s8 }
   0xa   :  { %6124 = sst [smem:[#allocation48_spill]] %s6095_s9 }
   0xb   :  { %6125 = sst [smem:[#allocation49_spill]] %s6096_s10 }
   0xc   :  { %36 = vsyncpa [#allocation6], 0 }
   0xd   :  { %37 = vsyncpa [#allocation9], 0 }
   0xe   :  { %38 = vsyncpa [#allocation12], 0 }
   0xf   :  { %39 = vsyncpa [#allocation15], 0 }
  0x10   :  { %40 = vsyncpa [#allocation18], 0 }
  0x11   :  { %41 = vsyncpa [#allocation21], 0 }
  0x12   :  { %42 = vsyncpa [#allocation24], 0 }
  0x13   :  { %43 = vsyncpa [#allocation27], 0 }
  0x14   :  { %44 = vsyncpa [#allocation7], 0  ;;  %s4961_s8 = smov [#allocation8]   ;;  %s4962_s29 = smov [#allocation11]  }
  0x15   :  { %s65_s4 = sshll.u32 %s4961_s8, 4  ;;  %s87_s0 = sshll.u32 %s4962_s29, 4  ;;  %s66_s4 = int_to_ptr.vmem [resolvable:$true] %s65_s4  ;;  %s88_s0 = int_to_ptr.vmem [resolvable:$true] %s87_s0 }
  0x16   :  { %s4631_s18 = scalar_lea.vmem %s66_s4, 16  ;;  %s4635_s24 = scalar_lea.vmem %s66_s4, 32 }
  0x17   :  { %p4632_p0 = scmp.ne.s32.totalorder %s66_s4, %s4631_s18  ;;  %p4636_p1 = scmp.lt.s32.totalorder %s66_s4, %s66_s4 }
  0x18   :  { %p4637_p2 = scmp.lt.s32.totalorder %s4635_s24, %s4631_s18 }
  0x1a   :  { %p4638_p3 = por %p4637_p2, %p4636_p1 }
  0x1c   :  { %p4639_p4 = pnand %p4638_p3, %p4632_p0 }
  0x1e   :  { %4642 = shalt.err (!%p4639_p4)
}
  0x1f   :  { %s6126_s2 = sld [smem:[#allocation41_spill]]  ;;  %s4651_s5 = scalar_lea.vmem %s88_s0, 64 }
  0x20   :  { %p4652_p5 = scmp.ne.s32.totalorder %s88_s0, %s4651_s5  ;;  %p4656_p6 = scmp.lt.s32.totalorder %s88_s0, %s88_s0 }
  0x21   :  { %p4657_p7 = scmp.lt.s32.totalorder %s4651_s5, %s4651_s5 }
  0x23   :  { %p4658_p8 = por %p4657_p7, %p4656_p6 }
  0x25   :  { %68 = dma.hbm_to_vmem [thread:$0]  %s6126_s2, 16, %s66_s4, [#allocation9]  }
  0x26   :  { %p4659_p9 = pnand %p4658_p8, %p4652_p5 }
  0x28   :  { %4662 = shalt.err (!%p4659_p9)
}
  0x29   :  { %s6127_s1 = sld [smem:[#allocation44_spill]]  ;;  %s4963_s27 = smov [#allocation14]  }
  0x2a   :  { %s106_s3 = sshll.u32 %s4963_s27, 4  ;;  %s107_s3 = int_to_ptr.vmem [resolvable:$true] %s106_s3 }
  0x2b   :  { %s4671_s7 = scalar_lea.vmem %s107_s3, 1280  ;;  %p4676_p11 = scmp.lt.s32.totalorder %s107_s3, %s107_s3 }
  0x2c   :  { %p4672_p10 = scmp.ne.s32.totalorder %s107_s3, %s4671_s7  ;;  %p4677_p12 = scmp.lt.s32.totalorder %s4671_s7, %s4671_s7 }
  0x2e   :  { %p4678_p13 = por %p4677_p12, %p4676_p11 }
  0x2f   :  { %90 = dma.hbm_to_vmem [thread:$0]  %s6127_s1, 64, %s88_s0, [#allocation12]  }
  0x30   :  { %p4679_p0 = pnand %p4678_p13, %p4672_p10 }
  0x32   :  { %4682 = shalt.err (!%p4679_p0)
}
  0x33   :  { %s4964_s28 = smov 128   ;;  %s4965_s8 = smov 8  }
  0x34   :  { %s6128_s18 = sld [smem:[#allocation46_spill]]  ;;  %s4966_s0 = smov [#allocation17]  }
  0x35   :  { %s128_s24 = sshll.u32 %s4966_s0, 4  ;;  %s4967_s9 = smov [#allocation20]   ;;  %s129_s24 = int_to_ptr.vmem [resolvable:$true] %s128_s24 }
  0x36   :  { %s150_s30 = sshll.u32 %s4967_s9, 4  ;;  %s4691_s2 = scalar_lea.vmem %s129_s24, 2560  ;;  %s151_s30 = int_to_ptr.vmem [resolvable:$true] %s150_s30 }
  0x37   :  { %p4692_p1 = scmp.ne.s32.totalorder %s129_s24, %s4691_s2  ;;  %p4696_p2 = scmp.lt.s32.totalorder %s129_s24, %s129_s24 }
  0x38   :  { %p4697_p3 = scmp.lt.s32.totalorder %s4691_s2, %s4691_s2 }
  0x3a   :  { %112 = dma.hbm_to_vmem [thread:$0]  %s6128_s18, 1280, %s107_s3, [#allocation15], %s4964_s28, %s4964_s28, %s4965_s8  }
  0x3b   :  { %p4698_p4 = por %p4697_p3, %p4696_p2 }
  0x3d   :  { %p4699_p5 = pnand %p4698_p4, %p4692_p1 }
  0x3f   :  { %4702 = shalt.err (!%p4699_p5)
}
  0x40   :  { %s6129_s6 = sld [smem:[#allocation48_spill]]  ;;  %s4711_s1 = scalar_lea.vmem %s151_s30, 256 }
  0x41   :  { %p4712_p6 = scmp.ne.s32.totalorder %s151_s30, %s4711_s1  ;;  %p4716_p7 = scmp.lt.s32.totalorder %s151_s30, %s151_s30 }
  0x42   :  { %p4717_p8 = scmp.lt.s32.totalorder %s4711_s1, %s4711_s1 }
  0x44   :  { %p4718_p9 = por %p4717_p8, %p4716_p7 }
  0x46   :  { %134 = dma.hbm_to_vmem [thread:$0]  %s6129_s6, 2560, %s129_s24, [#allocation18], %s4964_s28, %s4964_s28, %s4965_s8  }
  0x47   :  { %p4719_p10 = pnand %p4718_p9, %p4712_p6 }
  0x49   :  { %4722 = shalt.err (!%p4719_p10)
}
  0x4a   :  { %156 = dma.hbm_to_vmem [thread:$0]  %s6097_s11, 256, %s151_s30, [#allocation21], %s4964_s28, %s4964_s28, %s4965_s8  }
  0x4b   :  { %s4968_s7 = smov [#allocation23]   ;;  %s4969_s29 = smov [#allocation26]  }
  0x4c   :  { %s173_s4 = sshll.u32 %s4968_s7, 4  ;;  %s195_s18 = sshll.u32 %s4969_s29, 4  ;;  %s174_s4 = int_to_ptr.vmem [resolvable:$true] %s173_s4  ;;  %s196_s18 = int_to_ptr.vmem [resolvable:$true] %s195_s18 }
  0x4d   :  { %s4731_s0 = scalar_lea.vmem %s174_s4, 16  ;;  %s4735_s24 = scalar_lea.vmem %s174_s4, 32 }
  0x4e   :  { %p4732_p11 = scmp.ne.s32.totalorder %s174_s4, %s4731_s0  ;;  %p4736_p12 = scmp.lt.s32.totalorder %s174_s4, %s174_s4 }
  0x4f   :  { %p4737_p13 = scmp.lt.s32.totalorder %s4735_s24, %s4731_s0 }
  0x51   :  { %p4738_p0 = por %p4737_p13, %p4736_p12 }
  0x53   :  { %p4739_p1 = pnand %p4738_p0, %p4732_p11 }
  0x55   :  { %4742 = shalt.err (!%p4739_p1)
}
  0x56   :  { %176 = dma.hbm_to_vmem [thread:$0]  %s6099_s13, 16, %s174_s4, [#allocation24]  }
  0x57   :  { %s4751_s5 = scalar_lea.vmem %s196_s18, 16  ;;  %s4755_s11 = scalar_lea.vmem %s196_s18, 32 }
  0x58   :  { %p4752_p2 = scmp.ne.s32.totalorder %s196_s18, %s4751_s5  ;;  %p4756_p3 = scmp.lt.s32.totalorder %s196_s18, %s196_s18 }
  0x59   :  { %p4757_p4 = scmp.lt.s32.totalorder %s4755_s11, %s4751_s5 }
  0x5b   :  { %p4758_p5 = por %p4757_p4, %p4756_p3 }
  0x5d   :  { %p4759_p6 = pnand %p4758_p5, %p4752_p2 }
  0x5f   :  { %4762 = shalt.err (!%p4759_p6)
}
  0x60   :  { %198 = dma.hbm_to_vmem [thread:$0]  %s6102_s16, 16, %s196_s18, [#allocation27]  }
  0x61   :  { %s4970_s6 = smov [#allocation5]  }
  0x62   :  { %s52_s1 = sshll.u32 %s4970_s6, 4  ;;  %s53_s1 = int_to_ptr.vmem [resolvable:$true] %s52_s1 }
  0x63   :  { %s4771_s27 = scalar_lea.vmem %s53_s1, 320  ;;  %p4776_p8 = scmp.lt.s32.totalorder %s53_s1, %s53_s1 }
  0x64   :  { %p4772_p7 = scmp.ne.s32.totalorder %s53_s1, %s4771_s27  ;;  %p4777_p9 = scmp.lt.s32.totalorder %s4771_s27, %s4771_s27 }
  0x66   :  { %p4778_p10 = por %p4777_p9, %p4776_p8 }
  0x68   :  { %p4779_p11 = pnand %p4778_p10, %p4772_p7 }
  0x6a   :  { %4782 = shalt.err (!%p4779_p11)
}
  0x6b   :  { %s4971_s13 = smov 64   ;;  %s4972_s3 = smov 4  }
  0x6c   :  { %s6130_s29 = sld [smem:[#allocation40_spill]]  ;;  %s4973_s16 = smov [#allocation10]  }
  0x6d   :  { %s77_s18 = sshll.u32 %s4973_s16, 4  ;;  %s4974_s0 = smov [#allocation13]   ;;  %s78_s18 = int_to_ptr.vmem [resolvable:$true] %s77_s18 }
  0x6e   :  { %s97_s24 = sshll.u32 %s4974_s0, 4  ;;  %s4791_s9 = scalar_lea.vmem %s78_s18, 16  ;;  %s98_s24 = int_to_ptr.vmem [resolvable:$true] %s97_s24 }
  0x6f   :  { %p4792_p12 = scmp.ne.s32.totalorder %s78_s18, %s4791_s9  ;;  %s4795_s2 = scalar_lea.vmem %s78_s18, 32 }
  0x70   :  { %p4796_p13 = scmp.lt.s32.totalorder %s78_s18, %s78_s18  ;;  %p4797_p0 = scmp.lt.s32.totalorder %s4795_s2, %s4791_s9 }
  0x72   :  { %58 = dma.hbm_to_vmem [thread:$0]  %s6130_s29, 320, %s53_s1, [#allocation6], %s4971_s13, %s4971_s13, %s4972_s3  }
  0x73   :  { %p4798_p1 = por %p4797_p0, %p4796_p13 }
  0x75   :  { %p4799_p2 = pnand %p4798_p1, %p4792_p12 }
  0x77   :  { %4802 = shalt.err (!%p4799_p2)
}
  0x78   :  { %s6131_s30 = sld [smem:[#allocation43_spill]]  ;;  %s4811_s10 = scalar_lea.vmem %s98_s24, 16 }
  0x79   :  { %p4812_p3 = scmp.ne.s32.totalorder %s98_s24, %s4811_s10  ;;  %s4815_s6 = scalar_lea.vmem %s98_s24, 32 }
  0x7a   :  { %p4816_p4 = scmp.lt.s32.totalorder %s98_s24, %s98_s24  ;;  %p4817_p5 = scmp.lt.s32.totalorder %s4815_s6, %s4811_s10 }
  0x7c   :  { %p4818_p6 = por %p4817_p5, %p4816_p4 }
  0x7e   :  { %80 = dma.hbm_to_vmem [thread:$0]  %s6131_s30, 16, %s78_s18, [#allocation9]  }
  0x7f   :  { %p4819_p7 = pnand %p4818_p6, %p4812_p3 }
  0x81   :  { %4822 = shalt.err (!%p4819_p7)
}
  0x82   :  { %s6132_s7 = sld [smem:[#allocation45_spill]]  ;;  %s4975_s4 = smov [#allocation16]  }
  0x83   :  { %s119_s29 = sshll.u32 %s4975_s4, 4  ;;  %s4976_s16 = smov [#allocation19]   ;;  %s120_s29 = int_to_ptr.vmem [resolvable:$true] %s119_s29 }
  0x84   :  { %s141_s0 = sshll.u32 %s4976_s16, 4  ;;  %s4831_s9 = scalar_lea.vmem %s120_s29, 16  ;;  %s142_s0 = int_to_ptr.vmem [resolvable:$true] %s141_s0 }
  0x85   :  { %p4832_p8 = scmp.ne.s32.totalorder %s120_s29, %s4831_s9  ;;  %s4835_s18 = scalar_lea.vmem %s120_s29, 32 }
  0x86   :  { %p4836_p9 = scmp.lt.s32.totalorder %s120_s29, %s120_s29  ;;  %p4837_p10 = scmp.lt.s32.totalorder %s4835_s18, %s4831_s9 }
  0x88   :  { %100 = dma.hbm_to_vmem [thread:$0]  %s6132_s7, 16, %s98_s24, [#allocation12]  }
  0x89   :  { %p4838_p11 = por %p4837_p10, %p4836_p9 }
  0x8b   :  { %p4839_p12 = pnand %p4838_p11, %p4832_p8 }
  0x8d   :  { %4842 = shalt.err (!%p4839_p12)
}
  0x8e   :  { %s6133_s11 = sld [smem:[#allocation47_spill]]  ;;  %s4851_s30 = scalar_lea.vmem %s142_s0, 16 }
  0x8f   :  { %p4852_p13 = scmp.ne.s32.totalorder %s142_s0, %s4851_s30  ;;  %s4855_s24 = scalar_lea.vmem %s142_s0, 32 }
  0x90   :  { %p4856_p0 = scmp.lt.s32.totalorder %s142_s0, %s142_s0  ;;  %p4857_p1 = scmp.lt.s32.totalorder %s4855_s24, %s4851_s30 }
  0x92   :  { %p4858_p2 = por %p4857_p1, %p4856_p0 }
  0x94   :  { %122 = dma.hbm_to_vmem [thread:$0]  %s6133_s11, 16, %s120_s29, [#allocation15]  }
  0x95   :  { %p4859_p3 = pnand %p4858_p2, %p4852_p13 }
  0x97   :  { %4862 = shalt.err (!%p4859_p3)
}
  0x98   :  { %s6134_s1 = sld [smem:[#allocation49_spill]]  ;;  %s4977_s27 = smov [#allocation22]  }
  0x99   :  { %s163_s7 = sshll.u32 %s4977_s27, 4  ;;  %s4978_s4 = smov [#allocation25]   ;;  %s164_s7 = int_to_ptr.vmem [resolvable:$true] %s163_s7 }
  0x9a   :  { %s185_s16 = sshll.u32 %s4978_s4, 4  ;;  %s4871_s9 = scalar_lea.vmem %s164_s7, 16  ;;  %s186_s16 = int_to_ptr.vmem [resolvable:$true] %s185_s16 }
  0x9b   :  { %p4872_p4 = scmp.ne.s32.totalorder %s164_s7, %s4871_s9  ;;  %s4875_s29 = scalar_lea.vmem %s164_s7, 32 }
  0x9c   :  { %p4876_p5 = scmp.lt.s32.totalorder %s164_s7, %s164_s7  ;;  %p4877_p6 = scmp.lt.s32.totalorder %s4875_s29, %s4871_s9 }
  0x9e   :  { %144 = dma.hbm_to_vmem [thread:$0]  %s6134_s1, 16, %s142_s0, [#allocation18]  }
  0x9f   :  { %p4878_p7 = por %p4877_p6, %p4876_p5 }
  0xa1   :  { %p4879_p8 = pnand %p4878_p7, %p4872_p4 }
  0xa3   :  { %4882 = shalt.err (!%p4879_p8)
}
  0xa4   :  { %166 = dma.hbm_to_vmem [thread:$0]  %s6098_s12, 16, %s164_s7, [#allocation21]  }
  0xa5   :  { %s4891_s5 = scalar_lea.vmem %s186_s16, 16  ;;  %s4895_s0 = scalar_lea.vmem %s186_s16, 32 }
  0xa6   :  { %p4892_p9 = scmp.ne.s32.totalorder %s186_s16, %s4891_s5  ;;  %p4896_p10 = scmp.lt.s32.totalorder %s186_s16, %s186_s16 }
  0xa7   :  { %p4897_p11 = scmp.lt.s32.totalorder %s4895_s0, %s4891_s5 }
  0xa9   :  { %p4898_p12 = por %p4897_p11, %p4896_p10 }
  0xab   :  { %p4899_p13 = pnand %p4898_p12, %p4892_p9 }
  0xad   :  { %4902 = shalt.err (!%p4899_p13)
}
  0xae   :  { %188 = dma.hbm_to_vmem [thread:$0]  %s6101_s15, 16, %s186_s16, [#allocation24]  }
  0xaf   :  { %s4979_s24 = smov [#allocation28]  }
  0xb0   :  { %s210_s10 = sshll.u32 %s4979_s24, 4  ;;  %s211_s10 = int_to_ptr.vmem [resolvable:$true] %s210_s10 }
  0xb1   :  { %s4911_s6 = scalar_lea.vmem %s211_s10, 512  ;;  %p4916_p1 = scmp.lt.s32.totalorder %s211_s10, %s211_s10 }
  0xb2   :  { %p4912_p0 = scmp.ne.s32.totalorder %s211_s10, %s4911_s6  ;;  %p4917_p2 = scmp.lt.s32.totalorder %s4911_s6, %s4911_s6 }
  0xb4   :  { %p4918_p3 = por %p4917_p2, %p4916_p1 }
  0xb6   :  { %p4919_p4 = pnand %p4918_p3, %p4912_p0 }
  0xb8   :  { %4922 = shalt.err (!%p4919_p4)
}
  0xb9   :  { %216 = dma.hbm_to_vmem [thread:$0]  %s6106_s20, 512, %s211_s10, [#allocation27], %s4964_s28, %s4964_s28, %s4965_s8  }
  0xba   :  { %4943 = dma.done.wait [#allocation6], 320  }
  0xbb   :  { %4944 = vsyncadd [#allocation6], 4294966976 }
  0xbc   :  { %4945 = dma.done.wait [#allocation9], 32  }
  0xbd   :  { %4946 = vsyncadd [#allocation9], 4294967264 }
  0xbe   :  { %4947 = dma.done.wait [#allocation12], 80  }
  0xbf   :  { %4948 = vsyncadd [#allocation12], 4294967216 }
  0xc0   :  { %4949 = dma.done.wait [#allocation15], 1296  }
  0xc1   :  { %4950 = vsyncadd [#allocation15], 4294966000 }
  0xc2   :  { %4951 = dma.done.wait [#allocation18], 2576  }
  0xc3   :  { %4952 = vsyncadd [#allocation18], 4294964720 }
  0xc4   :  { %4953 = dma.done.wait [#allocation21], 272  }
  0xc5   :  { %4954 = vsyncadd [#allocation21], 4294967024 }
  0xc6   :  { %4955 = dma.done.wait [#allocation24], 32  }
  0xc7   :  { %4956 = vsyncadd [#allocation24], 4294967264 }
  0xc8   :  { %4957 = dma.done.wait [#allocation27], 528  }
  0xc9   :  { %4958 = vsyncadd [#allocation27], 4294966768  ;;  %vm272_vm0 = vcmask 261120   ;;  %v4980_v2 = vmov 0.0   ;;  %vm277_vm1 = vcmask 31744   ;;  %s6135_s28 = sld [smem:[#allocation39_spill]] }
  0xca   :  { %273 = vst.msk [vmem:[#allocation2] sm:$0xff] %vm272_vm0, %v4980_v2  ;;  %274 = vst.msk [vmem:[#allocation2 + $0x8] sm:$0xff] %vm272_vm0, %v4980_v2  ;;  %v337_v5 = vld [vmem:[#allocation5 + $0x10] sm:$0xf]  ;;  %vm361_vm2 = vcmask 1043456   ;;  %v4501_v6 = vld [vmem:[#allocation5 + $0x8] sm:$0xff]  }
  0xcb   :  { %275 = vst.msk [vmem:[#allocation2 + $0x10] sm:$0xff] %vm272_vm0, %v4980_v2  ;;  %276 = vst.msk [vmem:[#allocation2 + $0x18] sm:$0xff] %vm272_vm0, %v4980_v2  ;;  %4090 = vmatprep.subr.msk.mxu0 %vm361_vm2, %v337_v5  ;;  %v4502_v7 = vld [vmem:[#allocation5] sm:$0xff]   ;;  %s4981_s4 = smov 12   ;;  %s4982_s16 = smov 16   ;;  %vm324_vm3 = vcmask 64512  }
  0xcc   :  { %4091 = vmatpush3.msk.msra.mxu0 %vm361_vm2, %v337_v5  ;;  %vm327_vm4 = vcmask 97280   ;;  %vm330_vm5 = vcmask 130048   ;;  %vm354_vm6 = vcmask 162816   ;;  %s6136_s29 = sld [smem:[#allocation42_spill]]  ;;  %v3842_v37 = vld [vmem:[#allocation8] ss:$0 sm:$0xff] }
  0xcd   :  { %4092 = vmatprep.subr.mxu0 %v4501_v6  ;;  %v600_v61 = vld [vmem:[#allocation11] sm:$0xf]  ;;  %s4983_s9 = smov 32   ;;  %vm493_vm7 = vcmask 392192   ;;  %vm496_vm8 = vcmask 523264   ;;  %vm516_vm9 = vcmask 654336  }
  0xce   :  { %4093 = vmatpush3.msra.mxu0 %v4501_v6  ;;  %vm896_vm10 = vcmask 785408   ;;  %vm4986_vm11 = vmmov 0   ;;  %vm1161_vm12 = vcmask 1041409   ;;  %s4989_s7 = smov 2   ;;  %vm3772_vm13 = vcmask 7168  }
  0xcf   :  { %v5207_v3 = vld [vmem:[%s6135_s28] sm:$0xff]  ;;  %v5212_v4 = vld [vmem:[%s6135_s28 + $0x8] sm:$0xff]  ;;  %4094 = vmatprep.subr.mxu0 %v4502_v7  ;;  %vm3774_vm14 = vcmask 15360   ;;  %vm3776_vm15 = vcmask 23552  }
  0xd0   :  { %278 = vst.msk [vmem:[#allocation2 + $0x4] sm:$0xff] %vm277_vm1, %v5207_v3  ;;  %279 = vst.msk [vmem:[#allocation2 + $0x14] sm:$0xff] %vm277_vm1, %v5212_v4  ;;  %4095 = vmatpush3.msra.mxu0 %v4502_v7 }
  0xd2   :  { %v508_v34 = vld [vmem:[%s6136_s29 + $0x48] sm:$0xff]  ;;  %v507_v35 = vld [vmem:[%s6136_s29 + $0x40] sm:$0xff]  ;;  %v506_v36 = vld [vmem:[%s6136_s29 + $0x38] sm:$0xff] }
  0xd3   :  { %4099 = vmatprep.subr.mxu1 %v508_v34  ;;  %v505_v39 = vld [vmem:[%s6136_s29 + $0x30] sm:$0xff]  ;;  %v504_v42 = vld [vmem:[%s6136_s29 + $0x28] sm:$0xff]  ;;  %v503_v45 = vld [vmem:[%s6136_s29 + $0x20] sm:$0xff] }
  0xd4   :  { %4100 = vmatpush3.msra.mxu1 %v508_v34  ;;  %v502_v47 = vld [vmem:[%s6136_s29 + $0x18] sm:$0xff]  ;;  %v501_v48 = vld [vmem:[%s6136_s29 + $0x10] sm:$0xff]  ;;  %v500_v49 = vld [vmem:[%s6136_s29 + $0x8] sm:$0xff] }
  0xd5   :  { %4101 = vmatprep.subr.mxu1 %v507_v35  ;;  %v499_v55 = vld [vmem:[%s6136_s29] sm:$0xff]  ;;  %s4984_s29 = smov 48  }
  0xd6   :  { %4102 = vmatpush3.msra.mxu1 %v507_v35 }
  0xd7   :  { %v284_v8 = vld [vmem:[#allocation2 + $0x2] sm:$0xff]  ;;  %v285_v10 = vld [vmem:[#allocation2 + $0x12] sm:$0xff]  ;;  %4103 = vmatprep.subr.mxu1 %v506_v36 }
  0xd8   :  { %v282_v9 = vld [vmem:[#allocation2 + $0x1] sm:$0xff]  ;;  %300 = vrot.lane.b32.xlu1 %v284_v8, %s4965_s8  ;;  %v283_v11 = vld [vmem:[#allocation2 + $0x11] sm:$0xff]  ;;  %4104 = vmatpush3.msra.mxu1 %v506_v36 }
  0xd9   :  { %292 = vrot.lane.b32.xlu0 %v282_v9, %s4972_s3  ;;  %v287_v12 = vld [vmem:[#allocation2 + $0x13] sm:$0xff]  ;;  %v286_v13 = vld [vmem:[#allocation2 + $0x3] sm:$0xff]  ;;  %4105 = vmatprep.subr.mxu1 %v505_v39 }
  0xda   :  { %v289_v14 = vld [vmem:[#allocation2 + $0x14] sm:$0xff]  ;;  %v288_v15 = vld [vmem:[#allocation2 + $0x4] sm:$0xff]  ;;  %4106 = vmatpush3.msra.mxu1 %v505_v39 }
  0xdb   :  { %v280_v16 = vld [vmem:[#allocation2] sm:$0xff]  ;;  %444 = vst.msk [vmem:[#allocation2 + $0x18] sm:$0xff] %vm272_vm0, %v4980_v2  ;;  %442 = vst.msk [vmem:[#allocation2 + $0x8] sm:$0xff] %vm272_vm0, %v4980_v2  ;;  %v281_v17 = vld [vmem:[#allocation2 + $0x10] sm:$0xff]  ;;  %4107 = vmatprep.subr.mxu1 %v504_v42 }
  0xdc   :  { %441 = vst.msk [vmem:[#allocation2] sm:$0xff] %vm272_vm0, %v4980_v2  ;;  %443 = vst.msk [vmem:[#allocation2 + $0x10] sm:$0xff] %vm272_vm0, %v4980_v2  ;;  %302 = vrot.lane.b32.xlu1 %v285_v10, %s4965_s8  ;;  %4108 = vmatpush3.msra.mxu1 %v504_v42  ;;  %v757_v36 = vld [vmem:[#allocation14 + $0x28] sm:$0xff]  ;;  %v755_v39 = vld [vmem:[#allocation14 + $0x18] sm:$0xff]  ;;  %s4991_s8 = smov 5  }
  0xdd   :  { %294 = vrot.lane.b32.xlu0 %v283_v11, %s4972_s3  ;;  %4109 = vmatprep.subr.mxu1 %v503_v45 }
  0xde   :  { %4110 = vmatpush3.msra.mxu1 %v503_v45 }
  0xdf   :  { %4111 = vmatprep.subr.mxu1 %v502_v47 }
  0xe0   :  { %310 = vrot.lane.b32.xlu1 %v287_v12, %s4981_s4  ;;  %4112 = vmatpush3.msra.mxu1 %v502_v47  ;;  %v753_v47 = vld [vmem:[#allocation14 + $0x8] sm:$0xff] }
  0xe1   :  { %308 = vrot.lane.b32.xlu0 %v286_v13, %s4981_s4  ;;  %4113 = vmatprep.subr.mxu1 %v501_v48  ;;  %s4990_s4 = smov 3  }
  0xe2   :  { %4114 = vmatpush3.msra.mxu1 %v501_v48 }
  0xe3   :  { %4115 = vmatprep.subr.mxu1 %v500_v49 }
  0xe4   :  { %318 = vrot.lane.b32.xlu1 %v289_v14, %s4982_s16  ;;  %4116 = vmatpush3.msra.mxu1 %v500_v49 }
  0xe5   :  { %316 = vrot.lane.b32.xlu0 %v288_v15, %s4982_s16  ;;  %4117 = vmatprep.subr.mxu1 %v499_v55 }
  0xe6   :  { %4118 = vmatpush3.msra.mxu1 %v499_v55 }
  0xe7   :  { %4122 = vmatprep.subr.msk.mxu1 %vm361_vm2, %v600_v61 }
 0x14a   :  { %v301_v18 = vpop.permute.xlu1 %300 }
 0x14b   :  { %v293_v19 = vpop.permute.xlu0 %292 }
 0x14c   :  { %v322_v22 = vsel %vm277_vm1, %v280_v16, %v293_v19  ;;  %v3846_v19 = vld [vmem:[#allocation10] ss:$0 sm:$0xff] }
 0x14d   :  { %v325_v27 = vsel %vm324_vm3, %v322_v22, %v301_v18  ;;  %v760_v18 = vld [vmem:[#allocation14 + $0x40] sm:$0xff] }
 0x14e   :  { %v303_v20 = vpop.permute.xlu1 %302 }
 0x14f   :  { %v295_v21 = vpop.permute.xlu0 %294 }
 0x150   :  { %v323_v23 = vsel %vm277_vm1, %v281_v17, %v295_v21  ;;  %v761_v17 = vld [vmem:[#allocation14 + $0x48] sm:$0xff] }
 0x151   :  { %v326_v26 = vsel %vm324_vm3, %v323_v23, %v303_v20  ;;  %4127 = vmatprep.subr.mxu0 %v761_v17  ;;  %v3849_v23 = vld [vmem:[#allocation13] ss:$0 sm:$0xff]  ;;  %vm3779_vm3 = vcmask 39936  }
 0x152   :  { %v311_v24 = vpop.permute.xlu1 %310 }
 0x153   :  { %v309_v25 = vpop.permute.xlu0 %308  ;;  %v329_v28 = vsel %vm327_vm4, %v326_v26, %v311_v24 }
 0x154   :  { %v328_v29 = vsel %vm327_vm4, %v325_v27, %v309_v25 }
 0x156   :  { %v319_v30 = vpop.permute.xlu1 %318 }
 0x157   :  { %v317_v31 = vpop.permute.xlu0 %316  ;;  %v332_v32 = vsel %vm330_vm5, %v329_v28, %v319_v30 }
 0x158   :  { %v331_v33 = vsel %vm330_vm5, %v328_v29, %v317_v31  ;;  %v759_v29 = vld [vmem:[#allocation14 + $0x38] sm:$0xff] }
 0x159   :  { %4096 = vmatprep.mubr.msk.f32.mxu0 %vm354_vm6, %v331_v33  ;;  %v758_v33 = vld [vmem:[#allocation14 + $0x30] sm:$0xff] }
 0x15a   :  { %4097 = vmatmul.mubr.msk.f32.vlgmr.msra.gmra.mxu0 %vm354_vm6, %v332_v32 }
 0x15b   :  { %4128 = vmatpush3.msra.mxu0 %v761_v17  ;;  %v907_v17 = vld [vmem:[#allocation17 + $0x40] sm:$0xff] }
 0x15c   :  { %4129 = vmatprep.subr.mxu0 %v760_v18 }
 0x15d   :  { %4130 = vmatpush3.msra.mxu0 %v760_v18  ;;  %v906_v18 = vld [vmem:[#allocation17 + $0x38] sm:$0xff] }
 0x15e   :  { %4131 = vmatprep.subr.mxu0 %v759_v29 }
 0x15f   :  { %4132 = vmatpush3.msra.mxu0 %v759_v29 }
 0x160   :  { %4133 = vmatprep.subr.mxu0 %v758_v33 }
 0x161   :  { %4134 = vmatpush3.msra.mxu0 %v758_v33 }
 0x162   :  { %4135 = vmatprep.subr.mxu0 %v757_v36 }
 0x163   :  { %4136 = vmatpush3.msra.mxu0 %v757_v36  ;;  %v915_v36 = vld [vmem:[#allocation17 + $0x80] sm:$0xff] }
 0x21a   :  { %v4098_v38 = vpop.f32.mrf.mxu0 }
 0x21b   :  { %v436_v40 = vadd.f32 %v4098_v38, %v3842_v37  ;;  %v756_v38 = vld [vmem:[#allocation14 + $0x20] sm:$0xff] }
 0x21c   :  { %v430_v41 = vpop.f32.mrf.mxu0  ;;  %4137 = vmatprep.subr.mxu0 %v756_v38 }
 0x21d   :  { %v440_v43 = vmax.f32 %v436_v40, 0.0  ;;  %v431_v44 = vadd.f32 %v3842_v37, %v430_v41  ;;  %4138 = vmatpush3.msra.mxu0 %v756_v38  ;;  %v754_v40 = vld [vmem:[#allocation14 + $0x10] sm:$0xff] }
 0x21e   :  { %4139 = vmatprep.subr.mxu0 %v755_v39 }
 0x21f   :  { %446 = vst.msk [vmem:[#allocation2 + $0x14] sm:$0xff] %vm330_vm5, %v440_v43  ;;  %v439_v46 = vmax.f32 %v431_v44, 0.0  ;;  %4140 = vmatpush3.msra.mxu0 %v755_v39 }
 0x220   :  { %4141 = vmatprep.subr.mxu0 %v754_v40 }
 0x221   :  { %445 = vst.msk [vmem:[#allocation2 + $0x4] sm:$0xff] %vm330_vm5, %v439_v46  ;;  %4142 = vmatpush3.msra.mxu0 %v754_v40 }
 0x222   :  { %4143 = vmatprep.subr.mxu0 %v753_v47 }
 0x223   :  { %4144 = vmatpush3.msra.mxu0 %v753_v47 }
 0x226   :  { %v450_v50 = vld [vmem:[#allocation2 + $0x11] sm:$0xff] }
 0x227   :  { %v452_v51 = vld [vmem:[#allocation2 + $0x12] sm:$0xff]  ;;  %461 = vrot.lane.b32.xlu1 %v450_v50, %s4982_s16 }
 0x228   :  { %v454_v52 = vld [vmem:[#allocation2 + $0x13] sm:$0xff]  ;;  %v449_v56 = vld [vmem:[#allocation2 + $0x1] sm:$0xff] }
 0x229   :  { %v456_v53 = vld [vmem:[#allocation2 + $0x14] sm:$0xff]  ;;  %v451_v57 = vld [vmem:[#allocation2 + $0x2] sm:$0xff]  ;;  %459 = vrot.lane.b32.xlu0 %v449_v56, %s4982_s16 }
 0x22a   :  { %v448_v54 = vld [vmem:[#allocation2 + $0x10] sm:$0xff]  ;;  %v453_v58 = vld [vmem:[#allocation2 + $0x3] sm:$0xff]  ;;  %699 = vst.msk [vmem:[#allocation2 + $0x18] sm:$0xff] %vm272_vm0, %v4980_v2 }
 0x22b   :  { %698 = vst.msk [vmem:[#allocation2 + $0x10] sm:$0xff] %vm272_vm0, %v4980_v2  ;;  %v455_v59 = vld [vmem:[#allocation2 + $0x4] sm:$0xff]  ;;  %469 = vrot.lane.b32.xlu1 %v452_v51, %s4983_s9 }
 0x22c   :  { %v447_v60 = vld [vmem:[#allocation2] sm:$0xff]  ;;  %697 = vst.msk [vmem:[#allocation2 + $0x8] sm:$0xff] %vm272_vm0, %v4980_v2 }
 0x22d   :  { %696 = vst.msk [vmem:[#allocation2] sm:$0xff] %vm272_vm0, %v4980_v2  ;;  %467 = vrot.lane.b32.xlu0 %v451_v57, %s4983_s9 }
 0x22f   :  { %477 = vrot.lane.b32.xlu1 %v454_v52, %s4984_s29  ;;  %v752_v52 = vld [vmem:[#allocation14] sm:$0xff] }
 0x230   :  { %4145 = vmatprep.subr.mxu0 %v752_v52 }
 0x231   :  { %475 = vrot.lane.b32.xlu0 %v453_v58, %s4984_s29  ;;  %4146 = vmatpush3.msra.mxu0 %v752_v52 }
 0x232   :  { %v703_v41 = vld [vmem:[#allocation2 + $0x10] sm:$0xff] }
 0x233   :  { %485 = vrot.lane.b32.xlu1 %v456_v53, %s4971_s13  ;;  %v1010_v53 = vld [vmem:[#allocation20 + $0x8] sm:$0xff] }
 0x234   :  { %v702_v46 = vld [vmem:[#allocation2] sm:$0xff]  ;;  %4150 = vmatprep.subr.mxu0 %v1010_v53 }
 0x235   :  { %483 = vrot.lane.b32.xlu0 %v455_v59, %s4971_s13 }
 0x299   :  { %v462_v62 = vpop.permute.xlu1 %461 }
 0x29a   :  { %v490_v8 = vsel %vm330_vm5, %v448_v54, %v462_v62 }
 0x29b   :  { %v460_v63 = vpop.permute.xlu0 %459 }
 0x29c   :  { %v489_v7 = vsel %vm330_vm5, %v447_v60, %v460_v63 }
 0x29d   :  { %v470_v0 = vpop.permute.xlu1 %469 }
 0x29e   :  { %v492_v11 = vsel %vm272_vm0, %v490_v8, %v470_v0 }
 0x29f   :  { %v468_v1 = vpop.permute.xlu0 %467 }
 0x2a0   :  { %v491_v9 = vsel %vm272_vm0, %v489_v7, %v468_v1 }
 0x2a1   :  { %v478_v5 = vpop.permute.xlu1 %477 }
 0x2a2   :  { %v495_v14 = vsel %vm493_vm7, %v492_v11, %v478_v5  ;;  %v913_v11 = vld [vmem:[#allocation17 + $0x70] sm:$0xff] }
 0x2a3   :  { %v476_v6 = vpop.permute.xlu0 %475 }
 0x2a4   :  { %v494_v12 = vsel %vm493_vm7, %v491_v9, %v476_v6  ;;  %v1009_v9 = vld [vmem:[#allocation20] sm:$0xff] }
 0x2a5   :  { %v486_v10 = vpop.permute.xlu1 %485 }
 0x2a6   :  { %v498_v16 = vsel %vm496_vm8, %v495_v14, %v486_v10  ;;  %v914_v10 = vld [vmem:[#allocation17 + $0x78] sm:$0xff] }
 0x2a7   :  { %v484_v13 = vpop.permute.xlu0 %483  ;;  %v910_v14 = vld [vmem:[#allocation17 + $0x58] sm:$0xff] }
 0x2a8   :  { %v497_v15 = vsel %vm496_vm8, %v494_v12, %v484_v13  ;;  %v912_v12 = vld [vmem:[#allocation17 + $0x68] sm:$0xff]  ;;  %v911_v13 = vld [vmem:[#allocation17 + $0x60] sm:$0xff] }
 0x2a9   :  { %4119 = vmatprep.mubr.msk.f32.mxu1 %vm516_vm9, %v497_v15  ;;  %v909_v15 = vld [vmem:[#allocation17 + $0x50] sm:$0xff] }
 0x2aa   :  { %4120 = vmatmul.mubr.msk.f32.vlgmr.msra.gmra.mxu1 %vm516_vm9, %v498_v16  ;;  %v908_v16 = vld [vmem:[#allocation17 + $0x48] sm:$0xff] }
 0x2ab   :  { %4123 = vmatpush3.msk.msra.mxu1 %vm361_vm2, %v600_v61  ;;  %4124 = vmatprep.mubr.msk.f32.mxu1 %vm277_vm1, %v5207_v3  ;;  %vm3781_vm2 = vcmask 41984  }
 0x2ac   :  { %932 = vmatprep.subr.mxu1 %v4980_v2 }
 0x2ae   :  { %4125 = vmatmul.mubr.msk.f32.vlgmr.msra.gmra.mxu1 %vm277_vm1, %v5212_v4 }
 0x2af   :  { %933 = vmatpush1.msra.mxu1 %v914_v10 }
 0x2b0   :  { %934 = vmatprep.subr.mxu1 %v4980_v2 }
 0x2b1   :  { %935 = vmatpush1.msra.mxu1 %v913_v11 }
 0x2b2   :  { %936 = vmatprep.subr.mxu1 %v4980_v2 }
 0x2b3   :  { %937 = vmatpush1.msra.mxu1 %v912_v12 }
 0x2b4   :  { %938 = vmatprep.subr.mxu1 %v4980_v2 }
 0x2b5   :  { %939 = vmatpush1.msra.mxu1 %v911_v13 }
 0x2b6   :  { %940 = vmatprep.subr.mxu1 %v4980_v2 }
 0x2b7   :  { %941 = vmatpush1.msra.mxu1 %v910_v14 }
 0x2b8   :  { %942 = vmatprep.subr.mxu1 %v4980_v2 }
 0x2b9   :  { %943 = vmatpush1.msra.mxu1 %v909_v15 }
 0x2ba   :  { %944 = vmatprep.subr.mxu1 %v4980_v2 }
 0x2bb   :  { %945 = vmatpush1.msra.mxu1 %v908_v16 }
 0x2bc   :  { %946 = vmatprep.subr.mxu1 %v4980_v2 }
 0x2bd   :  { %947 = vmatpush1.msra.mxu1 %v907_v17 }
 0x2be   :  { %948 = vmatprep.subr.mxu1 %v4980_v2 }
 0x2bf   :  { %949 = vmatpush1.msra.mxu1 %v906_v18 }
 0x2c0   :  { %950 = vmatprep.subr.mxu1 %v4980_v2 }
 0x36a   :  { %v4121_v20 = vpop.f32.mrf.mxu1 }
 0x36b   :  { %v595_v21 = vadd.f32 %v4121_v20, %v3846_v19  ;;  %v904_v20 = vld [vmem:[#allocation17 + $0x28] sm:$0xff] }
 0x36c   :  { %v589_v22 = vpop.f32.mrf.mxu1 }
 0x36d   :  { %v590_v24 = vadd.f32 %v3846_v19, %v589_v22  ;;  %v599_v26 = vmax.f32 %v595_v21, 0.0  ;;  %v905_v19 = vld [vmem:[#allocation17 + $0x30] sm:$0xff]  ;;  %v903_v21 = vld [vmem:[#allocation17 + $0x20] sm:$0xff]  ;;  %v902_v22 = vld [vmem:[#allocation17 + $0x18] sm:$0xff] }
 0x36e   :  { %v4126_v25 = vpop.f32.mrf.mxu1  ;;  %951 = vmatpush1.msra.mxu1 %v905_v19 }
 0x36f   :  { %v689_v27 = vadd.f32 %v4126_v25, %v3849_v23  ;;  %v598_v30 = vmax.f32 %v590_v24, 0.0  ;;  %952 = vmatprep.subr.mxu1 %v4980_v2  ;;  %v900_v24 = vld [vmem:[#allocation17 + $0x8] sm:$0xff]  ;;  %v899_v25 = vld [vmem:[#allocation17] sm:$0xff] }
 0x370   :  { %v683_v28 = vpop.f32.mrf.mxu1  ;;  %953 = vmatpush1.msra.mxu1 %v904_v20 }
 0x371   :  { %v5303_v31 = vadd.f32 %v689_v27, %v599_v26  ;;  %v684_v32 = vadd.f32 %v3849_v23, %v683_v28  ;;  %954 = vmatprep.subr.mxu1 %v4980_v2  ;;  %v901_v23 = vld [vmem:[#allocation17 + $0x10] sm:$0xff]  ;;  %v918_v26 = vld [vmem:[#allocation17 + $0x98] sm:$0xff] }
 0x372   :  { %955 = vmatpush1.msra.mxu1 %v903_v21  ;;  %v3853_v27 = vld [vmem:[#allocation16] ss:$0 sm:$0xff] }
 0x373   :  { %v695_v34 = vmax.f32 %v5303_v31, 0.0  ;;  %v5306_v35 = vadd.f32 %v684_v32, %v598_v30  ;;  %956 = vmatprep.subr.mxu1 %v4980_v2  ;;  %v917_v31 = vld [vmem:[#allocation17 + $0x90] sm:$0xff] }
 0x374   :  { %957 = vmatpush1.msra.mxu1 %v902_v22  ;;  %v5442_v22 = vld [vmem:[#allocation26] ss:$0 sm:$0xff] }
 0x375   :  { %701 = vst.msk [vmem:[#allocation2 + $0x18] sm:$0xff] %vm330_vm5, %v695_v34  ;;  %v694_v37 = vmax.f32 %v5306_v35, 0.0  ;;  %958 = vmatprep.subr.mxu1 %v4980_v2 }
 0x376   :  { %959 = vmatpush1.msra.mxu1 %v901_v23 }
 0x377   :  { %700 = vst.msk [vmem:[#allocation2 + $0x8] sm:$0xff] %vm330_vm5, %v694_v37  ;;  %960 = vmatprep.subr.mxu1 %v4980_v2 }
 0x378   :  { %961 = vmatpush1.msra.mxu1 %v900_v24 }
 0x379   :  { %962 = vmatprep.subr.mxu1 %v4980_v2 }
 0x37a   :  { %963 = vmatpush1.msra.mxu1 %v899_v25 }
 0x37b   :  { %988 = vmatprep.subr.mxu1 %v4980_v2 }
 0x37c   :  { %v705_v42 = vld [vmem:[#allocation2 + $0x12] sm:$0xff]  ;;  %989 = vmatpush2.msra.mxu1 %v918_v26 }
 0x37d   :  { %v707_v43 = vld [vmem:[#allocation2 + $0x14] sm:$0xff]  ;;  %716 = vrot.lane.b32.xlu1 %v705_v42, %s4982_s16  ;;  %990 = vmatprep.subr.mxu1 %v4980_v2 }
 0x37e   :  { %v709_v44 = vld [vmem:[#allocation2 + $0x16] sm:$0xff]  ;;  %v704_v48 = vld [vmem:[#allocation2 + $0x2] sm:$0xff]  ;;  %991 = vmatpush2.msra.mxu1 %v917_v31 }
 0x37f   :  { %v711_v45 = vld [vmem:[#allocation2 + $0x18] sm:$0xff]  ;;  %854 = vst.msk [vmem:[#allocation2 + $0x10] sm:$0xff] %vm272_vm0, %v4980_v2  ;;  %v706_v49 = vld [vmem:[#allocation2 + $0x4] sm:$0xff]  ;;  %714 = vrot.lane.b32.xlu0 %v704_v48, %s4982_s16  ;;  %992 = vmatprep.subr.mxu1 %v4980_v2  ;;  %s4985_s16 = smov 96  }
 0x380   :  { %v708_v50 = vld [vmem:[#allocation2 + $0x6] sm:$0xff]  ;;  %855 = vst.msk [vmem:[#allocation2 + $0x18] sm:$0xff] %vm272_vm0, %v4980_v2 }
 0x381   :  { %v710_v51 = vld [vmem:[#allocation2 + $0x8] sm:$0xff]  ;;  %852 = vst.msk [vmem:[#allocation2] sm:$0xff] %vm272_vm0, %v4980_v2  ;;  %724 = vrot.lane.b32.xlu1 %v707_v43, %s4983_s9 }
 0x382   :  { %853 = vst.msk [vmem:[#allocation2 + $0x8] sm:$0xff] %vm272_vm0, %v4980_v2 }
 0x383   :  { %722 = vrot.lane.b32.xlu0 %v706_v49, %s4983_s9 }
 0x385   :  { %732 = vrot.lane.b32.xlu1 %v709_v44, %s4984_s29 }
 0x387   :  { %730 = vrot.lane.b32.xlu0 %v708_v50, %s4984_s29 }
 0x388   :  { %v858_v44 = vld [vmem:[#allocation2] sm:$0xff] }
 0x389   :  { %740 = vrot.lane.b32.xlu1 %v711_v45, %s4971_s13 }
 0x38b   :  { %738 = vrot.lane.b32.xlu0 %v710_v51, %s4971_s13  ;;  %v859_v51 = vld [vmem:[#allocation2 + $0x10] sm:$0xff] }
 0x3ef   :  { %v717_v54 = vpop.permute.xlu1 %716 }
 0x3f0   :  { %v745_v61 = vsel %vm330_vm5, %v703_v41, %v717_v54 }
 0x3f1   :  { %v715_v55 = vpop.permute.xlu0 %714 }
 0x3f2   :  { %v744_v60 = vsel %vm330_vm5, %v702_v46, %v715_v55 }
 0x3f3   :  { %v725_v56 = vpop.permute.xlu1 %724 }
 0x3f4   :  { %v747_v0 = vsel %vm272_vm0, %v745_v61, %v725_v56  ;;  %v5402_v61 = vld [vmem:[%s6100_s14 + $0x8] sm:$0xff] }
 0x3f5   :  { %v723_v57 = vpop.permute.xlu0 %722 }
 0x3f6   :  { %v746_v62 = vsel %vm272_vm0, %v744_v60, %v723_v57  ;;  %v5393_v60 = vld [vmem:[%s6100_s14 + $0x10] sm:$0xff] }
 0x3f7   :  { %v733_v58 = vpop.permute.xlu1 %732 }
 0x3f8   :  { %v749_v6 = vsel %vm493_vm7, %v747_v0, %v733_v58 }
 0x3f9   :  { %v731_v59 = vpop.permute.xlu0 %730 }
 0x3fa   :  { %v748_v1 = vsel %vm493_vm7, %v746_v62, %v731_v59  ;;  %v5385_v59 = vld [vmem:[%s6100_s14 + $0x18] sm:$0xff]  ;;  %v5409_v62 = vld [vmem:[%s6100_s14] sm:$0xff] }
 0x3fb   :  { %v741_v63 = vpop.permute.xlu1 %740 }
 0x3fc   :  { %v751_v8 = vsel %vm496_vm8, %v749_v6, %v741_v63  ;;  %v4987_v63 = vmov 0  }
 0x3fd   :  { %v739_v5 = vpop.permute.xlu0 %738  ;;  %4500 = vset.pattern.permute.xlu1 %v4987_v63  ;;  %4499 = vset.pattern.permute.xlu0 %v4987_v63  ;;  %v5487_v63 = vld [vmem:[%s6103_s17] sm:$0xff] }
 0x3fe   :  { %v750_v7 = vsel %vm496_vm8, %v748_v1, %v739_v5  ;;  %v3856_v1 = vld [vmem:[#allocation19] ss:$0 sm:$0xff] }
 0x3ff   :  { %4147 = vmatprep.mubr.msk.f32.mxu0 %vm516_vm9, %v750_v7 }
 0x400   :  { %4148 = vmatmul.mubr.msk.f32.vlgmr.msra.gmra.mxu0 %vm516_vm9, %v751_v8 }
 0x401   :  { %4151 = vmatpush3.msra.mxu0 %v1010_v53  ;;  %4154 = vmatprep.mubr.msk.f32.mxu0 %vm330_vm5, %v694_v37 }
 0x402   :  { %4152 = vmatprep.subr.mxu0 %v1009_v9 }
 0x403   :  { %4153 = vmatpush3.msra.mxu0 %v1009_v9  ;;  %v3859_v9 = vld [vmem:[#allocation22] ss:$0 sm:$0xff] }
 0x404   :  { %4155 = vmatmul.mubr.msk.f32.vlgmr.msra.gmra.mxu0 %vm330_vm5, %v695_v34  ;;  %4157 = vmatprep.subr.mxu0 %v4980_v2  ;;  %v916_v34 = vld [vmem:[#allocation17 + $0x88] sm:$0xff] }
 0x405   :  { %993 = vmatpush2.msra.mxu1 %v916_v34  ;;  %4158 = vmatpush3.msra.mxu0 %v5385_v59 }
 0x406   :  { %994 = vmatprep.subr.mxu1 %v4980_v2  ;;  %4159 = vmatprep.subr.mxu0 %v4980_v2 }
 0x407   :  { %995 = vmatpush2.msra.mxu1 %v915_v36  ;;  %4160 = vmatpush3.msra.mxu0 %v5393_v60 }
 0x408   :  { %4201 = vmatprep.subr.mxu1 %v4980_v2  ;;  %4161 = vmatprep.subr.mxu0 %v4980_v2 }
 0x409   :  { %4162 = vmatpush3.msra.mxu0 %v5402_v61  ;;  %4165 = vmatprep.mubr.msk.f32.mxu0 %vm4986_vm11, %v4980_v2 }
 0x40a   :  { %4163 = vmatprep.subr.mxu0 %v4980_v2 }
 0x40b   :  { %4164 = vmatpush3.msra.mxu0 %v5409_v62 }
 0x40c   :  { %4168 = vmatprep.subr.mxu0 %v4980_v2 }
 0x4c0   :  { %v4149_v28 = vpop.f32.mrf.mxu0 }
 0x4c1   :  { %v847_v29 = vadd.f32 %v4149_v28, %v3853_v27  ;;  %v5447_v28 = vld [vmem:[#allocation23] ss:$0 sm:$0xff] }
 0x4c2   :  { %v841_v30 = vpop.f32.mrf.mxu0 }
 0x4c3   :  { %v851_v32 = vmax.f32 %v847_v29, 0.0  ;;  %v842_v33 = vadd.f32 %v3853_v27, %v841_v30 }
 0x4c4   :  { %v4156_v0 = vpop.f32.mrf.mxu0 }
 0x4c5   :  { %857 = vst.msk [vmem:[#allocation2 + $0x18] sm:$0xff] %vm272_vm0, %v851_v32  ;;  %v850_v35 = vmax.f32 %v842_v33, 0.0  ;;  %v5455_v32 = vld [vmem:[#allocation25] ss:$0 sm:$0xff] }
 0x4c6   :  { %v1090_v6 = vpop.f32.mrf.mxu0 }
 0x4c7   :  { %856 = vst.msk [vmem:[#allocation2 + $0x8] sm:$0xff] %vm272_vm0, %v850_v35  ;;  %v1091_v11 = vadd.f32 %v3859_v9, %v1090_v6 }
 0x4cc   :  { %v861_v40 = vld [vmem:[#allocation2 + $0x12] sm:$0xff] }
 0x4cd   :  { %v865_v42 = vld [vmem:[#allocation2 + $0x16] sm:$0xff] }
 0x4ce   :  { %v866_v37 = vld [vmem:[#allocation2 + $0x8] sm:$0xff]  ;;  %v863_v43 = vld [vmem:[#allocation2 + $0x14] sm:$0xff] }
 0x4cf   :  { %v862_v38 = vld [vmem:[#allocation2 + $0x4] sm:$0xff]  ;;  %3857 = vmatprep.mubr.msk.f32.mxu1 %vm272_vm0, %v866_v37  ;;  %v867_v53 = vld [vmem:[#allocation2 + $0x18] sm:$0xff] }
 0x4d0   :  { %v860_v39 = vld [vmem:[#allocation2 + $0x2] sm:$0xff]  ;;  %878 = vrot.lane.b32.xlu1 %v862_v38, %s4971_s13 }
 0x4d1   :  { %870 = vrot.lane.b32.xlu0 %v860_v39, %s4983_s9  ;;  %v864_v41 = vld [vmem:[#allocation2 + $0x6] sm:$0xff] }
 0x4d4   :  { %872 = vrot.lane.b32.xlu1 %v861_v40, %s4983_s9 }
 0x4d5   :  { %886 = vrot.lane.b32.xlu0 %v864_v41, %s4985_s16 }
 0x4d8   :  { %888 = vrot.lane.b32.xlu1 %v865_v42, %s4985_s16 }
 0x4d9   :  { %880 = vrot.lane.b32.xlu0 %v863_v43, %s4971_s13 }
 0x4dc   :  { %1132 = vperm.xlu1 %4500, %v5212_v4  }
 0x4dd   :  { %1128 = vperm.xlu0 %4499, %v5207_v3   ;;  %v1096_v3 = vadd.f32 %v4156_v0, %v3859_v9 }
 0x542   :  { %v879_v45 = vpop.permute.xlu1 %878 }
 0x543   :  { %v871_v46 = vpop.permute.xlu0 %870 }
 0x544   :  { %v892_v47 = vsel %vm272_vm0, %v858_v44, %v871_v46 }
 0x545   :  { %v894_v50 = vsel %vm496_vm8, %v892_v47, %v879_v45 }
 0x546   :  { %v873_v48 = vpop.permute.xlu1 %872 }
 0x547   :  { %v887_v49 = vpop.permute.xlu0 %886  ;;  %v893_v55 = vsel %vm272_vm0, %v859_v51, %v873_v48 }
 0x548   :  { %v897_v52 = vsel %vm896_vm10, %v894_v50, %v887_v49 }
 0x549   :  { %997 = vmatmul.mubr.f32.vlgmr.msra.gmra.mxu1 %v897_v52 }
 0x54a   :  { %3858 = vmatprep.mubr.msk.f32.mxu1 %vm272_vm0, %v867_v53  ;;  %v889_v54 = vpop.permute.xlu1 %888  ;;  %4202 = vmatpush3.msra.mxu1 %v5385_v59 }
 0x54b   :  { %v881_v56 = vpop.permute.xlu0 %880  ;;  %4203 = vmatprep.subr.mxu1 %v4980_v2 }
 0x54c   :  { %v895_v57 = vsel %vm496_vm8, %v893_v55, %v881_v56  ;;  %4204 = vmatpush3.msra.mxu1 %v5393_v60  ;;  %v5466_v55 = vld [vmem:[%s6103_s17 + $0x18] sm:$0xff]  ;;  %v5471_v56 = vld [vmem:[%s6103_s17 + $0x10] sm:$0xff] }
 0x54d   :  { %v898_v58 = vsel %vm896_vm10, %v895_v57, %v889_v54  ;;  %4205 = vmatprep.subr.mxu1 %v4980_v2 }
 0x54e   :  { %1002 = vmatmul.mubr.f32.gmra.mxu1 %v898_v58  ;;  %v5480_v58 = vld [vmem:[%s6103_s17 + $0x8] sm:$0xff] }
 0x54f   :  { %4206 = vmatpush3.msra.mxu1 %v5402_v61  ;;  %4209 = vmatprep.mubr.msk.f32.mxu1 %vm4986_vm11, %v4980_v2 }
 0x550   :  { %4207 = vmatprep.subr.mxu1 %v4980_v2 }
 0x551   :  { %4208 = vmatpush3.msra.mxu1 %v5409_v62 }
 0x552   :  { %4223 = vmatprep.subr.mxu1 %v4980_v2 }
 0x557   :  { %v5449_v29 = vpop.permute.xlu1 %1132 }
 0x558   :  { %v5451_v30 = vpop.permute.xlu0 %1128  ;;  %v1142_v31 = vmul.f32 %v5447_v28, %v5449_v29 }
 0x559   :  { %v1141_v33 = vmul.f32 %v5447_v28, %v5451_v30 }
 0x55a   :  { %v1150_v34 = vadd.f32 %v5455_v32, %v1142_v31 }
 0x55b   :  { %v1149_v35 = vadd.f32 %v5455_v32, %v1141_v33 }
 0x609   :  { %v998_v5 = vpop.f32.mrf.mxu1 }
 0x60a   :  { %v999_v7 = vadd.f32 %v3856_v1, %v998_v5 }
 0x60b   :  { %v1000_v8 = vpop.f32.mrf.mxu1 }
 0x60c   :  { %v1007_v10 = vmax.f32 %v999_v7, 0.0 }
 0x60e   :  { %v1003_v12 = vpop.f32.mrf.mxu1  ;;  %v5424_v13 = vadd.f32 %v1091_v11, %v1007_v10 }
 0x60f   :  { %v1004_v4 = vadd.f32 %v3856_v1, %v1003_v12 }
 0x610   :  { %v1005_v14 = vpop.f32.mrf.mxu1  ;;  %v1101_v16 = vmax.f32 %v5424_v13, 0.0 }
 0x611   :  { %v1008_v15 = vmax.f32 %v1004_v4, 0.0 }
 0x612   :  { %v5431_v19 = vrot.slane %v1101_v16, 7 }
 0x613   :  { %v1100_v17 = vadd.f32 %v1096_v3, %v1008_v15 }
 0x615   :  { %v5427_v18 = vmax.f32 %v1100_v17, 0.0 }
 0x617   :  { %v1160_v20 = vrot.slane %v5427_v18, 6 }
 0x619   :  { %v5436_v21 = vsel %vm1161_vm12, %v1160_v20, %v5431_v19  ;;  %v5507_v20 = vld [vmem:[#allocation28 + $0x10] sm:$0xff] }
 0x61a   :  { %4166 = vmatmul.mubr.msk.f32.vlgmr.msra.gmra.mxu0 %vm272_vm0, %v5436_v21 }
 0x61b   :  { %4176 = vmatprep.mubr.msk.f32.mxu0 %vm4986_vm11, %v4980_v2  ;;  %4169 = vmatpush3.msra.mxu0 %v5466_v55 }
 0x61c   :  { %4170 = vmatprep.subr.mxu0 %v4980_v2 }
 0x61d   :  { %4171 = vmatpush3.msra.mxu0 %v5471_v56 }
 0x61e   :  { %4172 = vmatprep.subr.mxu0 %v4980_v2 }
 0x61f   :  { %4173 = vmatpush3.msra.mxu0 %v5480_v58 }
 0x620   :  { %4174 = vmatprep.subr.mxu0 %v4980_v2 }
 0x621   :  { %4175 = vmatpush3.msra.mxu0 %v5487_v63 }
 0x622   :  { %4179 = vmatprep.subr.mxu0 %v4980_v2 }
 0x6da   :  { %v1231_v23 = vpop.f32.mrf.mxu0 }
 0x6db   :  { %v1232_v24 = vadd.f32 %v5442_v22, %v1231_v23  ;;  %v5513_v23 = vld [vmem:[#allocation28 + $0x8] sm:$0xff] }
 0x6dc   :  { %v4167_v25 = vpop.f32.mrf.mxu0 }
 0x6dd   :  { %v1237_v26 = vrot.slane %v1232_v24, 2  ;;  %v1236_v27 = vrot.slane %v1232_v24, 1  ;;  %v5519_v24 = vld [vmem:[#allocation28] sm:$0xff] }
 0x6df   :  { %1256 = vrot.lane.b32.xlu0 %v1237_v26, %s4971_s13  ;;  %1254 = vrot.lane.b32.xlu1 %v1236_v27, %s4971_s13  ;;  %v1241_v36 = vadd.f32 %v1237_v26, %v1150_v34  ;;  %v1240_v37 = vadd.f32 %v1236_v27, %v1149_v35 }
 0x6e1   :  { %v3867_v38 = vmul.f32 -1.442695, %v1241_v36  ;;  %v3866_v39 = vmul.f32 -1.442695, %v1240_v37  ;;  %v5548_v37 = vld [vmem:[%s6105_s19] ss:$0 sm:$0xff] }
 0x6e3   :  { %4503 = vpow2.f32 %v3867_v38  ;;  %v1387_v38 = vmul.f32 %v5548_v37, %v5451_v30 }
 0x6e4   :  { %4505 = vpow2.f32 %v3866_v39  ;;  %v5555_v39 = vld [vmem:[%s6107_s21] ss:$0 sm:$0xff] }
 0x6f0   :  { %v4504_v40 = vpop.eup %4503 }
 0x6f1   :  { %v4506_v41 = vpop.eup %4505  ;;  %v1249_v42 = vadd.f32 1.0, %v4504_v40  ;;  %v1388_v40 = vmul.f32 %v5548_v37, %v5449_v29 }
 0x6f2   :  { %v1248_v43 = vadd.f32 1.0, %v4506_v41  ;;  %v1395_v41 = vadd.f32 %v5555_v39, %v1387_v38 }
 0x6f3   :  { %4507 = vrcp.f32 %v1249_v42  ;;  %v1396_v42 = vadd.f32 %v5555_v39, %v1388_v40 }
 0x6f4   :  { %4509 = vrcp.f32 %v1248_v43 }
 0x700   :  { %v4508_v44 = vpop.eup %4507 }
 0x701   :  { %v4510_v45 = vpop.eup %4509  ;;  %v1275_v5 = vsub.f32 1.0, %v4508_v44 }
 0x702   :  { %v1274_v6 = vsub.f32 1.0, %v4510_v45 }
 0x751   :  { %v1257_v46 = vpop.permute.xlu0 %1256  ;;  %v1255_v47 = vpop.permute.xlu1 %1254 }
 0x752   :  { %v1261_v48 = vmul.f32 %v4508_v44, %v1257_v46  ;;  %v1260_v49 = vmul.f32 %v4510_v45, %v1255_v47 }
 0x754   :  { %1266 = vrot.lane.b32.xlu0 %v1261_v48, %s4971_s13  ;;  %1264 = vrot.lane.b32.xlu1 %v1260_v49, %s4971_s13 }
 0x7c6   :  { %v1267_v50 = vpop.permute.xlu0 %1266  ;;  %v1265_v51 = vpop.permute.xlu1 %1264 }
 0x7c7   :  { %v1271_v52 = vadd.f32 %v1267_v50, %v1150_v34  ;;  %v1270_v53 = vadd.f32 %v1265_v51, %v1149_v35 }
 0x7c9   :  { %4511 = vtanh.f32 %v1271_v52 }
 0x7ca   :  { %4513 = vtanh.f32 %v1270_v53 }
 0x7d6   :  { %v4512_v54 = vpop.eup %4511 }
 0x7d7   :  { %v4514_v57 = vpop.eup %4513  ;;  %1280 = vrot.lane.b32.xlu0 %v4512_v54, %s4985_s16 }
 0x7d8   :  { %1278 = vrot.lane.b32.xlu1 %v4514_v57, %s4985_s16  ;;  %v1523_v57 = vrot.slane %v5427_v18, 7 }
 0x7db   :  { %1288 = vrot.lane.b32.xlu0 %v5427_v18, %s4983_s9 }
 0x7dc   :  { %1286 = vrot.lane.b32.xlu1 %v1101_v16, %s4983_s9  ;;  %v5503_v16 = vld [vmem:[#allocation28 + $0x18] sm:$0xff] }
 0x849   :  { %v1281_v0 = vpop.permute.xlu0 %1280 }
 0x84a   :  { %v1279_v1 = vpop.permute.xlu1 %1278  ;;  %v1285_v8 = vmul.f32 %v1281_v0, %v1275_v5  ;;  %v5565_v0 = vld [vmem:[#allocation3] ss:$0 sm:$0xff] }
 0x84b   :  { %v1284_v11 = vmul.f32 %v1279_v1, %v1274_v6 }
 0x84d   :  { %v1289_v7 = vpop.permute.xlu0 %1288 }
 0x84e   :  { %v1293_v9 = vmul.f32 %v4508_v44, %v1289_v7  ;;  %v1287_v10 = vpop.permute.xlu1 %1286 }
 0x84f   :  { %v1292_v12 = vmul.f32 %v4510_v45, %v1287_v10 }
 0x850   :  { %v1295_v4 = vadd.f32 %v1293_v9, %v1285_v8 }
 0x851   :  { %v1294_v14 = vadd.f32 %v1292_v12, %v1284_v11 }
 0x852   :  { %v1305_v13 = vrot.slane %v1295_v4, 6 }
 0x853   :  { %v1304_v3 = vrot.slane %v1294_v14, 7 }
 0x855   :  { %v5499_v15 = vsel %vm1161_vm12, %v1305_v13, %v1304_v3 }
 0x856   :  { %1307 = vrot.lane.b32.xlu1 %v5499_v15, %s4985_s16 }
 0x8c8   :  { %v1308_v17 = vpop.permute.xlu1 %1307 }
 0x8c9   :  { %4177 = vmatmul.mubr.msk.f32.vlgmr.msra.gmra.mxu0 %vm272_vm0, %v1308_v17  ;;  %4210 = vmatmul.mubr.msk.f32.vlgmr.msra.gmra.mxu1 %vm272_vm0, %v1308_v17 }
 0x8ca   :  { %4180 = vmatpush3.msra.mxu0 %v5503_v16  ;;  %4187 = vmatprep.mubr.msk.f32.mxu0 %vm4986_vm11, %v4980_v2 }
 0x8cb   :  { %4181 = vmatprep.subr.mxu0 %v4980_v2  ;;  %4224 = vmatpush3.msra.mxu1 %v5503_v16 }
 0x8cc   :  { %4182 = vmatpush3.msra.mxu0 %v5507_v20  ;;  %4225 = vmatprep.subr.mxu1 %v4980_v2 }
 0x8cd   :  { %4183 = vmatprep.subr.mxu0 %v4980_v2  ;;  %4226 = vmatpush3.msra.mxu1 %v5507_v20 }
 0x8ce   :  { %4184 = vmatpush3.msra.mxu0 %v5513_v23  ;;  %4227 = vmatprep.subr.mxu1 %v4980_v2 }
 0x8cf   :  { %4185 = vmatprep.subr.mxu0 %v4980_v2  ;;  %4228 = vmatpush3.msra.mxu1 %v5513_v23 }
 0x8d0   :  { %4186 = vmatpush3.msra.mxu0 %v5519_v24  ;;  %4229 = vmatprep.subr.mxu1 %v4980_v2 }
 0x8d1   :  { %4188 = vmatmul.mubr.msk.f32.vlgmr.msra.gmra.mxu0 %vm272_vm0, %v5436_v21  ;;  %4190 = vmatprep.subr.mxu0 %v4980_v2  ;;  %v5540_v21 = vld [vmem:[%s6108_s22] ss:$0 sm:$0xff] }
 0x8d2   :  { %4198 = vmatprep.mubr.msk.f32.mxu0 %vm4986_vm11, %v4980_v2  ;;  %4230 = vmatpush3.msra.mxu1 %v5519_v24 }
 0x8d3   :  { %4231 = vmatprep.mubr.msk.f32.mxu1 %vm4986_vm11, %v4980_v2  ;;  %4245 = vmatprep.subr.mxu1 %v4980_v2 }
 0x989   :  { %v1377_v25 = vpop.f32.mrf.mxu0  ;;  %v1691_v26 = vpop.f32.mrf.mxu1 }
 0x98a   :  { %v5570_v1 = vadd.f32 %v5565_v0, %v1377_v25  ;;  %v1692_v5 = vadd.f32 %v5442_v22, %v1691_v26 }
 0x98b   :  { %v4178_v27 = vpop.f32.mrf.mxu0  ;;  %v4211_v31 = vpop.f32.mrf.mxu1 }
 0x991   :  { %v1469_v33 = vpop.f32.mrf.mxu0 }
 0x992   :  { %v1470_v34 = vadd.f32 %v5540_v21, %v1469_v33  ;;  %v5583_v33 = vld [vmem:[%s6109_s23 + $0x18] sm:$0xff] }
 0x993   :  { %v4189_v35 = vpop.f32.mrf.mxu0  ;;  %4191 = vmatpush3.msra.mxu0 %v5583_v33 }
 0x994   :  { %1491 = vrot.lane.b32.xlu1 %v1470_v34, %s4971_s13  ;;  %v1474_v36 = vrot.slane %v1470_v34, 1  ;;  %v1477_v43 = vadd.f32 %v1470_v34, %v1395_v41  ;;  %v5588_v34 = vld [vmem:[%s6109_s23 + $0x10] sm:$0xff]  ;;  %4192 = vmatprep.subr.mxu0 %v4980_v2  ;;  %v5595_v35 = vld [vmem:[%s6109_s23 + $0x8] sm:$0xff] }
 0x995   :  { %4193 = vmatpush3.msra.mxu0 %v5588_v34 }
 0x996   :  { %1493 = vrot.lane.b32.xlu0 %v1474_v36, %s4971_s13  ;;  %v1478_v44 = vadd.f32 %v1474_v36, %v1396_v42  ;;  %v3874_v45 = vmul.f32 -1.442695, %v1477_v43  ;;  %4194 = vmatprep.subr.mxu0 %v4980_v2  ;;  %v5602_v36 = vld [vmem:[%s6109_s23] sm:$0xff] }
 0x997   :  { %4195 = vmatpush3.msra.mxu0 %v5595_v35 }
 0x998   :  { %v3875_v46 = vmul.f32 -1.442695, %v1478_v44  ;;  %4515 = vpow2.f32 %v3874_v45  ;;  %4196 = vmatprep.subr.mxu0 %v4980_v2 }
 0x999   :  { %4197 = vmatpush3.msra.mxu0 %v5602_v36 }
 0x99a   :  { %4517 = vpow2.f32 %v3875_v46  ;;  %4212 = vmatprep.subr.mxu0 %v4980_v2 }
 0x9a5   :  { %v4516_v47 = vpop.eup %4515 }
 0x9a6   :  { %v1485_v48 = vadd.f32 1.0, %v4516_v47 }
 0x9a7   :  { %v4518_v30 = vpop.eup %4517 }
 0x9a8   :  { %v1486_v49 = vadd.f32 1.0, %v4518_v30  ;;  %4519 = vrcp.f32 %v1485_v48 }
 0x9aa   :  { %4521 = vrcp.f32 %v1486_v49 }
 0x9b5   :  { %v4520_v50 = vpop.eup %4519 }
 0x9b6   :  { %v1511_v44 = vsub.f32 1.0, %v4520_v50 }
 0x9b7   :  { %v4522_v29 = vpop.eup %4521 }
 0x9b8   :  { %v1512_v38 = vsub.f32 1.0, %v4522_v29 }
 0xa06   :  { %v1492_v51 = vpop.permute.xlu1 %1491 }
 0xa07   :  { %v1497_v52 = vmul.f32 %v4520_v50, %v1492_v51 }
 0xa08   :  { %v1494_v53 = vpop.permute.xlu0 %1493 }
 0xa09   :  { %v1498_v54 = vmul.f32 %v4522_v29, %v1494_v53  ;;  %1501 = vrot.lane.b32.xlu1 %v1497_v52, %s4971_s13 }
 0xa0b   :  { %1503 = vrot.lane.b32.xlu0 %v1498_v54, %s4971_s13 }
 0xa0d   :  { %1526 = vrot.lane.b32.xlu1 %v1523_v57, %s4983_s9 }
 0xa11   :  { %1524 = vrot.lane.b32.xlu1 %v5431_v19, %s4983_s9 }
 0xa15   :  { %1620 = vperm.xlu1 %4500, %v5570_v1  }
 0xa19   :  { %1703 = vrot.lane.b32.xlu1 %v1692_v5, %s4971_s13 }
 0xa7b   :  { %v1502_v6 = vpop.permute.xlu1 %1501 }
 0xa7c   :  { %v1507_v18 = vadd.f32 %v1502_v6, %v1395_v41 }
 0xa7d   :  { %v1504_v7 = vpop.permute.xlu0 %1503 }
 0xa7e   :  { %v1508_v8 = vadd.f32 %v1504_v7, %v1396_v42 }
 0xa7f   :  { %v1527_v9 = vpop.permute.xlu1 %1526 }
 0xa80   :  { %4523 = vtanh.f32 %v1508_v8  ;;  %v1531_v41 = vmul.f32 %v4522_v29, %v1527_v9 }
 0xa81   :  { %4525 = vtanh.f32 %v1507_v18 }
 0xa83   :  { %v1525_v10 = vpop.permute.xlu1 %1524 }
 0xa84   :  { %v1530_v46 = vmul.f32 %v4520_v50, %v1525_v10 }
 0xa8d   :  { %v4524_v11 = vpop.eup %4523 }
 0xa8e   :  { %1517 = vrot.lane.b32.xlu0 %v4524_v11, %s4985_s16  ;;  %v4526_v12 = vpop.eup %4525 }
 0xa90   :  { %v1621_v19 = vpop.permute.xlu1 %1620 }
 0xa91   :  { %v1623_v4 = vmul.f32 %v5447_v28, %v1621_v19 }
 0xa92   :  { %1515 = vrot.lane.b32.xlu0 %v4526_v12, %s4985_s16 }
 0xa93   :  { %v1624_v14 = vadd.f32 %v5455_v32, %v1623_v4 }
 0xa94   :  { %v1704_v27 = vpop.permute.xlu1 %1703 }
 0xa95   :  { %v1695_v13 = vadd.f32 %v1692_v5, %v1624_v14 }
 0xa97   :  { %v3879_v3 = vmul.f32 -1.442695, %v1695_v13 }
 0xa99   :  { %4527 = vpow2.f32 %v3879_v3 }
 0xaa6   :  { %v4528_v17 = vpop.eup %4527 }
 0xaa7   :  { %v1699_v25 = vadd.f32 1.0, %v4528_v17 }
 0xaa9   :  { %4529 = vrcp.f32 %v1699_v25 }
 0xab6   :  { %v4530_v26 = vpop.eup %4529 }
 0xab7   :  { %v1706_v31 = vmul.f32 %v4530_v26, %v1704_v27  ;;  %v1713_v50 = vsub.f32 1.0, %v4530_v26  ;;  %v1720_v57 = vmul.f32 %v4530_v26, %v5499_v15  ;;  %v5663_v15 = vld [vmem:[#allocation4] ss:$0 sm:$0xff] }
 0xab9   :  { %1708 = vrot.lane.b32.xlu1 %v1706_v31, %s4971_s13 }
 0xb00   :  { %v1518_v40 = vpop.permute.xlu0 %1517 }
 0xb01   :  { %v1522_v42 = vmul.f32 %v1518_v40, %v1512_v38 }
 0xb03   :  { %v1533_v43 = vadd.f32 %v1531_v41, %v1522_v42 }
 0xb04   :  { %v1516_v45 = vpop.permute.xlu0 %1515 }
 0xb05   :  { %v1521_v47 = vmul.f32 %v1516_v45, %v1511_v44  ;;  %v1542_v30 = vrot.slane %v1533_v43, 7 }
 0xb07   :  { %v1532_v48 = vadd.f32 %v1530_v46, %v1521_v47 }
 0xb09   :  { %v5609_v49 = vsel %vm1161_vm12, %v1542_v30, %v1532_v48 }
 0xb0a   :  { %1544 = vrot.lane.b32.xlu0 %v5609_v49, %s4985_s16 }
 0xb2b   :  { %v1709_v51 = vpop.permute.xlu1 %1708 }
 0xb2c   :  { %v1711_v52 = vadd.f32 %v1709_v51, %v1624_v14 }
 0xb2e   :  { %4531 = vtanh.f32 %v1711_v52 }
 0xb3b   :  { %v4532_v53 = vpop.eup %4531 }
 0xb3c   :  { %1715 = vrot.lane.b32.xlu1 %v4532_v53, %s4985_s16 }
 0xb7c   :  { %v1545_v29 = vpop.permute.xlu0 %1544 }
 0xb7d   :  { %4199 = vmatmul.mubr.msk.f32.vlgmr.msra.gmra.mxu0 %vm272_vm0, %v1545_v29  ;;  %4232 = vmatmul.mubr.msk.f32.vlgmr.msra.gmra.mxu1 %vm272_vm0, %v1545_v29 }
 0xb7e   :  { %4213 = vmatpush3.msra.mxu0 %v5466_v55  ;;  %4246 = vmatpush3.msra.mxu1 %v5385_v59 }
 0xb7f   :  { %4214 = vmatprep.subr.mxu0 %v4980_v2  ;;  %4247 = vmatprep.subr.mxu1 %v4980_v2 }
 0xb80   :  { %4215 = vmatpush3.msra.mxu0 %v5471_v56  ;;  %4248 = vmatpush3.msra.mxu1 %v5393_v60 }
 0xb81   :  { %4216 = vmatprep.subr.mxu0 %v4980_v2  ;;  %4249 = vmatprep.subr.mxu1 %v4980_v2 }
 0xb82   :  { %4217 = vmatpush3.msra.mxu0 %v5480_v58  ;;  %4250 = vmatpush3.msra.mxu1 %v5402_v61 }
 0xb83   :  { %4218 = vmatprep.subr.mxu0 %v4980_v2  ;;  %4251 = vmatprep.subr.mxu1 %v4980_v2 }
 0xb84   :  { %4219 = vmatpush3.msra.mxu0 %v5487_v63  ;;  %4220 = vmatprep.mubr.msk.f32.mxu0 %vm4986_vm11, %v4980_v2 }
 0xb85   :  { %4252 = vmatpush3.msra.mxu1 %v5409_v62  ;;  %4253 = vmatprep.mubr.msk.f32.mxu1 %vm4986_vm11, %v4980_v2 }
 0xb86   :  { %4234 = vmatprep.subr.mxu0 %v4980_v2  ;;  %4267 = vmatprep.subr.mxu1 %v4980_v2 }
 0xbae   :  { %v1716_v54 = vpop.permute.xlu1 %1715 }
 0xbaf   :  { %v1718_v5 = vmul.f32 %v1716_v54, %v1713_v50 }
 0xbb1   :  { %v5637_v6 = vadd.f32 %v1720_v57, %v1718_v5 }
 0xbb3   :  { %1723 = vrot.lane.b32.xlu1 %v5637_v6, %s4985_s16 }
 0xc25   :  { %v1724_v7 = vpop.permute.xlu1 %1723 }
 0xc26   :  { %4221 = vmatmul.mubr.msk.f32.vlgmr.msra.gmra.mxu0 %vm272_vm0, %v1724_v7  ;;  %4254 = vmatmul.mubr.msk.f32.vlgmr.msra.gmra.mxu1 %vm272_vm0, %v1724_v7 }
 0xc27   :  { %4235 = vmatpush3.msra.mxu0 %v5583_v33  ;;  %4268 = vmatpush3.msra.mxu1 %v5503_v16 }
 0xc28   :  { %4236 = vmatprep.subr.mxu0 %v4980_v2  ;;  %4269 = vmatprep.subr.mxu1 %v4980_v2 }
 0xc29   :  { %4237 = vmatpush3.msra.mxu0 %v5588_v34  ;;  %4270 = vmatpush3.msra.mxu1 %v5507_v20 }
 0xc2a   :  { %4238 = vmatprep.subr.mxu0 %v4980_v2  ;;  %4271 = vmatprep.subr.mxu1 %v4980_v2 }
 0xc2b   :  { %4239 = vmatpush3.msra.mxu0 %v5595_v35  ;;  %4272 = vmatpush3.msra.mxu1 %v5513_v23 }
 0xc2c   :  { %4240 = vmatprep.subr.mxu0 %v4980_v2  ;;  %4273 = vmatprep.subr.mxu1 %v4980_v2 }
 0xc2d   :  { %4241 = vmatpush3.msra.mxu0 %v5602_v36  ;;  %4242 = vmatprep.mubr.msk.f32.mxu0 %vm4986_vm11, %v4980_v2 }
 0xc2e   :  { %4274 = vmatpush3.msra.mxu1 %v5519_v24  ;;  %4275 = vmatprep.mubr.msk.f32.mxu1 %vm4986_vm11, %v4980_v2 }
 0xc2f   :  { %4256 = vmatprep.subr.mxu0 %v4980_v2  ;;  %4289 = vmatprep.subr.mxu1 %v4980_v2 }
 0xc3d   :  { %v1614_v8 = vpop.f32.mrf.mxu0  ;;  %v1870_v18 = vpop.f32.mrf.mxu1 }
 0xc3e   :  { %v5666_v9 = vadd.f32 %v5663_v15, %v1614_v8  ;;  %v1871_v19 = vadd.f32 %v5540_v21, %v1870_v18 }
 0xc3f   :  { %v4200_v10 = vpop.f32.mrf.mxu0  ;;  %v4233_v11 = vpop.f32.mrf.mxu1 }
 0xc40   :  { %1799 = vperm.xlu0 %4499, %v5666_v9  }
 0xc44   :  { %1882 = vrot.lane.b32.xlu0 %v1871_v19, %s4971_s13 }
 0xcbb   :  { %v1800_v12 = vpop.permute.xlu0 %1799 }
 0xcbc   :  { %v1802_v4 = vmul.f32 %v5548_v37, %v1800_v12 }
 0xcbe   :  { %v1803_v14 = vadd.f32 %v5555_v39, %v1802_v4 }
 0xcbf   :  { %v1883_v27 = vpop.permute.xlu0 %1882 }
 0xcc0   :  { %v1874_v13 = vadd.f32 %v1871_v19, %v1803_v14 }
 0xcc2   :  { %v3882_v3 = vmul.f32 -1.442695, %v1874_v13 }
 0xcc4   :  { %4533 = vpow2.f32 %v3882_v3 }
 0xcd1   :  { %v4534_v17 = vpop.eup %4533 }
 0xcd2   :  { %v1878_v25 = vadd.f32 1.0, %v4534_v17 }
 0xcd4   :  { %4535 = vrcp.f32 %v1878_v25 }
 0xce1   :  { %v4536_v26 = vpop.eup %4535 }
 0xce2   :  { %v1885_v31 = vmul.f32 %v4536_v26, %v1883_v27  ;;  %v1892_v7 = vsub.f32 1.0, %v4536_v26  ;;  %v1899_v18 = vmul.f32 %v4536_v26, %v5609_v49 }
 0xce4   :  { %1887 = vrot.lane.b32.xlu0 %v1885_v31, %s4971_s13 }
 0xce6   :  { %v1793_v38 = vpop.f32.mrf.mxu0  ;;  %v2049_v40 = vpop.f32.mrf.mxu1 }
 0xce7   :  { %v5675_v41 = vadd.f32 %v5565_v0, %v1793_v38  ;;  %v2050_v44 = vadd.f32 %v5442_v22, %v2049_v40 }
 0xce8   :  { %v4222_v42 = vpop.f32.mrf.mxu0  ;;  %v4255_v43 = vpop.f32.mrf.mxu1 }
 0xce9   :  { %1978 = vperm.xlu1 %4500, %v5675_v41  }
 0xced   :  { %2061 = vrot.lane.b32.xlu1 %v2050_v44, %s4971_s13 }
 0xd56   :  { %v1888_v45 = vpop.permute.xlu0 %1887 }
 0xd57   :  { %v1890_v46 = vadd.f32 %v1888_v45, %v1803_v14 }
 0xd59   :  { %4537 = vtanh.f32 %v1890_v46 }
 0xd64   :  { %v1979_v47 = vpop.permute.xlu1 %1978 }
 0xd65   :  { %v1981_v30 = vmul.f32 %v5447_v28, %v1979_v47 }
 0xd66   :  { %v4538_v48 = vpop.eup %4537 }
 0xd67   :  { %v1982_v51 = vadd.f32 %v5455_v32, %v1981_v30  ;;  %1894 = vrot.lane.b32.xlu0 %v4538_v48, %s4985_s16 }
 0xd68   :  { %v2062_v57 = vpop.permute.xlu1 %2061 }
 0xd69   :  { %v2053_v52 = vadd.f32 %v2050_v44, %v1982_v51 }
 0xd6b   :  { %v3885_v53 = vmul.f32 -1.442695, %v2053_v52 }
 0xd6d   :  { %4539 = vpow2.f32 %v3885_v53 }
 0xd7a   :  { %v4540_v29 = vpop.eup %4539 }
 0xd7b   :  { %v2057_v50 = vadd.f32 1.0, %v4540_v29 }
 0xd7d   :  { %4541 = vrcp.f32 %v2057_v50 }
 0xd8a   :  { %v4542_v54 = vpop.eup %4541 }
 0xd8b   :  { %v2064_v5 = vmul.f32 %v4542_v54, %v2062_v57  ;;  %v2071_v49 = vsub.f32 1.0, %v4542_v54  ;;  %v2077_v3 = vmul.f32 %v4542_v54, %v5637_v6 }
 0xd8d   :  { %2066 = vrot.lane.b32.xlu1 %v2064_v5, %s4971_s13 }
 0xdd9   :  { %v1895_v8 = vpop.permute.xlu0 %1894 }
 0xdda   :  { %v1897_v10 = vmul.f32 %v1895_v8, %v1892_v7 }
 0xddc   :  { %v5685_v11 = vadd.f32 %v1899_v18, %v1897_v10 }
 0xdde   :  { %1902 = vrot.lane.b32.xlu0 %v5685_v11, %s4985_s16 }
 0xdff   :  { %v2067_v19 = vpop.permute.xlu1 %2066 }
 0xe00   :  { %v2069_v12 = vadd.f32 %v2067_v19, %v1982_v51 }
 0xe02   :  { %4543 = vtanh.f32 %v2069_v12 }
 0xe0f   :  { %v4544_v4 = vpop.eup %4543 }
 0xe10   :  { %2073 = vrot.lane.b32.xlu1 %v4544_v4, %s4985_s16 }
 0xe50   :  { %v1903_v14 = vpop.permute.xlu0 %1902 }
 0xe51   :  { %4243 = vmatmul.mubr.msk.f32.vlgmr.msra.gmra.mxu0 %vm272_vm0, %v1903_v14  ;;  %4276 = vmatmul.mubr.msk.f32.vlgmr.msra.gmra.mxu1 %vm272_vm0, %v1903_v14 }
 0xe52   :  { %4257 = vmatpush3.msra.mxu0 %v5466_v55  ;;  %4290 = vmatpush3.msra.mxu1 %v5385_v59 }
 0xe53   :  { %4258 = vmatprep.subr.mxu0 %v4980_v2  ;;  %4291 = vmatprep.subr.mxu1 %v4980_v2 }
 0xe54   :  { %4259 = vmatpush3.msra.mxu0 %v5471_v56  ;;  %4292 = vmatpush3.msra.mxu1 %v5393_v60 }
 0xe55   :  { %4260 = vmatprep.subr.mxu0 %v4980_v2  ;;  %4293 = vmatprep.subr.mxu1 %v4980_v2 }
 0xe56   :  { %4261 = vmatpush3.msra.mxu0 %v5480_v58  ;;  %4294 = vmatpush3.msra.mxu1 %v5402_v61 }
 0xe57   :  { %4262 = vmatprep.subr.mxu0 %v4980_v2  ;;  %4295 = vmatprep.subr.mxu1 %v4980_v2 }
 0xe58   :  { %4263 = vmatpush3.msra.mxu0 %v5487_v63  ;;  %4264 = vmatprep.mubr.msk.f32.mxu0 %vm4986_vm11, %v4980_v2 }
 0xe59   :  { %4296 = vmatpush3.msra.mxu1 %v5409_v62  ;;  %4297 = vmatprep.mubr.msk.f32.mxu1 %vm4986_vm11, %v4980_v2 }
 0xe5a   :  { %4278 = vmatprep.subr.mxu0 %v4980_v2  ;;  %4311 = vmatprep.subr.mxu1 %v4980_v2 }
 0xe82   :  { %v2074_v13 = vpop.permute.xlu1 %2073 }
 0xe83   :  { %v2076_v17 = vmul.f32 %v2074_v13, %v2071_v49 }
 0xe85   :  { %v5713_v25 = vadd.f32 %v2077_v3, %v2076_v17 }
 0xe87   :  { %2080 = vrot.lane.b32.xlu1 %v5713_v25, %s4985_s16 }
 0xef9   :  { %v2081_v26 = vpop.permute.xlu1 %2080 }
 0xefa   :  { %4265 = vmatmul.mubr.msk.f32.vlgmr.msra.gmra.mxu0 %vm272_vm0, %v2081_v26  ;;  %4298 = vmatmul.mubr.msk.f32.vlgmr.msra.gmra.mxu1 %vm272_vm0, %v2081_v26 }
 0xefb   :  { %4279 = vmatpush3.msra.mxu0 %v5583_v33  ;;  %4312 = vmatpush3.msra.mxu1 %v5503_v16 }
 0xefc   :  { %4280 = vmatprep.subr.mxu0 %v4980_v2  ;;  %4313 = vmatprep.subr.mxu1 %v4980_v2 }
 0xefd   :  { %4281 = vmatpush3.msra.mxu0 %v5588_v34  ;;  %4314 = vmatpush3.msra.mxu1 %v5507_v20 }
 0xefe   :  { %4282 = vmatprep.subr.mxu0 %v4980_v2  ;;  %4315 = vmatprep.subr.mxu1 %v4980_v2 }
 0xeff   :  { %4283 = vmatpush3.msra.mxu0 %v5595_v35  ;;  %4316 = vmatpush3.msra.mxu1 %v5513_v23 }
 0xf00   :  { %4284 = vmatprep.subr.mxu0 %v4980_v2  ;;  %4317 = vmatprep.subr.mxu1 %v4980_v2 }
 0xf01   :  { %4285 = vmatpush3.msra.mxu0 %v5602_v36  ;;  %4286 = vmatprep.mubr.msk.f32.mxu0 %vm4986_vm11, %v4980_v2 }
 0xf02   :  { %4318 = vmatpush3.msra.mxu1 %v5519_v24  ;;  %4319 = vmatprep.mubr.msk.f32.mxu1 %vm4986_vm11, %v4980_v2 }
 0xf03   :  { %4300 = vmatprep.subr.mxu0 %v4980_v2  ;;  %4333 = vmatprep.subr.mxu1 %v4980_v2 }
 0xf11   :  { %v1972_v6 = vpop.f32.mrf.mxu0  ;;  %v2227_v27 = vpop.f32.mrf.mxu1 }
 0xf12   :  { %v5740_v31 = vadd.f32 %v5663_v15, %v1972_v6  ;;  %v2228_v42 = vadd.f32 %v5540_v21, %v2227_v27 }
 0xf13   :  { %v4244_v38 = vpop.f32.mrf.mxu0  ;;  %v4277_v40 = vpop.f32.mrf.mxu1 }
 0xf14   :  { %2156 = vperm.xlu0 %4499, %v5740_v31  }
 0xf18   :  { %2239 = vrot.lane.b32.xlu0 %v2228_v42, %s4971_s13 }
 0xf8f   :  { %v2157_v43 = vpop.permute.xlu0 %2156 }
 0xf90   :  { %v2159_v44 = vmul.f32 %v5548_v37, %v2157_v43 }
 0xf92   :  { %v2160_v45 = vadd.f32 %v5555_v39, %v2159_v44 }
 0xf93   :  { %v2240_v52 = vpop.permute.xlu0 %2239 }
 0xf94   :  { %v2231_v46 = vadd.f32 %v2228_v42, %v2160_v45 }
 0xf96   :  { %v3888_v47 = vmul.f32 -1.442695, %v2231_v46 }
 0xf98   :  { %4545 = vpow2.f32 %v3888_v47 }
 0xfa5   :  { %v4546_v30 = vpop.eup %4545 }
 0xfa6   :  { %v2235_v48 = vadd.f32 1.0, %v4546_v30 }
 0xfa8   :  { %4547 = vrcp.f32 %v2235_v48 }
 0xfb5   :  { %v4548_v51 = vpop.eup %4547 }
 0xfb6   :  { %v2242_v53 = vmul.f32 %v4548_v51, %v2240_v52  ;;  %v2249_v27 = vsub.f32 1.0, %v4548_v51  ;;  %v2255_v40 = vmul.f32 %v4548_v51, %v5685_v11 }
 0xfb8   :  { %2244 = vrot.lane.b32.xlu0 %v2242_v53, %s4971_s13 }
 0xfba   :  { %v2150_v29 = vpop.f32.mrf.mxu0  ;;  %v2405_v50 = vpop.f32.mrf.mxu1 }
 0xfbb   :  { %v5749_v54 = vadd.f32 %v5565_v0, %v2150_v29  ;;  %v2406_v7 = vadd.f32 %v5442_v22, %v2405_v50 }
 0xfbc   :  { %v4266_v57 = vpop.f32.mrf.mxu0  ;;  %v4299_v5 = vpop.f32.mrf.mxu1 }
 0xfbd   :  { %2334 = vperm.xlu1 %4500, %v5749_v54  }
 0xfc1   :  { %2417 = vrot.lane.b32.xlu1 %v2406_v7, %s4971_s13 }
0x102a   :  { %v2245_v8 = vpop.permute.xlu0 %2244 }
0x102b   :  { %v2247_v18 = vadd.f32 %v2245_v8, %v2160_v45 }
0x102d   :  { %4549 = vtanh.f32 %v2247_v18 }
0x1038   :  { %v2335_v10 = vpop.permute.xlu1 %2334 }
0x1039   :  { %v2337_v19 = vmul.f32 %v5447_v28, %v2335_v10 }
0x103a   :  { %v4550_v12 = vpop.eup %4549 }
0x103b   :  { %v2338_v4 = vadd.f32 %v5455_v32, %v2337_v19  ;;  %2251 = vrot.lane.b32.xlu0 %v4550_v12, %s4985_s16 }
0x103c   :  { %v2418_v26 = vpop.permute.xlu1 %2417 }
0x103d   :  { %v2409_v14 = vadd.f32 %v2406_v7, %v2338_v4 }
0x103f   :  { %v3891_v49 = vmul.f32 -1.442695, %v2409_v14 }
0x1041   :  { %4551 = vpow2.f32 %v3891_v49 }
0x104e   :  { %v4552_v13 = vpop.eup %4551 }
0x104f   :  { %v2413_v3 = vadd.f32 1.0, %v4552_v13 }
0x1051   :  { %4553 = vrcp.f32 %v2413_v3 }
0x105e   :  { %v4554_v17 = vpop.eup %4553 }
0x105f   :  { %v2420_v6 = vmul.f32 %v4554_v17, %v2418_v26 }
0x1061   :  { %2422 = vrot.lane.b32.xlu1 %v2420_v6, %s4971_s13 }
0x10ad   :  { %v2252_v38 = vpop.permute.xlu0 %2251 }
0x10ae   :  { %v2254_v42 = vmul.f32 %v2252_v38, %v2249_v27 }
0x10b0   :  { %v5759_v43 = vadd.f32 %v2255_v40, %v2254_v42 }
0x10b2   :  { %2258 = vrot.lane.b32.xlu0 %v5759_v43, %s4985_s16 }
0x10d3   :  { %v2423_v44 = vpop.permute.xlu1 %2422 }
0x10d4   :  { %v2425_v45 = vadd.f32 %v2423_v44, %v2338_v4 }
0x10d6   :  { %4555 = vtanh.f32 %v2425_v45 }
0x10e3   :  { %v4556_v46 = vpop.eup %4555 }
0x10e4   :  { %2429 = vrot.lane.b32.xlu1 %v4556_v46, %s4985_s16 }
0x1124   :  { %v2259_v47 = vpop.permute.xlu0 %2258 }
0x1125   :  { %4287 = vmatmul.mubr.msk.f32.vlgmr.msra.gmra.mxu0 %vm272_vm0, %v2259_v47  ;;  %4320 = vmatmul.mubr.msk.f32.vlgmr.msra.gmra.mxu1 %vm272_vm0, %v2259_v47 }
0x1126   :  { %4301 = vmatpush3.msra.mxu0 %v5466_v55  ;;  %4334 = vmatpush3.msra.mxu1 %v5385_v59  ;;  %v2427_v59 = vsub.f32 1.0, %v4554_v17 }
0x1127   :  { %4302 = vmatprep.subr.mxu0 %v4980_v2  ;;  %4335 = vmatprep.subr.mxu1 %v4980_v2 }
0x1128   :  { %4303 = vmatpush3.msra.mxu0 %v5471_v56  ;;  %4336 = vmatpush3.msra.mxu1 %v5393_v60 }
0x1129   :  { %4304 = vmatprep.subr.mxu0 %v4980_v2  ;;  %4337 = vmatprep.subr.mxu1 %v4980_v2 }
0x112a   :  { %4305 = vmatpush3.msra.mxu0 %v5480_v58  ;;  %4338 = vmatpush3.msra.mxu1 %v5402_v61  ;;  %v2433_v61 = vmul.f32 %v4554_v17, %v5713_v25 }
0x112b   :  { %4306 = vmatprep.subr.mxu0 %v4980_v2  ;;  %4339 = vmatprep.subr.mxu1 %v4980_v2 }
0x112c   :  { %4307 = vmatpush3.msra.mxu0 %v5487_v63  ;;  %4308 = vmatprep.mubr.msk.f32.mxu0 %vm4986_vm11, %v4980_v2 }
0x112d   :  { %4340 = vmatpush3.msra.mxu1 %v5409_v62  ;;  %4341 = vmatprep.mubr.msk.f32.mxu1 %vm4986_vm11, %v4980_v2 }
0x112e   :  { %4322 = vmatprep.subr.mxu0 %v4980_v2  ;;  %4355 = vmatprep.subr.mxu1 %v4980_v2 }
0x1156   :  { %v2430_v60 = vpop.permute.xlu1 %2429 }
0x1157   :  { %v2432_v11 = vmul.f32 %v2430_v60, %v2427_v59 }
0x1159   :  { %v5787_v30 = vadd.f32 %v2433_v61, %v2432_v11 }
0x115b   :  { %2436 = vrot.lane.b32.xlu1 %v5787_v30, %s4985_s16 }
0x11cd   :  { %v2437_v48 = vpop.permute.xlu1 %2436 }
0x11ce   :  { %4309 = vmatmul.mubr.msk.f32.vlgmr.msra.gmra.mxu0 %vm272_vm0, %v2437_v48  ;;  %4342 = vmatmul.mubr.msk.f32.vlgmr.msra.gmra.mxu1 %vm272_vm0, %v2437_v48 }
0x11cf   :  { %4323 = vmatpush3.msra.mxu0 %v5583_v33  ;;  %4356 = vmatpush3.msra.mxu1 %v5503_v16 }
0x11d0   :  { %4324 = vmatprep.subr.mxu0 %v4980_v2  ;;  %4357 = vmatprep.subr.mxu1 %v4980_v2 }
0x11d1   :  { %4325 = vmatpush3.msra.mxu0 %v5588_v34  ;;  %4358 = vmatpush3.msra.mxu1 %v5507_v20 }
0x11d2   :  { %4326 = vmatprep.subr.mxu0 %v4980_v2  ;;  %4359 = vmatprep.subr.mxu1 %v4980_v2 }
0x11d3   :  { %4327 = vmatpush3.msra.mxu0 %v5595_v35  ;;  %4360 = vmatpush3.msra.mxu1 %v5513_v23 }
0x11d4   :  { %4328 = vmatprep.subr.mxu0 %v4980_v2  ;;  %4361 = vmatprep.subr.mxu1 %v4980_v2 }
0x11d5   :  { %4329 = vmatpush3.msra.mxu0 %v5602_v36  ;;  %4330 = vmatprep.mubr.msk.f32.mxu0 %vm4986_vm11, %v4980_v2 }
0x11d6   :  { %4362 = vmatpush3.msra.mxu1 %v5519_v24  ;;  %4363 = vmatprep.mubr.msk.f32.mxu1 %vm4986_vm11, %v4980_v2 }
0x11d7   :  { %4344 = vmatprep.subr.mxu0 %v4980_v2  ;;  %4377 = vmatprep.subr.mxu1 %v4980_v2 }
0x11e5   :  { %v2328_v62 = vpop.f32.mrf.mxu0  ;;  %v2583_v25 = vpop.f32.mrf.mxu1 }
0x11e6   :  { %v5814_v51 = vadd.f32 %v5663_v15, %v2328_v62  ;;  %v2584_v29 = vadd.f32 %v5540_v21, %v2583_v25 }
0x11e7   :  { %v4288_v52 = vpop.f32.mrf.mxu0  ;;  %v4321_v53 = vpop.f32.mrf.mxu1 }
0x11e8   :  { %2512 = vperm.xlu0 %4499, %v5814_v51  }
0x11ec   :  { %2595 = vrot.lane.b32.xlu0 %v2584_v29, %s4971_s13 }
0x1263   :  { %v2513_v50 = vpop.permute.xlu0 %2512 }
0x1264   :  { %v2515_v57 = vmul.f32 %v5548_v37, %v2513_v50  ;;  %v4600_v50 = vld [vmem:[%s6100_s14 + $0x10] sm:$0xff] }
0x1266   :  { %v2516_v5 = vadd.f32 %v5555_v39, %v2515_v57 }
0x1267   :  { %v2596_v12 = vpop.permute.xlu0 %2595 }
0x1268   :  { %v2587_v7 = vadd.f32 %v2584_v29, %v2516_v5 }
0x126a   :  { %v3894_v8 = vmul.f32 -1.442695, %v2587_v7 }
0x126c   :  { %4557 = vpow2.f32 %v3894_v8 }
0x1279   :  { %v4558_v18 = vpop.eup %4557 }
0x127a   :  { %v2591_v10 = vadd.f32 1.0, %v4558_v18 }
0x127c   :  { %4559 = vrcp.f32 %v2591_v10 }
0x1289   :  { %v4560_v19 = vpop.eup %4559 }
0x128a   :  { %v2598_v4 = vmul.f32 %v4560_v19, %v2596_v12  ;;  %v2605_v11 = vsub.f32 1.0, %v4560_v19 }
0x128c   :  { %2600 = vrot.lane.b32.xlu0 %v2598_v4, %s4971_s13 }
0x128e   :  { %v2506_v14 = vpop.f32.mrf.mxu0  ;;  %v2761_v49 = vpop.f32.mrf.mxu1 }
0x128f   :  { %v5823_v13 = vadd.f32 %v5565_v0, %v2506_v14  ;;  %v2762_v26 = vadd.f32 %v5442_v22, %v2761_v49 }
0x1290   :  { %v4310_v3 = vpop.f32.mrf.mxu0  ;;  %v4343_v17 = vpop.f32.mrf.mxu1 }
0x1291   :  { %2690 = vperm.xlu1 %4500, %v5823_v13  }
0x1295   :  { %2773 = vrot.lane.b32.xlu1 %v2762_v26, %s4971_s13 }
0x12fe   :  { %v2601_v6 = vpop.permute.xlu0 %2600 }
0x12ff   :  { %v2603_v27 = vadd.f32 %v2601_v6, %v2516_v5 }
0x1301   :  { %4561 = vtanh.f32 %v2603_v27 }
0x130c   :  { %v2691_v38 = vpop.permute.xlu1 %2690 }
0x130d   :  { %v2693_v40 = vmul.f32 %v5447_v28, %v2691_v38  ;;  %v2611_v28 = vmul.f32 %v4560_v19, %v5759_v43  ;;  %v4599_v43 = vld [vmem:[%s6100_s14 + $0x18] sm:$0xff] }
0x130e   :  { %v4562_v42 = vpop.eup %4561 }
0x130f   :  { %v2694_v44 = vadd.f32 %v5455_v32, %v2693_v40  ;;  %2607 = vrot.lane.b32.xlu0 %v4562_v42, %s4985_s16 }
0x1310   :  { %v2774_v60 = vpop.permute.xlu1 %2773 }
0x1311   :  { %v2765_v45 = vadd.f32 %v2762_v26, %v2694_v44 }
0x1313   :  { %v3897_v46 = vmul.f32 -1.442695, %v2765_v45 }
0x1315   :  { %4563 = vpow2.f32 %v3897_v46 }
0x1322   :  { %v4564_v47 = vpop.eup %4563 }
0x1323   :  { %v2769_v59 = vadd.f32 1.0, %v4564_v47  ;;  %v4604_v47 = vld [vmem:[#allocation23] ss:$0 sm:$0xff] }
0x1325   :  { %4565 = vrcp.f32 %v2769_v59 }
0x1332   :  { %v4566_v22 = vpop.eup %4565 }
0x1333   :  { %v2776_v61 = vmul.f32 %v4566_v22, %v2774_v60  ;;  %v2789_v5 = vmul.f32 %v4566_v22, %v5787_v30  ;;  %v4605_v60 = vld [vmem:[#allocation25] ss:$0 sm:$0xff] }
0x1335   :  { %2778 = vrot.lane.b32.xlu1 %v2776_v61, %s4971_s13 }
0x1381   :  { %v2608_v48 = vpop.permute.xlu0 %2607 }
0x1382   :  { %v2610_v62 = vmul.f32 %v2608_v48, %v2605_v11 }
0x1384   :  { %v5833_v25 = vadd.f32 %v2611_v28, %v2610_v62 }
0x1386   :  { %2614 = vrot.lane.b32.xlu0 %v5833_v25, %s4985_s16 }
0x13a7   :  { %v2779_v32 = vpop.permute.xlu1 %2778 }
0x13a8   :  { %v2781_v52 = vadd.f32 %v2779_v32, %v2694_v44 }
0x13aa   :  { %4567 = vtanh.f32 %v2781_v52 }
0x13b7   :  { %v4568_v53 = vpop.eup %4567 }
0x13b8   :  { %2785 = vrot.lane.b32.xlu1 %v4568_v53, %s4985_s16 }
0x13f8   :  { %v2615_v29 = vpop.permute.xlu0 %2614 }
0x13f9   :  { %4331 = vmatmul.mubr.msk.f32.vlgmr.msra.gmra.mxu0 %vm272_vm0, %v2615_v29  ;;  %4364 = vmatmul.mubr.msk.f32.vlgmr.msra.gmra.mxu1 %vm272_vm0, %v2615_v29 }
0x13fa   :  { %4345 = vmatpush3.msra.mxu0 %v5466_v55  ;;  %4378 = vmatpush3.msra.mxu1 %v4599_v43  ;;  %v4601_v55 = vld [vmem:[%s6100_s14 + $0x8] sm:$0xff] }
0x13fb   :  { %4346 = vmatprep.subr.mxu0 %v4980_v2  ;;  %4379 = vmatprep.subr.mxu1 %v4980_v2 }
0x13fc   :  { %4347 = vmatpush3.msra.mxu0 %v5471_v56  ;;  %4380 = vmatpush3.msra.mxu1 %v4600_v50  ;;  %v4602_v56 = vld [vmem:[%s6100_s14] sm:$0xff] }
0x13fd   :  { %4348 = vmatprep.subr.mxu0 %v4980_v2  ;;  %4381 = vmatprep.subr.mxu1 %v4980_v2 }
0x13fe   :  { %4349 = vmatpush3.msra.mxu0 %v5480_v58  ;;  %4382 = vmatpush3.msra.mxu1 %v4601_v55  ;;  %v2783_v58 = vsub.f32 1.0, %v4566_v22 }
0x13ff   :  { %4350 = vmatprep.subr.mxu0 %v4980_v2  ;;  %4383 = vmatprep.subr.mxu1 %v4980_v2 }
0x1400   :  { %4351 = vmatpush3.msra.mxu0 %v5487_v63  ;;  %4352 = vmatprep.mubr.msk.f32.mxu0 %vm4986_vm11, %v4980_v2 }
0x1401   :  { %4384 = vmatpush3.msra.mxu1 %v4602_v56  ;;  %4385 = vmatprep.mubr.msk.f32.mxu1 %vm4986_vm11, %v4980_v2 }
0x1402   :  { %4366 = vmatprep.subr.mxu0 %v4980_v2  ;;  %4399 = vmatprep.subr.mxu1 %v4980_v2 }
0x142a   :  { %v2786_v57 = vpop.permute.xlu1 %2785 }
0x142b   :  { %v2788_v63 = vmul.f32 %v2786_v57, %v2783_v58 }
0x142d   :  { %v5869_v7 = vadd.f32 %v2789_v5, %v2788_v63  ;;  %v5925_v63 = vld [vmem:[#allocation28 + $0x18] sm:$0xff] }
0x142f   :  { %2792 = vrot.lane.b32.xlu1 %v5869_v7, %s4985_s16 }
0x14a1   :  { %v2793_v8 = vpop.permute.xlu1 %2792 }
0x14a2   :  { %4353 = vmatmul.mubr.msk.f32.vlgmr.msra.gmra.mxu0 %vm272_vm0, %v2793_v8  ;;  %4386 = vmatmul.mubr.msk.f32.vlgmr.msra.gmra.mxu1 %vm272_vm0, %v2793_v8  ;;  %v4608_v8 = vld [vmem:[%s6103_s17 + $0x10] sm:$0xff] }
0x14a3   :  { %4367 = vmatpush3.msra.mxu0 %v5583_v33  ;;  %4400 = vmatpush3.msra.mxu1 %v5503_v16 }
0x14a4   :  { %4368 = vmatprep.subr.mxu0 %v4980_v2  ;;  %4401 = vmatprep.subr.mxu1 %v4980_v2 }
0x14a5   :  { %4369 = vmatpush3.msra.mxu0 %v5588_v34  ;;  %4402 = vmatpush3.msra.mxu1 %v5507_v20 }
0x14a6   :  { %4370 = vmatprep.subr.mxu0 %v4980_v2  ;;  %4403 = vmatprep.subr.mxu1 %v4980_v2 }
0x14a7   :  { %4371 = vmatpush3.msra.mxu0 %v5595_v35  ;;  %4404 = vmatpush3.msra.mxu1 %v5513_v23 }
0x14a8   :  { %4372 = vmatprep.subr.mxu0 %v4980_v2  ;;  %4405 = vmatprep.subr.mxu1 %v4980_v2 }
0x14a9   :  { %4373 = vmatpush3.msra.mxu0 %v5602_v36  ;;  %4374 = vmatprep.mubr.msk.f32.mxu0 %vm4986_vm11, %v4980_v2 }
0x14aa   :  { %4406 = vmatpush3.msra.mxu1 %v5519_v24  ;;  %4407 = vmatprep.mubr.msk.f32.mxu1 %vm4986_vm11, %v4980_v2 }
0x14ab   :  { %4388 = vmatprep.subr.mxu0 %v4980_v2  ;;  %4421 = vmatprep.subr.mxu1 %v4980_v2 }
0x14b9   :  { %v2684_v16 = vpop.f32.mrf.mxu0  ;;  %v2939_v20 = vpop.f32.mrf.mxu1 }
0x14ba   :  { %v5896_v23 = vadd.f32 %v5663_v15, %v2684_v16  ;;  %v2940_v10 = vadd.f32 %v5540_v21, %v2939_v20  ;;  %v5933_v16 = vld [vmem:[#allocation28 + $0x10] sm:$0xff]  ;;  %v4610_v20 = vld [vmem:[%s6103_s17 + $0x8] sm:$0xff] }
0x14bb   :  { %v4332_v30 = vpop.f32.mrf.mxu0  ;;  %v4365_v18 = vpop.f32.mrf.mxu1 }
0x14bc   :  { %2868 = vperm.xlu0 %4499, %v5896_v23   ;;  %v5941_v30 = vld [vmem:[#allocation28 + $0x8] sm:$0xff]  ;;  %v4612_v18 = vld [vmem:[%s6103_s17] sm:$0xff] }
0x14c0   :  { %2951 = vrot.lane.b32.xlu0 %v2940_v10, %s4971_s13 }
0x1537   :  { %v2869_v24 = vpop.permute.xlu0 %2868 }
0x1538   :  { %v2871_v19 = vmul.f32 %v5548_v37, %v2869_v24 }
0x153a   :  { %v2872_v12 = vadd.f32 %v5555_v39, %v2871_v19  ;;  %v4603_v39 = vld [vmem:[#allocation26] ss:$0 sm:$0xff] }
0x153b   :  { %v2952_v26 = vpop.permute.xlu0 %2951 }
0x153c   :  { %v2943_v4 = vadd.f32 %v2940_v10, %v2872_v12  ;;  %v5949_v10 = vld [vmem:[#allocation28] sm:$0xff] }
0x153e   :  { %v3900_v14 = vmul.f32 -1.442695, %v2943_v4 }
0x1540   :  { %4569 = vpow2.f32 %v3900_v14 }
0x154d   :  { %v4570_v49 = vpop.eup %4569 }
0x154e   :  { %v2947_v3 = vadd.f32 1.0, %v4570_v49 }
0x1550   :  { %4571 = vrcp.f32 %v2947_v3 }
0x155d   :  { %v4572_v17 = vpop.eup %4571 }
0x155e   :  { %v2954_v6 = vmul.f32 %v4572_v17, %v2952_v26  ;;  %v2961_v53 = vsub.f32 1.0, %v4572_v17  ;;  %v2967_v43 = vmul.f32 %v4572_v17, %v5833_v25  ;;  %v4606_v25 = vld [vmem:[%s6103_s17 + $0x18] sm:$0xff] }
0x1560   :  { %2956 = vrot.lane.b32.xlu0 %v2954_v6, %s4971_s13  ;;  %v5982_v6 = vld [vmem:[%s6105_s19] ss:$0 sm:$0xff] }
0x1562   :  { %v2862_v27 = vpop.f32.mrf.mxu0  ;;  %v3117_v21 = vpop.f32.mrf.mxu1 }
0x1563   :  { %v5905_v38 = vadd.f32 %v5565_v0, %v2862_v27  ;;  %v3118_v42 = vadd.f32 %v4603_v39, %v3117_v21  ;;  %v5988_v21 = vld [vmem:[%s6107_s21] ss:$0 sm:$0xff] }
0x1564   :  { %v4354_v40 = vpop.f32.mrf.mxu0  ;;  %v4387_v37 = vpop.f32.mrf.mxu1 }
0x1565   :  { %3046 = vperm.xlu1 %4500, %v5905_v38  }
0x1569   :  { %3129 = vrot.lane.b32.xlu1 %v3118_v42, %s4971_s13 }
0x15d2   :  { %v2957_v44 = vpop.permute.xlu0 %2956 }
0x15d3   :  { %v2959_v45 = vadd.f32 %v2957_v44, %v2872_v12 }
0x15d5   :  { %4573 = vtanh.f32 %v2959_v45 }
0x15e0   :  { %v3047_v46 = vpop.permute.xlu1 %3046 }
0x15e1   :  { %v3049_v59 = vmul.f32 %v4604_v47, %v3047_v46 }
0x15e2   :  { %v4574_v22 = vpop.eup %4573 }
0x15e3   :  { %v3050_v61 = vadd.f32 %v4605_v60, %v3049_v59  ;;  %2963 = vrot.lane.b32.xlu0 %v4574_v22, %s4985_s16 }
0x15e4   :  { %v3130_v32 = vpop.permute.xlu1 %3129 }
0x15e5   :  { %v3121_v0 = vadd.f32 %v3118_v42, %v3050_v61 }
0x15e7   :  { %v3903_v11 = vmul.f32 -1.442695, %v3121_v0 }
0x15e9   :  { %4575 = vpow2.f32 %v3903_v11 }
0x15f6   :  { %v4576_v48 = vpop.eup %4575 }
0x15f7   :  { %v3125_v28 = vadd.f32 1.0, %v4576_v48 }
0x15f9   :  { %4577 = vrcp.f32 %v3125_v28 }
0x1606   :  { %v4578_v62 = vpop.eup %4577 }
0x1607   :  { %v3132_v52 = vmul.f32 %v4578_v62, %v3130_v32  ;;  %v3139_v24 = vsub.f32 1.0, %v4578_v62  ;;  %v3145_v12 = vmul.f32 %v4578_v62, %v5869_v7 }
0x1609   :  { %3134 = vrot.lane.b32.xlu1 %v3132_v52, %s4971_s13 }
0x1655   :  { %v2964_v29 = vpop.permute.xlu0 %2963 }
0x1656   :  { %v2966_v50 = vmul.f32 %v2964_v29, %v2961_v53  ;;  %v4617_v53 = vld [vmem:[%s6109_s23 + $0x18] sm:$0xff]  ;;  %v4618_v29 = vld [vmem:[%s6109_s23 + $0x10] sm:$0xff] }
0x1658   :  { %v5912_v55 = vadd.f32 %v2967_v43, %v2966_v50  ;;  %v4619_v43 = vld [vmem:[%s6109_s23 + $0x8] sm:$0xff]  ;;  %v4620_v50 = vld [vmem:[%s6109_s23] sm:$0xff]  ;;  %s4988_s23 = smov 1  }
0x165a   :  { %2970 = vrot.lane.b32.xlu0 %v5912_v55, %s4985_s16 }
0x167b   :  { %v3135_v56 = vpop.permute.xlu1 %3134 }
0x167c   :  { %v3137_v58 = vadd.f32 %v3135_v56, %v3050_v61 }
0x167e   :  { %4579 = vtanh.f32 %v3137_v58 }
0x168b   :  { %v4580_v57 = vpop.eup %4579 }
0x168c   :  { %3141 = vrot.lane.b32.xlu1 %v4580_v57, %s4985_s16 }
0x16cc   :  { %v2971_v5 = vpop.permute.xlu0 %2970 }
0x16cd   :  { %4375 = vmatmul.mubr.msk.f32.vlgmr.msra.gmra.mxu0 %vm272_vm0, %v2971_v5  ;;  %4408 = vmatmul.mubr.msk.f32.vlgmr.msra.gmra.mxu1 %vm272_vm0, %v2971_v5 }
0x16ce   :  { %4389 = vmatpush3.msra.mxu0 %v4606_v25  ;;  %4396 = vmatprep.mubr.msk.f32.mxu0 %vm4986_vm11, %v4980_v2 }
0x16cf   :  { %4390 = vmatprep.subr.mxu0 %v4980_v2  ;;  %4422 = vmatpush3.msra.mxu1 %v5925_v63 }
0x16d0   :  { %4391 = vmatpush3.msra.mxu0 %v4608_v8  ;;  %4423 = vmatprep.subr.mxu1 %v4980_v2 }
0x16d1   :  { %4392 = vmatprep.subr.mxu0 %v4980_v2  ;;  %4424 = vmatpush3.msra.mxu1 %v5933_v16 }
0x16d2   :  { %4393 = vmatpush3.msra.mxu0 %v4610_v20  ;;  %4425 = vmatprep.subr.mxu1 %v4980_v2 }
0x16d3   :  { %4394 = vmatprep.subr.mxu0 %v4980_v2  ;;  %4426 = vmatpush3.msra.mxu1 %v5941_v30 }
0x16d4   :  { %4395 = vmatpush3.msra.mxu0 %v4612_v18  ;;  %4427 = vmatprep.subr.mxu1 %v4980_v2 }
0x16d5   :  { %4410 = vmatprep.subr.mxu0 %v4980_v2  ;;  %4428 = vmatpush3.msra.mxu1 %v5949_v10 }
0x16d6   :  { %4429 = vmatprep.mubr.msk.f32.mxu1 %vm4986_vm11, %v4980_v2  ;;  %4443 = vmatprep.subr.mxu1 %v4980_v2 }
0x16fe   :  { %v3142_v19 = vpop.permute.xlu1 %3141 }
0x16ff   :  { %v3144_v4 = vmul.f32 %v3142_v19, %v3139_v24 }
0x1701   :  { %v3146_v14 = vadd.f32 %v3145_v12, %v3144_v4 }
0x1703   :  { %3148 = vrot.lane.b32.xlu1 %v3146_v14, %s4985_s16 }
0x1775   :  { %v3149_v49 = vpop.permute.xlu1 %3148 }
0x1776   :  { %4397 = vmatmul.mubr.msk.f32.vlgmr.msra.gmra.mxu0 %vm272_vm0, %v3149_v49 }
0x1777   :  { %4411 = vmatpush3.msra.mxu0 %v5583_v33  ;;  %4418 = vmatprep.mubr.msk.f32.mxu0 %vm4986_vm11, %v4980_v2 }
0x1778   :  { %4412 = vmatprep.subr.mxu0 %v4980_v2 }
0x1779   :  { %4413 = vmatpush3.msra.mxu0 %v5588_v34  ;;  %v5975_v34 = vld [vmem:[%s6108_s22] ss:$0 sm:$0xff] }
0x177a   :  { %4414 = vmatprep.subr.mxu0 %v4980_v2 }
0x177b   :  { %4415 = vmatpush3.msra.mxu0 %v5595_v35 }
0x177c   :  { %4416 = vmatprep.subr.mxu0 %v4980_v2 }
0x177d   :  { %4417 = vmatpush3.msra.mxu0 %v5602_v36 }
0x177e   :  { %4432 = vmatprep.subr.mxu0 %v4980_v2 }
0x178d   :  { %v3040_v7 = vpop.f32.mrf.mxu0  ;;  %v3295_v3 = vpop.f32.mrf.mxu1 }
0x178e   :  { %v5969_v33 = vadd.f32 %v5663_v15, %v3040_v7  ;;  %v3296_v35 = vadd.f32 %v5975_v34, %v3295_v3 }
0x178f   :  { %v4376_v17 = vpop.f32.mrf.mxu0  ;;  %v4409_v26 = vpop.f32.mrf.mxu1 }
0x1790   :  { %3224 = vperm.xlu0 %4499, %v5969_v33  }
0x1794   :  { %3307 = vrot.lane.b32.xlu0 %v3296_v35, %s4971_s13 }
0x180b   :  { %v3225_v36 = vpop.permute.xlu0 %3224 }
0x180c   :  { %v3227_v27 = vmul.f32 %v5982_v6, %v3225_v36 }
0x180e   :  { %v3228_v40 = vadd.f32 %v5988_v21, %v3227_v27 }
0x180f   :  { %v3308_v46 = vpop.permute.xlu0 %3307 }
0x1810   :  { %v3299_v37 = vadd.f32 %v3296_v35, %v3228_v40 }
0x1812   :  { %v3906_v39 = vmul.f32 -1.442695, %v3299_v37 }
0x1814   :  { %4581 = vpow2.f32 %v3906_v39 }
0x1821   :  { %v4582_v42 = vpop.eup %4581 }
0x1822   :  { %v3303_v44 = vadd.f32 1.0, %v4582_v42 }
0x1824   :  { %4583 = vrcp.f32 %v3303_v44 }
0x1831   :  { %v4584_v45 = vpop.eup %4583 }
0x1832   :  { %v3310_v47 = vmul.f32 %v4584_v45, %v3308_v46  ;;  %v3317_v11 = vsub.f32 1.0, %v4584_v45  ;;  %v3323_v28 = vmul.f32 %v4584_v45, %v5912_v55 }
0x1834   :  { %3312 = vrot.lane.b32.xlu0 %v3310_v47, %s4971_s13 }
0x1836   :  { %v5992_v59 = vpop.f32.mrf.mxu0 }
0x1838   :  { %v4398_v22 = vpop.f32.mrf.mxu0 }
0x18a6   :  { %v3313_v60 = vpop.permute.xlu0 %3312 }
0x18a7   :  { %v3315_v61 = vadd.f32 %v3313_v60, %v3228_v40  ;;  %v6044_v40 = vld [vmem:[#allocation4] ss:$0 sm:$0xff] }
0x18a9   :  { %4585 = vtanh.f32 %v3315_v61 }
0x18b6   :  { %v4586_v0 = vpop.eup %4585 }
0x18b7   :  { %3319 = vrot.lane.b32.xlu0 %v4586_v0, %s4985_s16 }
0x1929   :  { %v3320_v48 = vpop.permute.xlu0 %3319 }
0x192a   :  { %v3322_v62 = vmul.f32 %v3320_v48, %v3317_v11 }
0x192c   :  { %v3324_v32 = vadd.f32 %v3323_v28, %v3322_v62 }
0x192e   :  { %3326 = vrot.lane.b32.xlu0 %v3324_v32, %s4985_s16 }
0x19a0   :  { %v3327_v52 = vpop.permute.xlu0 %3326 }
0x19a1   :  { %4419 = vmatmul.mubr.msk.f32.vlgmr.msra.gmra.mxu0 %vm272_vm0, %v3327_v52  ;;  %4430 = vmatmul.mubr.msk.f32.vlgmr.msra.gmra.mxu1 %vm272_vm0, %v3327_v52 }
0x19a2   :  { %4433 = vmatpush3.msra.mxu0 %v4617_v53  ;;  %4444 = vmatpush3.msra.mxu1 %v5925_v63 }
0x19a3   :  { %4434 = vmatprep.subr.mxu0 %v4980_v2  ;;  %4445 = vmatprep.subr.mxu1 %v4980_v2 }
0x19a4   :  { %4435 = vmatpush3.msra.mxu0 %v4618_v29  ;;  %4446 = vmatpush3.msra.mxu1 %v5933_v16 }
0x19a5   :  { %4436 = vmatprep.subr.mxu0 %v4980_v2  ;;  %4447 = vmatprep.subr.mxu1 %v4980_v2 }
0x19a6   :  { %4437 = vmatpush3.msra.mxu0 %v4619_v43  ;;  %4448 = vmatpush3.msra.mxu1 %v5941_v30 }
0x19a7   :  { %4438 = vmatprep.subr.mxu0 %v4980_v2  ;;  %4449 = vmatprep.subr.mxu1 %v4980_v2 }
0x19a8   :  { %4439 = vmatpush3.msra.mxu0 %v4620_v50  ;;  %4440 = vmatprep.mubr.msk.f32.mxu0 %vm4986_vm11, %v4980_v2 }
0x19a9   :  { %4450 = vmatpush3.msra.mxu1 %v5949_v10  ;;  %4451 = vmatprep.mubr.msk.f32.mxu1 %vm4986_vm11, %v4980_v2 }
0x19aa   :  { %4454 = vmatprep.subr.mxu0 %v4980_v2 }
0x1a61   :  { %v3396_v55 = vpop.f32.mrf.mxu0  ;;  %v3473_v56 = vpop.f32.mrf.mxu1 }
0x1a62   :  { %v6027_v58 = vadd.f32 %v5663_v15, %v3396_v55  ;;  %v3474_v57 = vadd.f32 %v5975_v34, %v3473_v56 }
0x1a63   :  { %v4420_v5 = vpop.f32.mrf.mxu0  ;;  %v4431_v25 = vpop.f32.mrf.mxu1 }
0x1a64   :  { %3485 = vrot.lane.b32.xlu0 %v3474_v57, %s4971_s13  ;;  %3402 = vperm.xlu1 %4500, %v6027_v58  }
0x1ad6   :  { %v3486_v24 = vpop.permute.xlu0 %3485 }
0x1adf   :  { %v3403_v63 = vpop.permute.xlu1 %3402 }
0x1ae0   :  { %v3405_v8 = vmul.f32 %v5982_v6, %v3403_v63 }
0x1ae2   :  { %v3406_v16 = vadd.f32 %v5988_v21, %v3405_v8 }
0x1ae4   :  { %v3477_v20 = vadd.f32 %v3474_v57, %v3406_v16 }
0x1ae6   :  { %v3909_v30 = vmul.f32 -1.442695, %v3477_v20 }
0x1ae8   :  { %4587 = vpow2.f32 %v3909_v30 }
0x1af5   :  { %v4588_v18 = vpop.eup %4587 }
0x1af6   :  { %v3481_v10 = vadd.f32 1.0, %v4588_v18 }
0x1af8   :  { %4589 = vrcp.f32 %v3481_v10 }
0x1b05   :  { %v4590_v15 = vpop.eup %4589 }
0x1b06   :  { %v3488_v19 = vmul.f32 %v4590_v15, %v3486_v24  ;;  %v3495_v49 = vsub.f32 1.0, %v4590_v15  ;;  %v3501_v3 = vmul.f32 %v4590_v15, %v3324_v32 }
0x1b08   :  { %3490 = vrot.lane.b32.xlu1 %v3488_v19, %s4971_s13 }
0x1b7a   :  { %v3491_v12 = vpop.permute.xlu1 %3490 }
0x1b7b   :  { %v3493_v4 = vadd.f32 %v3491_v12, %v3406_v16 }
0x1b7d   :  { %4591 = vtanh.f32 %v3493_v4 }
0x1b8a   :  { %v4592_v14 = vpop.eup %4591 }
0x1b8b   :  { %3497 = vrot.lane.b32.xlu0 %v4592_v14, %s4985_s16 }
0x1bfd   :  { %v3498_v7 = vpop.permute.xlu0 %3497 }
0x1bfe   :  { %v3500_v17 = vmul.f32 %v3498_v7, %v3495_v49 }
0x1c00   :  { %v3502_v26 = vadd.f32 %v3501_v3, %v3500_v17 }
0x1c02   :  { %3504 = vrot.lane.b32.xlu1 %v3502_v26, %s4985_s16 }
0x1c74   :  { %v3505_v35 = vpop.permute.xlu1 %3504 }
0x1c75   :  { %4441 = vmatmul.mubr.msk.f32.vlgmr.msra.gmra.mxu0 %vm272_vm0, %v3505_v35  ;;  %4452 = vmatmul.mubr.msk.f32.vlgmr.msra.gmra.mxu1 %vm272_vm0, %v3505_v35 }
0x1c76   :  { %4455 = vmatpush3.msra.mxu0 %v4617_v53  ;;  %4462 = vmatprep.mubr.msk.f32.mxu0 %vm4986_vm11, %v4980_v2 }
0x1c77   :  { %4456 = vmatprep.subr.mxu0 %v4980_v2 }
0x1c78   :  { %4457 = vmatpush3.msra.mxu0 %v4618_v29 }
0x1c79   :  { %4458 = vmatprep.subr.mxu0 %v4980_v2 }
0x1c7a   :  { %4459 = vmatpush3.msra.mxu0 %v4619_v43 }
0x1c7b   :  { %4460 = vmatprep.subr.mxu0 %v4980_v2 }
0x1c7c   :  { %4461 = vmatpush3.msra.mxu0 %v4620_v50 }
0x1d35   :  { %v3574_v36 = vpop.f32.mrf.mxu0  ;;  %v3651_v27 = vpop.f32.mrf.mxu1 }
0x1d36   :  { %v3575_v37 = vadd.f32 %v6044_v40, %v3574_v36  ;;  %v3652_v39 = vadd.f32 %v5975_v34, %v3651_v27 }
0x1d37   :  { %v4442_v42 = vpop.f32.mrf.mxu0  ;;  %v4453_v44 = vpop.f32.mrf.mxu1 }
0x1d38   :  { %3663 = vrot.lane.b32.xlu1 %v3652_v39, %s4971_s13  ;;  %3580 = vperm.xlu0 %4499, %v3575_v37  }
0x1daa   :  { %v3664_v11 = vpop.permute.xlu1 %3663 }
0x1db3   :  { %v3581_v45 = vpop.permute.xlu0 %3580 }
0x1db4   :  { %v3583_v46 = vmul.f32 %v5982_v6, %v3581_v45 }
0x1db6   :  { %v3584_v47 = vadd.f32 %v5988_v21, %v3583_v46 }
0x1db8   :  { %v3655_v2 = vadd.f32 %v3652_v39, %v3584_v47 }
0x1dba   :  { %v3912_v22 = vmul.f32 -1.442695, %v3655_v2 }
0x1dbc   :  { %4593 = vpow2.f32 %v3912_v22 }
0x1dc9   :  { %v4594_v60 = vpop.eup %4593 }
0x1dca   :  { %v3659_v61 = vadd.f32 1.0, %v4594_v60 }
0x1dcc   :  { %4595 = vrcp.f32 %v3659_v61 }
0x1dd9   :  { %v4596_v0 = vpop.eup %4595 }
0x1dda   :  { %v3666_v48 = vmul.f32 %v4596_v0, %v3664_v11  ;;  %v3673_v6 = vsub.f32 1.0, %v4596_v0  ;;  %v3679_v32 = vmul.f32 %v4596_v0, %v3502_v26 }
0x1ddc   :  { %3668 = vrot.lane.b32.xlu0 %v3666_v48, %s4971_s13  ;;  %s4992_s13 = smov 6  }
0x1e4e   :  { %v3669_v34 = vpop.permute.xlu0 %3668 }
0x1e4f   :  { %v3671_v28 = vadd.f32 %v3669_v34, %v3584_v47 }
0x1e51   :  { %4597 = vtanh.f32 %v3671_v28 }
0x1e5e   :  { %v4598_v62 = vpop.eup %4597 }
0x1e5f   :  { %3675 = vrot.lane.b32.xlu1 %v4598_v62, %s4985_s16 }
0x1e63   :  { %3783 = vrot.lane.b32.xlu1 %v5740_v31, %s4988_s23  ;;  %v4622_v31 = vld [vmem:[#allocation3] ss:$0 sm:$0xff] }
0x1e67   :  { %3786 = vrot.lane.b32.xlu1 %v5814_v51, %s4989_s7  ;;  %v3219_v51 = vadd.f32 %v4622_v31, %v5992_v59 }
0x1e6b   :  { %3789 = vrot.lane.b32.xlu1 %v5896_v23, %s4990_s4 }
0x1e6f   :  { %3792 = vrot.lane.b32.xlu1 %v5969_v33, %s4972_s3 }
0x1e73   :  { %3795 = vrot.lane.b32.xlu1 %v6027_v58, %s4991_s8 }
0x1e77   :  { %3798 = vrot.lane.b32.xlu1 %v3575_v37, %s4992_s13 }
0x1ed1   :  { %v3676_v21 = vpop.permute.xlu1 %3675 }
0x1ed2   :  { %v3678_v52 = vmul.f32 %v3676_v21, %v3673_v6 }
0x1ed4   :  { %v3680_v53 = vadd.f32 %v3679_v32, %v3678_v52 }
0x1ed6   :  { %3682 = vrot.lane.b32.xlu0 %v3680_v53, %s4985_s16 }
0x1eda   :  { %3756 = vrot.lane.b32.xlu0 %v5675_v41, %s4988_s23 }
0x1ede   :  { %3759 = vrot.lane.b32.xlu0 %v5749_v54, %s4989_s7 }
0x1ee2   :  { %3762 = vrot.lane.b32.xlu0 %v5823_v13, %s4990_s4 }
0x1ee6   :  { %3765 = vrot.lane.b32.xlu0 %v5905_v38, %s4972_s3  ;;  %s4993_s3 = smov [#allocation29]  }
0x1ee7   :  { %s3822_s16 = sshll.u32 %s4993_s3, 4  ;;  %s3823_s16 = int_to_ptr.vmem [resolvable:$true] %s3822_s16 }
0x1ee8   :  { %s4923_s14 = scalar_lea.vmem %s3823_s16, 32  ;;  %p4928_p6 = scmp.lt.s32.totalorder %s3823_s16, %s3823_s16 }
0x1ee9   :  { %p4924_p5 = scmp.ne.s32.totalorder %s3823_s16, %s4923_s14  ;;  %p4929_p7 = scmp.lt.s32.totalorder %s4923_s14, %s4923_s14 }
0x1eea   :  { %3769 = vrot.lane.b32.xlu0 %v3219_v51, %s4991_s8 }
0x1eeb   :  { %p4930_p8 = por %p4929_p7, %p4928_p6 }
0x1eed   :  { %p4931_p9 = pnand %p4930_p8, %p4924_p5 }
0x1f48   :  { %v3683_v23 = vpop.permute.xlu0 %3682 }
0x1f49   :  { %4463 = vmatmul.mubr.msk.f32.vlgmr.msra.gmra.mxu0 %vm272_vm0, %v3683_v23 }
0x1f4c   :  { %v3757_v33 = vpop.permute.xlu0 %3756 }
0x1f4d   :  { %v3773_v41 = vsel %vm3772_vm13, %v5570_v1, %v3757_v33 }
0x1f50   :  { %v3760_v29 = vpop.permute.xlu0 %3759 }
0x1f51   :  { %v3775_v54 = vsel %vm3774_vm14, %v3773_v41, %v3760_v29 }
0x1f54   :  { %v3763_v43 = vpop.permute.xlu0 %3762 }
0x1f55   :  { %v3777_v13 = vsel %vm3776_vm15, %v3775_v54, %v3763_v43 }
0x1f58   :  { %v3766_v50 = vpop.permute.xlu0 %3765 }
0x1f59   :  { %v3778_v38 = vsel %vm277_vm1, %v3777_v13, %v3766_v50 }
0x1f5c   :  { %v3770_v59 = vpop.permute.xlu0 %3769 }
0x1f5d   :  { %v3780_v55 = vsel %vm3779_vm3, %v3778_v38, %v3770_v59 }
0x1f5e   :  { %3782 = vst.msk [vmem:[#allocation29] sm:$0x3] %vm3781_vm2, %v3780_v55 }
0x1f5f   :  { %4934 = shalt.err (!%p4931_p9)
}
0x1f60   :  { %3825 = dma.vmem_to_hbm [thread:$0]  %s3823_s16, 32, %s6110_s25, [#allocation7]   ;;  %v3784_v57 = vpop.permute.xlu1 %3783  ;;  %vm3810_vm0 = vcmask 48128   ;;  %vm3812_vm4 = vcmask 56320   ;;  %vm3814_vm5 = vcmask 58368  }
0x1f61   :  { %s4994_s2 = smov 7   ;;  %v3805_v16 = vsel %vm3772_vm13, %v5666_v9, %v3784_v57 }
0x1f64   :  { %v3787_v5 = vpop.permute.xlu1 %3786 }
0x1f65   :  { %v3806_v20 = vsel %vm3774_vm14, %v3805_v16, %v3787_v5 }
0x1f68   :  { %v3790_v25 = vpop.permute.xlu1 %3789 }
0x1f69   :  { %v3807_v30 = vsel %vm3776_vm15, %v3806_v20, %v3790_v25 }
0x1f6c   :  { %v3793_v63 = vpop.permute.xlu1 %3792 }
0x1f6d   :  { %v3808_v10 = vsel %vm277_vm1, %v3807_v30, %v3793_v63 }
0x1f70   :  { %v3796_v8 = vpop.permute.xlu1 %3795 }
0x1f71   :  { %v3809_v15 = vsel %vm3779_vm3, %v3808_v10, %v3796_v8 }
0x1f74   :  { %v3799_v18 = vpop.permute.xlu1 %3798 }
0x1f75   :  { %v3811_v24 = vsel %vm3810_vm0, %v3809_v15, %v3799_v18 }
0x2009   :  { %v3752_v1 = vpop.f32.mrf.mxu0 }
0x200a   :  { %v3753_v56 = vadd.f32 %v6044_v40, %v3752_v1 }
0x200b   :  { %v4464_v58 = vpop.f32.mrf.mxu0 }
0x200c   :  { %3802 = vrot.lane.b32.xlu0 %v3753_v56, %s4994_s2 }
0x207e   :  { %v3803_v19 = vpop.permute.xlu0 %3802 }
0x207f   :  { %v3813_v12 = vsel %vm3812_vm4, %v3811_v24, %v3803_v19 }
0x2080   :  { %3815 = vst.msk [vmem:[%s6111_s26] sm:$0x3] %vm3814_vm5, %v3813_v12 }
0x2081   :  { %4959 = dma.done.wait [#allocation7], 32  }
0x2082   :  { %4960 = vsyncadd [#allocation7], 4294967264 }
0x2083   :  { %3833 = vsyncpa [#allocation6], 1 }
0x2084   :  { %3834 = vsyncpa [#allocation9], 1 }
0x2085   :  { %3835 = vsyncpa [#allocation12], 1 }
0x2086   :  { %3836 = vsyncpa [#allocation15], 1 }
0x2087   :  { %3837 = vsyncpa [#allocation18], 1 }
0x2088   :  { %3838 = vsyncpa [#allocation21], 1 }
0x2089   :  { %3839 = vsyncpa [#allocation24], 1 }
0x208a   :  { %3840 = vsyncpa [#allocation27], 1 }
0x208b   :  { %3841 = vsyncpa [#allocation7], 1 }

</bundles_post_ra>
